<compile_context>
chip_gen: v5e
topology: v5e:2x2
jax: 0.10.0
libtpu: 0.0.40
codegen_flags: <defaults>
</compile_context>

<pallas_src>
import math

import numpy as np

import jax
import jax.numpy as jnp
from jax.experimental import pallas as pl
from jax.experimental.pallas import tpu as pltpu


def _cdiv(a, b):
    return -(-a // b)


def _conv_out(size, k, s):
    return (size - k) // s + 1


def _layer_defs(n_input_channels, features_dim):
    if features_dim == 3136:
        return [(n_input_channels, 32, 8, 4), (32, 64, 4, 2), (64, 64, 3, 1)]
    if features_dim == 576:
        return [(n_input_channels, 64, 8, 4), (64, 64, 8, 2),
                (64, 64, 4, 1), (64, 64, 2, 1)]
    raise ValueError("unsupported features_dim")


class _LayerCfg:
    """Static geometry of one Conv2d+ReLU layer (pure Python ints)."""

    def __init__(self, h_in, w_in, c_in, c_out, k, s, f_in, f_out):
        self.h_in, self.w_in, self.c_in = h_in, w_in, c_in
        self.c_out, self.k, self.s = c_out, k, s
        self.h_out = _conv_out(h_in, k, s)
        self.w_out = _conv_out(w_in, k, s)
        self.f_in, self.f_out = f_in, f_out      # H phase-split factors
        self.wc_in = w_in * c_in                 # lane width of the input rows
        self.wc_out = self.w_out * c_out         # lane width of the output rows


def _build_cfgs(observation_shape, layer_defs):
    _, h, w = observation_shape
    strides = [s for (_, _, _, s) in layer_defs]
    # F_L = 1, F_{l-1} = s_l * F_l  (activation l is read with row-stride s_{l+1})
    f = [1] * (len(layer_defs) + 1)
    for l in range(len(layer_defs) - 1, -1, -1):
        f[l] = strides[l] * f[l + 1]
    cfgs = []
    for l, (c_in, c_out, k, s) in enumerate(layer_defs):
        cfg = _LayerCfg(h, w, c_in, c_out, k, s, f[l], f[l + 1])
        cfgs.append(cfg)
        h, w = cfg.h_out, cfg.w_out
    return cfgs


def _build_toeplitz(weight, stride, w_in, w_out, dtype):
    """weight (O,C,kh,kw) -> T (kh, w_in*C, w_out*O) with
       T[i, (stride*wo + j)*C + c, wo*O + o] = weight[o, c, i, j]."""
    o_dim, c_dim, kh, kw = weight.shape
    wo = np.arange(w_out)[:, None, None, None]
    j = np.arange(kw)[None, :, None, None]
    c = np.arange(c_dim)[None, None, :, None]
    o = np.arange(o_dim)[None, None, None, :]
    shape = (w_out, kw, c_dim, o_dim)
    rows = np.broadcast_to((stride * wo + j) * c_dim + c, shape).reshape(-1)
    cols = np.broadcast_to(wo * o_dim + o, shape).reshape(-1)
    # vals[i, wo, j, c, o] = weight[o, c, i, j]
    w_t = jnp.transpose(weight.astype(jnp.float32), (2, 3, 1, 0))   # (kh,kw,C,O)
    vals = jnp.broadcast_to(w_t[:, None], (kh,) + shape).reshape(kh, -1)
    t = jnp.zeros((kh, w_in * c_dim, w_out * o_dim), jnp.float32)
    t = t.at[:, rows, cols].set(vals)
    return t.astype(dtype)


def _make_fused_kernel(cfgs, compute_dtype):
    """Fused forward kernel: one grid step == one image through all layers."""
    n_layers = len(cfgs)

    def kernel(*refs):
        x_ref = refs[0]                                  # (1, F0, G0, W0*C0)
        layer_refs = refs[1:1 + 2 * n_layers]            # (T_l, b_l) pairs
        out_ref = refs[1 + 2 * n_layers]                 # (1, H_L, W_L*C_L)
        act_scratch = refs[2 + 2 * n_layers:]            # L-1 VMEM activation bufs

        def read_rows(layer, phase, q0, m):
            # Contiguous static slice: rows of the phase-split activation.
            if layer == 0:
                return x_ref[0, phase, q0:q0 + m, :]
            return act_scratch[layer - 1][phase, q0:q0 + m, :]

        for l, cfg in enumerate(cfgs):
            t_ref = layer_refs[2 * l]
            b_ref = layer_refs[2 * l + 1]
            for p in range(cfg.f_out):                   # output-row phase groups
                m = _cdiv(cfg.h_out - p, cfg.f_out)      # rows in this group
                if m <= 0:
                    continue
                acc = None
                for i in range(cfg.k):                   # kernel-row offsets
                    h0 = cfg.s * p + i
                    r, q0 = h0 % cfg.f_in, h0 // cfg.f_in
                    lhs = read_rows(l, r, q0, m).astype(compute_dtype)
                    part = jnp.dot(lhs, t_ref[i],
                                   preferred_element_type=jnp.float32)
                    acc = part if acc is None else acc + part
                y = jnp.maximum(acc + b_ref[...], 0.0)   # fused bias + ReLU (f32)
                if l == n_layers - 1:
                    out_ref[0, 0:m, :] = y.astype(out_ref.dtype)
                else:
                    act_scratch[l][p, 0:m, :] = y

    return kernel


def make_encoder_forward(params, observation_shape, features_dim,
                         compute_dtype=jnp.bfloat16):
    """Builds a jitted forward(x_nchw) -> (N, n_flatten) fused Pallas encoder."""
    layer_defs = _layer_defs(observation_shape[0], features_dim)
    cfgs = _build_cfgs(observation_shape, layer_defs)
    n_layers = len(cfgs)
    assert len(params) == n_layers

    # One-time weight prep: block-Toeplitz matmul weights + tiled biases.
    layer_args = []
    for cfg, (w, b, s) in zip(cfgs, params):
        assert s == cfg.s and w.shape == (cfg.c_out, cfg.c_in, cfg.k, cfg.k)
        t = _build_toeplitz(w, cfg.s, cfg.w_in, cfg.w_out, compute_dtype)
        bias = jnp.tile(b.astype(jnp.float32), cfg.w_out).reshape(1, cfg.wc_out)
        layer_args += [t, bias]

    c0, h0, w0 = observation_shape
    f0 = cfgs[0].f_in
    g0 = _cdiv(h0, f0)
    last = cfgs[-1]
    h_l, w_l, c_l = last.h_out, last.w_out, last.c_out

    kernel = _make_fused_kernel(cfgs, compute_dtype)

    in_specs = [pl.BlockSpec((1, f0, g0, w0 * c0), lambda n: (n, 0, 0, 0))]
    for cfg in cfgs:
        in_specs.append(
            pl.BlockSpec((cfg.k, cfg.wc_in, cfg.wc_out), lambda n: (0, 0, 0)))
        in_specs.append(pl.BlockSpec((1, cfg.wc_out), lambda n: (0, 0)))
    out_specs = pl.BlockSpec((1, h_l, w_l * c_l), lambda n: (n, 0, 0))
    scratch_shapes = [
        pltpu.VMEM((cfg.f_out, _cdiv(cfg.h_out, cfg.f_out), cfg.wc_out),
                   jnp.float32)
        for cfg in cfgs[:-1]
    ]

    def forward(x):
        x = x.astype(jnp.float32)
        n = x.shape[0]
        # NCHW -> (N, F0, G0, W*C): phase-split NHWC rows.  Single cheap XLA
        # pass over the raw observation; everything after this stays in VMEM.
        a = jnp.transpose(x, (0, 2, 3, 1)).reshape(n, h0, w0 * c0)
        a = jnp.pad(a, ((0, 0), (0, f0 * g0 - h0), (0, 0)))
        a = a.reshape(n, g0, f0, w0 * c0).transpose(0, 2, 1, 3)

        out = pl.pallas_call(
            kernel,
            out_shape=jax.ShapeDtypeStruct((n, h_l, w_l * c_l), jnp.float32),
            grid=(n,),
            in_specs=in_specs,
            out_specs=out_specs,
            scratch_shapes=scratch_shapes,
            compiler_params=pltpu.CompilerParams(
                dimension_semantics=("parallel",),
                vmem_limit_bytes=32 * 1024 * 1024,
            ),
        )(a, *layer_args)

        # PyTorch Flatten order is NCHW channel-major; the feature map is tiny,
        # so this final reorder outside the kernel is negligible.
        out = out.reshape(n, h_l, w_l, c_l).transpose(0, 3, 1, 2)
        return out.reshape(n, c_l * h_l * w_l)

    return jax.jit(forward)


def init_params(key, observation_shape, features_dim=3136):
    """Deterministic params matching the nn.Conv2d shapes of CNNEncoderNew."""
    params = []
    for (c_in, c_out, k, s) in _layer_defs(observation_shape[0], features_dim):
        key, wk, bk = jax.random.split(key, 3)
        bound = 1.0 / math.sqrt(c_in * k * k)   # PyTorch default uniform init
        w = jax.random.uniform(wk, (c_out, c_in, k, k), jnp.float32, -bound, bound)
        b = jax.random.uniform(bk, (c_out,), jnp.float32, -bound, bound)
        params.append((w, b, s))
    return params


def reference_forward(x, params):
    """Pure-JAX reference (lax conv) for correctness checking."""
    x = x.astype(jnp.float32)
    for (w, b, s) in params:
        x = jax.lax.conv_general_dilated(
            x, w, window_strides=(s, s), padding="VALID",
            dimension_numbers=("NCHW", "OIHW", "NCHW"),
            precision=jax.lax.Precision.HIGHEST)
        x = jax.nn.relu(x + b.reshape(1, -1, 1, 1))
    return x.reshape(x.shape[0], -1)


if __name__ == "__main__":
    key = jax.random.PRNGKey(0)
    # Small shapes consistent with the module: 36x36 is the smallest-ish spatial
    # size that survives k8/s4 -> k4/s2 -> k3/s1 VALID convs (final map 1x1).
    observation_shape = (4, 36, 36)
    batch = 2

    pkey, xkey = jax.random.split(key)
    params = init_params(pkey, observation_shape, features_dim=3136)
    x = jax.random.normal(xkey, (batch,) + observation_shape, jnp.float32)

    ref = reference_forward(x, params)

    # float32 compute: proves the fused Toeplitz / phase-split indexing exactly.
    fwd_f32 = make_encoder_forward(params, observation_shape, 3136,
                                   compute_dtype=jnp.float32)
    out_f32 = jax.block_until_ready(fwd_f32(x))
    assert out_f32.shape == (batch, 64), out_f32.shape
    if not bool(jnp.allclose(out_f32, ref, rtol=1e-2, atol=1e-2)):
        raise AssertionError(
            "f32 Pallas vs reference mismatch, max abs err="
            f"{float(jnp.max(jnp.abs(out_f32 - ref)))}")

    # bfloat16 MXU operands (fast path on v6e/v7x), float32 accumulation.
    fwd_bf16 = make_encoder_forward(params, observation_shape, 3136,
                                    compute_dtype=jnp.bfloat16)
    out_bf16 = jax.block_until_ready(fwd_bf16(x))
    assert out_bf16.shape == (batch, 64), out_bf16.shape
    if not bool(jnp.allclose(out_bf16, ref, rtol=5e-2, atol=5e-2)):
        raise AssertionError(
            "bf16 Pallas vs reference mismatch, max abs err="
            f"{float(jnp.max(jnp.abs(out_bf16 - ref)))}")

    print("KERNEL_OK")
</pallas_src>

<mosaic_0001>
module attributes {stable_mosaic.version = 11 : i64} {
  func.func @kernel(%arg0: i32, %arg1: memref<1x8x5x144xf32, #tpu.memory_space<vmem>>, %arg2: memref<8x144x256xf32, #tpu.memory_space<vmem>>, %arg3: memref<1x256xf32, #tpu.memory_space<vmem>>, %arg4: memref<4x256x192xf32, #tpu.memory_space<vmem>>, %arg5: memref<1x192xf32, #tpu.memory_space<vmem>>, %arg6: memref<3x192x64xf32, #tpu.memory_space<vmem>>, %arg7: memref<1x64xf32, #tpu.memory_space<vmem>>, %arg8: memref<1x1x64xf32, #tpu.memory_space<vmem>>, %arg9: memref<2x4x256xf32, #tpu.memory_space<vmem>>, %arg10: memref<1x3x192xf32, #tpu.memory_space<vmem>>) attributes {dimension_semantics = [#tpu.dimension_semantics<parallel>], iteration_bounds = array<i64: 2>, scalar_prefetch = 0 : i64, scratch_operands = 2 : i64, tpu.core_type = #tpu.core_type<tc>, window_params = [{transform_indices = @transform_0, window_bounds = array<i64: 1, 8, 5, 144>}, {pipeline_mode = #tpu.pipeline_mode<synchronous>, transform_indices = @transform_1, window_bounds = array<i64: 8, 144, 256>}, {pipeline_mode = #tpu.pipeline_mode<synchronous>, transform_indices = @transform_2, window_bounds = array<i64: 1, 256>}, {pipeline_mode = #tpu.pipeline_mode<synchronous>, transform_indices = @transform_3, window_bounds = array<i64: 4, 256, 192>}, {pipeline_mode = #tpu.pipeline_mode<synchronous>, transform_indices = @transform_4, window_bounds = array<i64: 1, 192>}, {pipeline_mode = #tpu.pipeline_mode<synchronous>, transform_indices = @transform_5, window_bounds = array<i64: 3, 192, 64>}, {pipeline_mode = #tpu.pipeline_mode<synchronous>, transform_indices = @transform_6, window_bounds = array<i64: 1, 64>}, {transform_indices = @transform_7, window_bounds = array<i64: 1, 1, 64>}]} {
    %c0 = arith.constant 0 : index
    %c0_0 = arith.constant 0 : index
    %c0_1 = arith.constant 0 : index
    %c0_2 = arith.constant 0 : index
    %0 = vector.load %arg1[%c0, %c0_0, %c0_1, %c0_2] : memref<1x8x5x144xf32, #tpu.memory_space<vmem>>, vector<1x1x4x144xf32>
    %1 = vector.shape_cast %0 : vector<1x1x4x144xf32> to vector<4x144xf32>
    %c0_3 = arith.constant 0 : index
    %c0_4 = arith.constant 0 : index
    %c0_5 = arith.constant 0 : index
    %2 = vector.load %arg2[%c0_3, %c0_4, %c0_5] : memref<8x144x256xf32, #tpu.memory_space<vmem>>, vector<1x144x256xf32>
    %3 = vector.shape_cast %2 : vector<1x144x256xf32> to vector<144x256xf32>
    %cst = arith.constant dense<0.000000e+00> : vector<4x256xf32>
    %4 = tpu.matmul %1, %3, %cst {dimension_numbers = #tpu.dot_dimension_numbers<[1], [0], [0], [1], [0, 0, 1, 1], [], []>} : vector<4x144xf32>, vector<144x256xf32>, vector<4x256xf32> -> vector<4x256xf32>
    %c0_6 = arith.constant 0 : index
    %c1 = arith.constant 1 : index
    %c0_7 = arith.constant 0 : index
    %c0_8 = arith.constant 0 : index
    %5 = vector.load %arg1[%c0_6, %c1, %c0_7, %c0_8] : memref<1x8x5x144xf32, #tpu.memory_space<vmem>>, vector<1x1x4x144xf32>
    %6 = vector.shape_cast %5 : vector<1x1x4x144xf32> to vector<4x144xf32>
    %c1_9 = arith.constant 1 : index
    %c0_10 = arith.constant 0 : index
    %c0_11 = arith.constant 0 : index
    %7 = vector.load %arg2[%c1_9, %c0_10, %c0_11] : memref<8x144x256xf32, #tpu.memory_space<vmem>>, vector<1x144x256xf32>
    %8 = vector.shape_cast %7 : vector<1x144x256xf32> to vector<144x256xf32>
    %cst_12 = arith.constant dense<0.000000e+00> : vector<4x256xf32>
    %9 = tpu.matmul %6, %8, %cst_12 {dimension_numbers = #tpu.dot_dimension_numbers<[1], [0], [0], [1], [0, 0, 1, 1], [], []>} : vector<4x144xf32>, vector<144x256xf32>, vector<4x256xf32> -> vector<4x256xf32>
    %10 = arith.addf %4, %9 : vector<4x256xf32>
    %c0_13 = arith.constant 0 : index
    %c2 = arith.constant 2 : index
    %c0_14 = arith.constant 0 : index
    %c0_15 = arith.constant 0 : index
    %11 = vector.load %arg1[%c0_13, %c2, %c0_14, %c0_15] : memref<1x8x5x144xf32, #tpu.memory_space<vmem>>, vector<1x1x4x144xf32>
    %12 = vector.shape_cast %11 : vector<1x1x4x144xf32> to vector<4x144xf32>
    %c2_16 = arith.constant 2 : index
    %c0_17 = arith.constant 0 : index
    %c0_18 = arith.constant 0 : index
    %13 = vector.load %arg2[%c2_16, %c0_17, %c0_18] : memref<8x144x256xf32, #tpu.memory_space<vmem>>, vector<1x144x256xf32>
    %14 = vector.shape_cast %13 : vector<1x144x256xf32> to vector<144x256xf32>
    %cst_19 = arith.constant dense<0.000000e+00> : vector<4x256xf32>
    %15 = tpu.matmul %12, %14, %cst_19 {dimension_numbers = #tpu.dot_dimension_numbers<[1], [0], [0], [1], [0, 0, 1, 1], [], []>} : vector<4x144xf32>, vector<144x256xf32>, vector<4x256xf32> -> vector<4x256xf32>
    %16 = arith.addf %10, %15 : vector<4x256xf32>
    %c0_20 = arith.constant 0 : index
    %c3 = arith.constant 3 : index
    %c0_21 = arith.constant 0 : index
    %c0_22 = arith.constant 0 : index
    %17 = vector.load %arg1[%c0_20, %c3, %c0_21, %c0_22] : memref<1x8x5x144xf32, #tpu.memory_space<vmem>>, vector<1x1x4x144xf32>
    %18 = vector.shape_cast %17 : vector<1x1x4x144xf32> to vector<4x144xf32>
    %c3_23 = arith.constant 3 : index
    %c0_24 = arith.constant 0 : index
    %c0_25 = arith.constant 0 : index
    %19 = vector.load %arg2[%c3_23, %c0_24, %c0_25] : memref<8x144x256xf32, #tpu.memory_space<vmem>>, vector<1x144x256xf32>
    %20 = vector.shape_cast %19 : vector<1x144x256xf32> to vector<144x256xf32>
    %cst_26 = arith.constant dense<0.000000e+00> : vector<4x256xf32>
    %21 = tpu.matmul %18, %20, %cst_26 {dimension_numbers = #tpu.dot_dimension_numbers<[1], [0], [0], [1], [0, 0, 1, 1], [], []>} : vector<4x144xf32>, vector<144x256xf32>, vector<4x256xf32> -> vector<4x256xf32>
    %22 = arith.addf %16, %21 : vector<4x256xf32>
    %c0_27 = arith.constant 0 : index
    %c4 = arith.constant 4 : index
    %c0_28 = arith.constant 0 : index
    %c0_29 = arith.constant 0 : index
    %23 = vector.load %arg1[%c0_27, %c4, %c0_28, %c0_29] : memref<1x8x5x144xf32, #tpu.memory_space<vmem>>, vector<1x1x4x144xf32>
    %24 = vector.shape_cast %23 : vector<1x1x4x144xf32> to vector<4x144xf32>
    %c4_30 = arith.constant 4 : index
    %c0_31 = arith.constant 0 : index
    %c0_32 = arith.constant 0 : index
    %25 = vector.load %arg2[%c4_30, %c0_31, %c0_32] : memref<8x144x256xf32, #tpu.memory_space<vmem>>, vector<1x144x256xf32>
    %26 = vector.shape_cast %25 : vector<1x144x256xf32> to vector<144x256xf32>
    %cst_33 = arith.constant dense<0.000000e+00> : vector<4x256xf32>
    %27 = tpu.matmul %24, %26, %cst_33 {dimension_numbers = #tpu.dot_dimension_numbers<[1], [0], [0], [1], [0, 0, 1, 1], [], []>} : vector<4x144xf32>, vector<144x256xf32>, vector<4x256xf32> -> vector<4x256xf32>
    %28 = arith.addf %22, %27 : vector<4x256xf32>
    %c0_34 = arith.constant 0 : index
    %c5 = arith.constant 5 : index
    %c0_35 = arith.constant 0 : index
    %c0_36 = arith.constant 0 : index
    %29 = vector.load %arg1[%c0_34, %c5, %c0_35, %c0_36] : memref<1x8x5x144xf32, #tpu.memory_space<vmem>>, vector<1x1x4x144xf32>
    %30 = vector.shape_cast %29 : vector<1x1x4x144xf32> to vector<4x144xf32>
    %c5_37 = arith.constant 5 : index
    %c0_38 = arith.constant 0 : index
    %c0_39 = arith.constant 0 : index
    %31 = vector.load %arg2[%c5_37, %c0_38, %c0_39] : memref<8x144x256xf32, #tpu.memory_space<vmem>>, vector<1x144x256xf32>
    %32 = vector.shape_cast %31 : vector<1x144x256xf32> to vector<144x256xf32>
    %cst_40 = arith.constant dense<0.000000e+00> : vector<4x256xf32>
    %33 = tpu.matmul %30, %32, %cst_40 {dimension_numbers = #tpu.dot_dimension_numbers<[1], [0], [0], [1], [0, 0, 1, 1], [], []>} : vector<4x144xf32>, vector<144x256xf32>, vector<4x256xf32> -> vector<4x256xf32>
    %34 = arith.addf %28, %33 : vector<4x256xf32>
    %c0_41 = arith.constant 0 : index
    %c6 = arith.constant 6 : index
    %c0_42 = arith.constant 0 : index
    %c0_43 = arith.constant 0 : index
    %35 = vector.load %arg1[%c0_41, %c6, %c0_42, %c0_43] : memref<1x8x5x144xf32, #tpu.memory_space<vmem>>, vector<1x1x4x144xf32>
    %36 = vector.shape_cast %35 : vector<1x1x4x144xf32> to vector<4x144xf32>
    %c6_44 = arith.constant 6 : index
    %c0_45 = arith.constant 0 : index
    %c0_46 = arith.constant 0 : index
    %37 = vector.load %arg2[%c6_44, %c0_45, %c0_46] : memref<8x144x256xf32, #tpu.memory_space<vmem>>, vector<1x144x256xf32>
    %38 = vector.shape_cast %37 : vector<1x144x256xf32> to vector<144x256xf32>
    %cst_47 = arith.constant dense<0.000000e+00> : vector<4x256xf32>
    %39 = tpu.matmul %36, %38, %cst_47 {dimension_numbers = #tpu.dot_dimension_numbers<[1], [0], [0], [1], [0, 0, 1, 1], [], []>} : vector<4x144xf32>, vector<144x256xf32>, vector<4x256xf32> -> vector<4x256xf32>
    %40 = arith.addf %34, %39 : vector<4x256xf32>
    %c0_48 = arith.constant 0 : index
    %c7 = arith.constant 7 : index
    %c0_49 = arith.constant 0 : index
    %c0_50 = arith.constant 0 : index
    %41 = vector.load %arg1[%c0_48, %c7, %c0_49, %c0_50] : memref<1x8x5x144xf32, #tpu.memory_space<vmem>>, vector<1x1x4x144xf32>
    %42 = vector.shape_cast %41 : vector<1x1x4x144xf32> to vector<4x144xf32>
    %c7_51 = arith.constant 7 : index
    %c0_52 = arith.constant 0 : index
    %c0_53 = arith.constant 0 : index
    %43 = vector.load %arg2[%c7_51, %c0_52, %c0_53] : memref<8x144x256xf32, #tpu.memory_space<vmem>>, vector<1x144x256xf32>
    %44 = vector.shape_cast %43 : vector<1x144x256xf32> to vector<144x256xf32>
    %cst_54 = arith.constant dense<0.000000e+00> : vector<4x256xf32>
    %45 = tpu.matmul %42, %44, %cst_54 {dimension_numbers = #tpu.dot_dimension_numbers<[1], [0], [0], [1], [0, 0, 1, 1], [], []>} : vector<4x144xf32>, vector<144x256xf32>, vector<4x256xf32> -> vector<4x256xf32>
    %46 = arith.addf %40, %45 : vector<4x256xf32>
    %c0_55 = arith.constant 0 : index
    %c0_56 = arith.constant 0 : index
    %47 = vector.load %arg3[%c0_55, %c0_56] : memref<1x256xf32, #tpu.memory_space<vmem>>, vector<1x256xf32>
    %48 = vector.broadcast %47 : vector<1x256xf32> to vector<4x256xf32>
    %49 = arith.addf %46, %48 : vector<4x256xf32>
    %cst_57 = arith.constant 0.000000e+00 : f32
    %50 = vector.broadcast %cst_57 : f32 to vector<4x256xf32>
    %51 = arith.maximumf %49, %50 : vector<4x256xf32>
    %c0_58 = arith.constant 0 : index
    %c0_59 = arith.constant 0 : index
    %c0_60 = arith.constant 0 : index
    %52 = vector.load %arg9[%c0_58, %c0_59, %c0_60] : memref<2x4x256xf32, #tpu.memory_space<vmem>>, vector<1x4x256xf32>
    %53 = vector.shape_cast %52 : vector<1x4x256xf32> to vector<4x256xf32>
    %54 = vector.shape_cast %51 : vector<4x256xf32> to vector<1x4x256xf32>
    tpu.vector_store %arg9[%c0_58, %c0_59, %c0_60], %54 {strides = array<i32>} : memref<2x4x256xf32, #tpu.memory_space<vmem>>, vector<1x4x256xf32>,
    %c0_61 = arith.constant 0 : index
    %c4_62 = arith.constant 4 : index
    %c0_63 = arith.constant 0 : index
    %c0_64 = arith.constant 0 : index
    %55 = vector.load %arg1[%c0_61, %c4_62, %c0_63, %c0_64] : memref<1x8x5x144xf32, #tpu.memory_space<vmem>>, vector<1x1x4x144xf32>
    %56 = vector.shape_cast %55 : vector<1x1x4x144xf32> to vector<4x144xf32>
    %c0_65 = arith.constant 0 : index
    %c0_66 = arith.constant 0 : index
    %c0_67 = arith.constant 0 : index
    %57 = vector.load %arg2[%c0_65, %c0_66, %c0_67] : memref<8x144x256xf32, #tpu.memory_space<vmem>>, vector<1x144x256xf32>
    %58 = vector.shape_cast %57 : vector<1x144x256xf32> to vector<144x256xf32>
    %cst_68 = arith.constant dense<0.000000e+00> : vector<4x256xf32>
    %59 = tpu.matmul %56, %58, %cst_68 {dimension_numbers = #tpu.dot_dimension_numbers<[1], [0], [0], [1], [0, 0, 1, 1], [], []>} : vector<4x144xf32>, vector<144x256xf32>, vector<4x256xf32> -> vector<4x256xf32>
    %c0_69 = arith.constant 0 : index
    %c5_70 = arith.constant 5 : index
    %c0_71 = arith.constant 0 : index
    %c0_72 = arith.constant 0 : index
    %60 = vector.load %arg1[%c0_69, %c5_70, %c0_71, %c0_72] : memref<1x8x5x144xf32, #tpu.memory_space<vmem>>, vector<1x1x4x144xf32>
    %61 = vector.shape_cast %60 : vector<1x1x4x144xf32> to vector<4x144xf32>
    %c1_73 = arith.constant 1 : index
    %c0_74 = arith.constant 0 : index
    %c0_75 = arith.constant 0 : index
    %62 = vector.load %arg2[%c1_73, %c0_74, %c0_75] : memref<8x144x256xf32, #tpu.memory_space<vmem>>, vector<1x144x256xf32>
    %63 = vector.shape_cast %62 : vector<1x144x256xf32> to vector<144x256xf32>
    %cst_76 = arith.constant dense<0.000000e+00> : vector<4x256xf32>
    %64 = tpu.matmul %61, %63, %cst_76 {dimension_numbers = #tpu.dot_dimension_numbers<[1], [0], [0], [1], [0, 0, 1, 1], [], []>} : vector<4x144xf32>, vector<144x256xf32>, vector<4x256xf32> -> vector<4x256xf32>
    %65 = arith.addf %59, %64 : vector<4x256xf32>
    %c0_77 = arith.constant 0 : index
    %c6_78 = arith.constant 6 : index
    %c0_79 = arith.constant 0 : index
    %c0_80 = arith.constant 0 : index
    %66 = vector.load %arg1[%c0_77, %c6_78, %c0_79, %c0_80] : memref<1x8x5x144xf32, #tpu.memory_space<vmem>>, vector<1x1x4x144xf32>
    %67 = vector.shape_cast %66 : vector<1x1x4x144xf32> to vector<4x144xf32>
    %c2_81 = arith.constant 2 : index
    %c0_82 = arith.constant 0 : index
    %c0_83 = arith.constant 0 : index
    %68 = vector.load %arg2[%c2_81, %c0_82, %c0_83] : memref<8x144x256xf32, #tpu.memory_space<vmem>>, vector<1x144x256xf32>
    %69 = vector.shape_cast %68 : vector<1x144x256xf32> to vector<144x256xf32>
    %cst_84 = arith.constant dense<0.000000e+00> : vector<4x256xf32>
    %70 = tpu.matmul %67, %69, %cst_84 {dimension_numbers = #tpu.dot_dimension_numbers<[1], [0], [0], [1], [0, 0, 1, 1], [], []>} : vector<4x144xf32>, vector<144x256xf32>, vector<4x256xf32> -> vector<4x256xf32>
    %71 = arith.addf %65, %70 : vector<4x256xf32>
    %c0_85 = arith.constant 0 : index
    %c7_86 = arith.constant 7 : index
    %c0_87 = arith.constant 0 : index
    %c0_88 = arith.constant 0 : index
    %72 = vector.load %arg1[%c0_85, %c7_86, %c0_87, %c0_88] : memref<1x8x5x144xf32, #tpu.memory_space<vmem>>, vector<1x1x4x144xf32>
    %73 = vector.shape_cast %72 : vector<1x1x4x144xf32> to vector<4x144xf32>
    %c3_89 = arith.constant 3 : index
    %c0_90 = arith.constant 0 : index
    %c0_91 = arith.constant 0 : index
    %74 = vector.load %arg2[%c3_89, %c0_90, %c0_91] : memref<8x144x256xf32, #tpu.memory_space<vmem>>, vector<1x144x256xf32>
    %75 = vector.shape_cast %74 : vector<1x144x256xf32> to vector<144x256xf32>
    %cst_92 = arith.constant dense<0.000000e+00> : vector<4x256xf32>
    %76 = tpu.matmul %73, %75, %cst_92 {dimension_numbers = #tpu.dot_dimension_numbers<[1], [0], [0], [1], [0, 0, 1, 1], [], []>} : vector<4x144xf32>, vector<144x256xf32>, vector<4x256xf32> -> vector<4x256xf32>
    %77 = arith.addf %71, %76 : vector<4x256xf32>
    %c0_93 = arith.constant 0 : index
    %c0_94 = arith.constant 0 : index
    %c1_95 = arith.constant 1 : index
    %c0_96 = arith.constant 0 : index
    %78 = vector.load %arg1[%c0_93, %c0_94, %c1_95, %c0_96] : memref<1x8x5x144xf32, #tpu.memory_space<vmem>>, vector<1x1x4x144xf32>
    %79 = vector.shape_cast %78 : vector<1x1x4x144xf32> to vector<4x144xf32>
    %c4_97 = arith.constant 4 : index
    %c0_98 = arith.constant 0 : index
    %c0_99 = arith.constant 0 : index
    %80 = vector.load %arg2[%c4_97, %c0_98, %c0_99] : memref<8x144x256xf32, #tpu.memory_space<vmem>>, vector<1x144x256xf32>
    %81 = vector.shape_cast %80 : vector<1x144x256xf32> to vector<144x256xf32>
    %cst_100 = arith.constant dense<0.000000e+00> : vector<4x256xf32>
    %82 = tpu.matmul %79, %81, %cst_100 {dimension_numbers = #tpu.dot_dimension_numbers<[1], [0], [0], [1], [0, 0, 1, 1], [], []>} : vector<4x144xf32>, vector<144x256xf32>, vector<4x256xf32> -> vector<4x256xf32>
    %83 = arith.addf %77, %82 : vector<4x256xf32>
    %c0_101 = arith.constant 0 : index
    %c1_102 = arith.constant 1 : index
    %c1_103 = arith.constant 1 : index
    %c0_104 = arith.constant 0 : index
    %84 = vector.load %arg1[%c0_101, %c1_102, %c1_103, %c0_104] : memref<1x8x5x144xf32, #tpu.memory_space<vmem>>, vector<1x1x4x144xf32>
    %85 = vector.shape_cast %84 : vector<1x1x4x144xf32> to vector<4x144xf32>
    %c5_105 = arith.constant 5 : index
    %c0_106 = arith.constant 0 : index
    %c0_107 = arith.constant 0 : index
    %86 = vector.load %arg2[%c5_105, %c0_106, %c0_107] : memref<8x144x256xf32, #tpu.memory_space<vmem>>, vector<1x144x256xf32>
    %87 = vector.shape_cast %86 : vector<1x144x256xf32> to vector<144x256xf32>
    %cst_108 = arith.constant dense<0.000000e+00> : vector<4x256xf32>
    %88 = tpu.matmul %85, %87, %cst_108 {dimension_numbers = #tpu.dot_dimension_numbers<[1], [0], [0], [1], [0, 0, 1, 1], [], []>} : vector<4x144xf32>, vector<144x256xf32>, vector<4x256xf32> -> vector<4x256xf32>
    %89 = arith.addf %83, %88 : vector<4x256xf32>
    %c0_109 = arith.constant 0 : index
    %c2_110 = arith.constant 2 : index
    %c1_111 = arith.constant 1 : index
    %c0_112 = arith.constant 0 : index
    %90 = vector.load %arg1[%c0_109, %c2_110, %c1_111, %c0_112] : memref<1x8x5x144xf32, #tpu.memory_space<vmem>>, vector<1x1x4x144xf32>
    %91 = vector.shape_cast %90 : vector<1x1x4x144xf32> to vector<4x144xf32>
    %c6_113 = arith.constant 6 : index
    %c0_114 = arith.constant 0 : index
    %c0_115 = arith.constant 0 : index
    %92 = vector.load %arg2[%c6_113, %c0_114, %c0_115] : memref<8x144x256xf32, #tpu.memory_space<vmem>>, vector<1x144x256xf32>
    %93 = vector.shape_cast %92 : vector<1x144x256xf32> to vector<144x256xf32>
    %cst_116 = arith.constant dense<0.000000e+00> : vector<4x256xf32>
    %94 = tpu.matmul %91, %93, %cst_116 {dimension_numbers = #tpu.dot_dimension_numbers<[1], [0], [0], [1], [0, 0, 1, 1], [], []>} : vector<4x144xf32>, vector<144x256xf32>, vector<4x256xf32> -> vector<4x256xf32>
    %95 = arith.addf %89, %94 : vector<4x256xf32>
    %c0_117 = arith.constant 0 : index
    %c3_118 = arith.constant 3 : index
    %c1_119 = arith.constant 1 : index
    %c0_120 = arith.constant 0 : index
    %96 = vector.load %arg1[%c0_117, %c3_118, %c1_119, %c0_120] : memref<1x8x5x144xf32, #tpu.memory_space<vmem>>, vector<1x1x4x144xf32>
    %97 = vector.shape_cast %96 : vector<1x1x4x144xf32> to vector<4x144xf32>
    %c7_121 = arith.constant 7 : index
    %c0_122 = arith.constant 0 : index
    %c0_123 = arith.constant 0 : index
    %98 = vector.load %arg2[%c7_121, %c0_122, %c0_123] : memref<8x144x256xf32, #tpu.memory_space<vmem>>, vector<1x144x256xf32>
    %99 = vector.shape_cast %98 : vector<1x144x256xf32> to vector<144x256xf32>
    %cst_124 = arith.constant dense<0.000000e+00> : vector<4x256xf32>
    %100 = tpu.matmul %97, %99, %cst_124 {dimension_numbers = #tpu.dot_dimension_numbers<[1], [0], [0], [1], [0, 0, 1, 1], [], []>} : vector<4x144xf32>, vector<144x256xf32>, vector<4x256xf32> -> vector<4x256xf32>
    %101 = arith.addf %95, %100 : vector<4x256xf32>
    %c0_125 = arith.constant 0 : index
    %c0_126 = arith.constant 0 : index
    %102 = vector.load %arg3[%c0_125, %c0_126] : memref<1x256xf32, #tpu.memory_space<vmem>>, vector<1x256xf32>
    %103 = vector.broadcast %102 : vector<1x256xf32> to vector<4x256xf32>
    %104 = arith.addf %101, %103 : vector<4x256xf32>
    %cst_127 = arith.constant 0.000000e+00 : f32
    %105 = vector.broadcast %cst_127 : f32 to vector<4x256xf32>
    %106 = arith.maximumf %104, %105 : vector<4x256xf32>
    %c1_128 = arith.constant 1 : index
    %c0_129 = arith.constant 0 : index
    %c0_130 = arith.constant 0 : index
    %107 = vector.load %arg9[%c1_128, %c0_129, %c0_130] : memref<2x4x256xf32, #tpu.memory_space<vmem>>, vector<1x4x256xf32>
    %108 = vector.shape_cast %107 : vector<1x4x256xf32> to vector<4x256xf32>
    %109 = vector.shape_cast %106 : vector<4x256xf32> to vector<1x4x256xf32>
    tpu.vector_store %arg9[%c1_128, %c0_129, %c0_130], %109 {strides = array<i32>} : memref<2x4x256xf32, #tpu.memory_space<vmem>>, vector<1x4x256xf32>,
    %c0_131 = arith.constant 0 : index
    %c0_132 = arith.constant 0 : index
    %c0_133 = arith.constant 0 : index
    %110 = vector.load %arg9[%c0_131, %c0_132, %c0_133] : memref<2x4x256xf32, #tpu.memory_space<vmem>>, vector<1x3x256xf32>
    %111 = vector.shape_cast %110 : vector<1x3x256xf32> to vector<3x256xf32>
    %c0_134 = arith.constant 0 : index
    %c0_135 = arith.constant 0 : index
    %c0_136 = arith.constant 0 : index
    %112 = vector.load %arg4[%c0_134, %c0_135, %c0_136] : memref<4x256x192xf32, #tpu.memory_space<vmem>>, vector<1x256x192xf32>
    %113 = vector.shape_cast %112 : vector<1x256x192xf32> to vector<256x192xf32>
    %cst_137 = arith.constant dense<0.000000e+00> : vector<3x192xf32>
    %114 = tpu.matmul %111, %113, %cst_137 {dimension_numbers = #tpu.dot_dimension_numbers<[1], [0], [0], [1], [0, 0, 1, 1], [], []>} : vector<3x256xf32>, vector<256x192xf32>, vector<3x192xf32> -> vector<3x192xf32>
    %c1_138 = arith.constant 1 : index
    %c0_139 = arith.constant 0 : index
    %c0_140 = arith.constant 0 : index
    %115 = vector.load %arg9[%c1_138, %c0_139, %c0_140] : memref<2x4x256xf32, #tpu.memory_space<vmem>>, vector<1x3x256xf32>
    %116 = vector.shape_cast %115 : vector<1x3x256xf32> to vector<3x256xf32>
    %c1_141 = arith.constant 1 : index
    %c0_142 = arith.constant 0 : index
    %c0_143 = arith.constant 0 : index
    %117 = vector.load %arg4[%c1_141, %c0_142, %c0_143] : memref<4x256x192xf32, #tpu.memory_space<vmem>>, vector<1x256x192xf32>
    %118 = vector.shape_cast %117 : vector<1x256x192xf32> to vector<256x192xf32>
    %cst_144 = arith.constant dense<0.000000e+00> : vector<3x192xf32>
    %119 = tpu.matmul %116, %118, %cst_144 {dimension_numbers = #tpu.dot_dimension_numbers<[1], [0], [0], [1], [0, 0, 1, 1], [], []>} : vector<3x256xf32>, vector<256x192xf32>, vector<3x192xf32> -> vector<3x192xf32>
    %120 = arith.addf %114, %119 : vector<3x192xf32>
    %c0_145 = arith.constant 0 : index
    %c1_146 = arith.constant 1 : index
    %c0_147 = arith.constant 0 : index
    %121 = vector.load %arg9[%c0_145, %c1_146, %c0_147] : memref<2x4x256xf32, #tpu.memory_space<vmem>>, vector<1x3x256xf32>
    %122 = vector.shape_cast %121 : vector<1x3x256xf32> to vector<3x256xf32>
    %c2_148 = arith.constant 2 : index
    %c0_149 = arith.constant 0 : index
    %c0_150 = arith.constant 0 : index
    %123 = vector.load %arg4[%c2_148, %c0_149, %c0_150] : memref<4x256x192xf32, #tpu.memory_space<vmem>>, vector<1x256x192xf32>
    %124 = vector.shape_cast %123 : vector<1x256x192xf32> to vector<256x192xf32>
    %cst_151 = arith.constant dense<0.000000e+00> : vector<3x192xf32>
    %125 = tpu.matmul %122, %124, %cst_151 {dimension_numbers = #tpu.dot_dimension_numbers<[1], [0], [0], [1], [0, 0, 1, 1], [], []>} : vector<3x256xf32>, vector<256x192xf32>, vector<3x192xf32> -> vector<3x192xf32>
    %126 = arith.addf %120, %125 : vector<3x192xf32>
    %c1_152 = arith.constant 1 : index
    %c1_153 = arith.constant 1 : index
    %c0_154 = arith.constant 0 : index
    %127 = vector.load %arg9[%c1_152, %c1_153, %c0_154] : memref<2x4x256xf32, #tpu.memory_space<vmem>>, vector<1x3x256xf32>
    %128 = vector.shape_cast %127 : vector<1x3x256xf32> to vector<3x256xf32>
    %c3_155 = arith.constant 3 : index
    %c0_156 = arith.constant 0 : index
    %c0_157 = arith.constant 0 : index
    %129 = vector.load %arg4[%c3_155, %c0_156, %c0_157] : memref<4x256x192xf32, #tpu.memory_space<vmem>>, vector<1x256x192xf32>
    %130 = vector.shape_cast %129 : vector<1x256x192xf32> to vector<256x192xf32>
    %cst_158 = arith.constant dense<0.000000e+00> : vector<3x192xf32>
    %131 = tpu.matmul %128, %130, %cst_158 {dimension_numbers = #tpu.dot_dimension_numbers<[1], [0], [0], [1], [0, 0, 1, 1], [], []>} : vector<3x256xf32>, vector<256x192xf32>, vector<3x192xf32> -> vector<3x192xf32>
    %132 = arith.addf %126, %131 : vector<3x192xf32>
    %c0_159 = arith.constant 0 : index
    %c0_160 = arith.constant 0 : index
    %133 = vector.load %arg5[%c0_159, %c0_160] : memref<1x192xf32, #tpu.memory_space<vmem>>, vector<1x192xf32>
    %134 = vector.broadcast %133 : vector<1x192xf32> to vector<3x192xf32>
    %135 = arith.addf %132, %134 : vector<3x192xf32>
    %cst_161 = arith.constant 0.000000e+00 : f32
    %136 = vector.broadcast %cst_161 : f32 to vector<3x192xf32>
    %137 = arith.maximumf %135, %136 : vector<3x192xf32>
    %c0_162 = arith.constant 0 : index
    %c0_163 = arith.constant 0 : index
    %c0_164 = arith.constant 0 : index
    %138 = vector.load %arg10[%c0_162, %c0_163, %c0_164] : memref<1x3x192xf32, #tpu.memory_space<vmem>>, vector<1x3x192xf32>
    %139 = vector.shape_cast %138 : vector<1x3x192xf32> to vector<3x192xf32>
    %140 = vector.shape_cast %137 : vector<3x192xf32> to vector<1x3x192xf32>
    tpu.vector_store %arg10[%c0_162, %c0_163, %c0_164], %140 {strides = array<i32>} : memref<1x3x192xf32, #tpu.memory_space<vmem>>, vector<1x3x192xf32>,
    %c0_165 = arith.constant 0 : index
    %c0_166 = arith.constant 0 : index
    %c0_167 = arith.constant 0 : index
    %141 = vector.load %arg10[%c0_165, %c0_166, %c0_167] : memref<1x3x192xf32, #tpu.memory_space<vmem>>, vector<1x1x192xf32>
    %142 = vector.shape_cast %141 : vector<1x1x192xf32> to vector<1x192xf32>
    %c0_168 = arith.constant 0 : index
    %c0_169 = arith.constant 0 : index
    %c0_170 = arith.constant 0 : index
    %143 = vector.load %arg6[%c0_168, %c0_169, %c0_170] : memref<3x192x64xf32, #tpu.memory_space<vmem>>, vector<1x192x64xf32>
    %144 = vector.shape_cast %143 : vector<1x192x64xf32> to vector<192x64xf32>
    %cst_171 = arith.constant dense<0.000000e+00> : vector<1x64xf32>
    %145 = tpu.matmul %142, %144, %cst_171 {dimension_numbers = #tpu.dot_dimension_numbers<[1], [0], [0], [1], [0, 0, 1, 1], [], []>} : vector<1x192xf32>, vector<192x64xf32>, vector<1x64xf32> -> vector<1x64xf32>
    %c0_172 = arith.constant 0 : index
    %c1_173 = arith.constant 1 : index
    %c0_174 = arith.constant 0 : index
    %146 = vector.load %arg10[%c0_172, %c1_173, %c0_174] : memref<1x3x192xf32, #tpu.memory_space<vmem>>, vector<1x1x192xf32>
    %147 = vector.shape_cast %146 : vector<1x1x192xf32> to vector<1x192xf32>
    %c1_175 = arith.constant 1 : index
    %c0_176 = arith.constant 0 : index
    %c0_177 = arith.constant 0 : index
    %148 = vector.load %arg6[%c1_175, %c0_176, %c0_177] : memref<3x192x64xf32, #tpu.memory_space<vmem>>, vector<1x192x64xf32>
    %149 = vector.shape_cast %148 : vector<1x192x64xf32> to vector<192x64xf32>
    %cst_178 = arith.constant dense<0.000000e+00> : vector<1x64xf32>
    %150 = tpu.matmul %147, %149, %cst_178 {dimension_numbers = #tpu.dot_dimension_numbers<[1], [0], [0], [1], [0, 0, 1, 1], [], []>} : vector<1x192xf32>, vector<192x64xf32>, vector<1x64xf32> -> vector<1x64xf32>
    %151 = arith.addf %145, %150 : vector<1x64xf32>
    %c0_179 = arith.constant 0 : index
    %c2_180 = arith.constant 2 : index
    %c0_181 = arith.constant 0 : index
    %152 = vector.load %arg10[%c0_179, %c2_180, %c0_181] : memref<1x3x192xf32, #tpu.memory_space<vmem>>, vector<1x1x192xf32>
    %153 = vector.shape_cast %152 : vector<1x1x192xf32> to vector<1x192xf32>
    %c2_182 = arith.constant 2 : index
    %c0_183 = arith.constant 0 : index
    %c0_184 = arith.constant 0 : index
    %154 = vector.load %arg6[%c2_182, %c0_183, %c0_184] : memref<3x192x64xf32, #tpu.memory_space<vmem>>, vector<1x192x64xf32>
    %155 = vector.shape_cast %154 : vector<1x192x64xf32> to vector<192x64xf32>
    %cst_185 = arith.constant dense<0.000000e+00> : vector<1x64xf32>
    %156 = tpu.matmul %153, %155, %cst_185 {dimension_numbers = #tpu.dot_dimension_numbers<[1], [0], [0], [1], [0, 0, 1, 1], [], []>} : vector<1x192xf32>, vector<192x64xf32>, vector<1x64xf32> -> vector<1x64xf32>
    %157 = arith.addf %151, %156 : vector<1x64xf32>
    %c0_186 = arith.constant 0 : index
    %c0_187 = arith.constant 0 : index
    %158 = vector.load %arg7[%c0_186, %c0_187] : memref<1x64xf32, #tpu.memory_space<vmem>>, vector<1x64xf32>
    %159 = arith.addf %157, %158 : vector<1x64xf32>
    %cst_188 = arith.constant 0.000000e+00 : f32
    %160 = vector.broadcast %cst_188 : f32 to vector<1x64xf32>
    %161 = arith.maximumf %159, %160 : vector<1x64xf32>
    %c0_189 = arith.constant 0 : index
    %c0_190 = arith.constant 0 : index
    %c0_191 = arith.constant 0 : index
    %162 = vector.load %arg8[%c0_189, %c0_190, %c0_191] : memref<1x1x64xf32, #tpu.memory_space<vmem>>, vector<1x1x64xf32>
    %163 = vector.shape_cast %162 : vector<1x1x64xf32> to vector<1x64xf32>
    %164 = vector.shape_cast %161 : vector<1x64xf32> to vector<1x1x64xf32>
    tpu.vector_store %arg8[%c0_189, %c0_190, %c0_191], %164 {strides = array<i32>} : memref<1x1x64xf32, #tpu.memory_space<vmem>>, vector<1x1x64xf32>,
    return
  }
  func.func @transform_0(%arg0: i32) -> (i32, i32, i32, i32) {
    %c0_i32 = arith.constant 0 : i32
    %c0_i32_0 = arith.constant 0 : i32
    %c0_i32_1 = arith.constant 0 : i32
    %c0_i32_2 = arith.constant 0 : i32
    return %arg0, %c0_i32, %c0_i32_0, %c0_i32_1 : i32, i32, i32, i32
  }
  func.func @transform_1(%arg0: i32) -> (i32, i32, i32) {
    %c0_i32 = arith.constant 0 : i32
    %c0_i32_0 = arith.constant 0 : i32
    %c0_i32_1 = arith.constant 0 : i32
    %c0_i32_2 = arith.constant 0 : i32
    return %c0_i32, %c0_i32_0, %c0_i32_1 : i32, i32, i32
  }
  func.func @transform_2(%arg0: i32) -> (i32, i32) {
    %c0_i32 = arith.constant 0 : i32
    %c0_i32_0 = arith.constant 0 : i32
    %c0_i32_1 = arith.constant 0 : i32
    return %c0_i32, %c0_i32_0 : i32, i32
  }
  func.func @transform_3(%arg0: i32) -> (i32, i32, i32) {
    %c0_i32 = arith.constant 0 : i32
    %c0_i32_0 = arith.constant 0 : i32
    %c0_i32_1 = arith.constant 0 : i32
    %c0_i32_2 = arith.constant 0 : i32
    return %c0_i32, %c0_i32_0, %c0_i32_1 : i32, i32, i32
  }
  func.func @transform_4(%arg0: i32) -> (i32, i32) {
    %c0_i32 = arith.constant 0 : i32
    %c0_i32_0 = arith.constant 0 : i32
    %c0_i32_1 = arith.constant 0 : i32
    return %c0_i32, %c0_i32_0 : i32, i32
  }
  func.func @transform_5(%arg0: i32) -> (i32, i32, i32) {
    %c0_i32 = arith.constant 0 : i32
    %c0_i32_0 = arith.constant 0 : i32
    %c0_i32_1 = arith.constant 0 : i32
    %c0_i32_2 = arith.constant 0 : i32
    return %c0_i32, %c0_i32_0, %c0_i32_1 : i32, i32, i32
  }
  func.func @transform_6(%arg0: i32) -> (i32, i32) {
    %c0_i32 = arith.constant 0 : i32
    %c0_i32_0 = arith.constant 0 : i32
    %c0_i32_1 = arith.constant 0 : i32
    return %c0_i32, %c0_i32_0 : i32, i32
  }
  func.func @transform_7(%arg0: i32) -> (i32, i32, i32) {
    %c0_i32 = arith.constant 0 : i32
    %c0_i32_0 = arith.constant 0 : i32
    %c0_i32_1 = arith.constant 0 : i32
    return %arg0, %c0_i32, %c0_i32_0 : i32, i32, i32
  }
}

</mosaic_0001>

<bundles_post_ra>
// kernel: forward.1
= control target key start
LH: loop header
LB: loop body
LE: loop exit
PB: predicated region body
PF: predicated region fallthrough
CT: control target
= control target key end

     0   :  { %s4304_s0 = inlined_call_operand.vmem [shape: f32[2,8,5,144], index: 0, kind: input, shape index: {}]   ;;  %s4305_s1 = inlined_call_operand.hbm [shape: f32[8,144,256], index: 1, kind: input, shape index: {}]   ;;  %s4306_s2 = inlined_call_operand.hbm [shape: f32[1,256], index: 2, kind: input, shape index: {}]   ;;  %s4307_s3 = inlined_call_operand.hbm [shape: f32[4,256,192], index: 3, kind: input, shape index: {}]   ;;  %s4308_s4 = inlined_call_operand.hbm [shape: f32[1,192], index: 4, kind: input, shape index: {}]   ;;  %s4309_s5 = inlined_call_operand.hbm [shape: f32[3,192,64], index: 5, kind: input, shape index: {}]   ;;  %s4310_s6 = inlined_call_operand.hbm [shape: f32[1,64], index: 6, kind: input, shape index: {}]   ;;  %s4311_s7 = inlined_call_operand.hbm [shape: f32[2,1,64], index: 7, kind: output, shape index: {}]  }
   0x1   :  { %4312 = sst [smem:[#allocation21_spill]] %s4305_s1 }
   0x2   :  { %4313 = sst [smem:[#allocation22_spill]] %s4306_s2 }
   0x3   :  { %4314 = sst [smem:[#allocation23_spill]] %s4308_s4 }
   0x4   :  { %12 = vsyncpa [#allocation5], 0 }
   0x5   :  { %13 = vsyncpa [#allocation8], 0 }
   0x6   :  { %14 = vsyncpa [#allocation11], 0 }
   0x7   :  { %15 = vsyncpa [#allocation14], 0 }
   0x8   :  { %16 = vsyncpa [#allocation6], 0 }
   0x9   :  { %18 = vsyncpa [#allocation6 + $0x1], 0  ;;  %s3879_s24 = smov 0   ;;  %s3881_s25 = smov 0  }
   0xa   :  { %s3883_s26 = smov 0   ;;  %s3885_s27 = smov 0  }
   0xb LB: > { %s3900_s28 = sadd.s32 4294967295, %s3827_s27   ;;  %s3381_s29 = sadd.s32 4294967294, %s3827_s27   ;;  %s3827_s27 = sphi %s3885_s27, %s4325_s27   ;;  %s3823_s26 = sphi %s3883_s26, %s4324_s26   ;;  %s3819_s25 = sphi %s3881_s25, %s4323_s25   ;;  %s3815_s24 = sphi %s3879_s24, %s4322_s24  }
   0xc   : > { %s3904_s30 = sadd.s32 1, %s3827_s27   ;;  %s183_s8 = sadd.s32 1, %s3823_s26 }
   0xd   : > { %s180_s9 = ssub.s32 %s3827_s27, %s3904_s30  ;;  %p193_p0 = scmp.ne.s32.totalorder %s3823_s26, %s3819_s25 }
   0xe   : > { %p181_p1 = scmp.eq.s32.totalorder %s180_s9, 0  ;;  %p194_p2 = scmp.eq.s32.totalorder %s3900_s28, 1 }
   0xf   : > { %p199_p3 = scmp.ne.s32.totalorder %s3819_s25, %s3815_s24  ;;  %p200_p4 = scmp.eq.s32.totalorder %s3381_s29, 1 }
  0x10   : > { %s3915_s10 = scalar_select %p181_p1, %s3823_s26, %s183_s8  }
  0x11   : > { %p3917_p5 = por %p194_p2, %p193_p0  ;;  %p3921_p6 = por %p200_p4, %p199_p3 }
  0x12   : > { %p3382_p7 = scmp.ge.s32.totalorder %s3827_s27, 1  ;;  %p207_p8 = scmp.lt.s32.totalorder %s3827_s27, 3 }
  0x13   : > { %p3514_p9 = scmp.eq.s32.totalorder %s3900_s28, 0  ;;  %s4318_s2 = sld [smem:[#allocation22_spill]] }
  0x14   : > { %p3928_p10 = pnand %p3382_p7, %p207_p8  ;;  %s3829_s17 = smov [#allocation7]  }
  0x15   : > { %s235_s18 = sshll.u32 %s3829_s17, 4  ;;  %s4319_s4 = sld [smem:[#allocation23_spill]]  ;;  %s236_s18 = int_to_ptr.vmem [resolvable:$true] %s235_s18 }
  0x16   : > { %p3491_p11 = pneg %p3928_p10  ;;  %s4321_s1 = sld [smem:[#allocation21_spill]] }
  0x17   : > { %s3830_s9 = smov [#allocation10]   ;;  %s3831_s15 = smov [#allocation4]  }
  0x18   : > { %p3942_p12 = pnand %p3514_p9, %p3491_p11  ;;  %s261_s14 = sshll.u32 %s3830_s9, 4  ;;  %s262_s14 = int_to_ptr.vmem [resolvable:$true] %s261_s14 }
  0x19   : > { %s233_s16 = sshll.u32 %s4318_s2, 4  ;;  %s220_s17 = sshll.u32 %s3831_s15, 4  ;;  %s234_s16 = int_to_ptr.hbm [resolvable:$true] %s233_s16  ;;  %s221_s17 = int_to_ptr.vmem [resolvable:$true] %s220_s17 }
  0x1a   : > { %3497 = dma.hbm_to_vmem [thread:$0]  (!%p3942_p12), %s234_s16, 32, %s236_s18, [#allocation8]  }
  0x1b   : > { %s259_s21 = sshll.u32 %s4319_s4, 4  ;;  %s244_s2 = sshll.u32 %s4307_s3, 4  ;;  %s260_s21 = int_to_ptr.hbm [resolvable:$true] %s259_s21  ;;  %s245_s2 = int_to_ptr.hbm [resolvable:$true] %s244_s2 }
  0x1c   : > { %s218_s8 = sshll.u32 %s4321_s1, 4  ;;  %s3832_s4 = smov 256   ;;  %s219_s8 = int_to_ptr.hbm [resolvable:$true] %s218_s8 }
  0x1d   : > { %3503 = dma.hbm_to_vmem [thread:$0]  (!%p3942_p12), %s260_s21, 32, %s262_s14, [#allocation11]  }
  0x1e   : > { %s3833_s23 = smov 16   ;;  %s3834_s29 = smov [#allocation9]  }
  0x1f   : > { %3494 = dma.hbm_to_vmem [thread:$0]  (!%p3942_p12), %s219_s8, 36864, %s221_s17, [#allocation5], %s3832_s4, %s3832_s4, %s3833_s23  }
  0x20   : > { %s246_s16 = sshll.u32 %s3834_s29, 4  ;;  %s270_s21 = sshll.u32 %s4309_s5, 4  ;;  %s247_s16 = int_to_ptr.vmem [resolvable:$true] %s246_s16  ;;  %s271_s21 = int_to_ptr.hbm [resolvable:$true] %s270_s21 }
  0x21   : > { %3500 = dma.hbm_to_vmem [thread:$0]  (!%p3942_p12), %s245_s2, 32768, %s247_s16, [#allocation8], %s3832_s4, %s3832_s4, %s3833_s23  }
  0x22   : > { %s3835_s14 = smov [#allocation12]   ;;  %s285_s1 = sshll.u32 %s4310_s6, 4  ;;  %s286_s1 = int_to_ptr.hbm [resolvable:$true] %s285_s1 }
  0x23   : > { %s272_s15 = sshll.u32 %s3835_s14, 4  ;;  %s3836_s8 = smov 128   ;;  %s273_s15 = int_to_ptr.vmem [resolvable:$true] %s272_s15 }
  0x24   : > { %s3837_s17 = smov 8   ;;  %s3838_s29 = smov [#allocation13]  }
  0x25   : > { %3506 = dma.hbm_to_vmem [thread:$0]  (!%p3942_p12), %s271_s21, 9216, %s273_s15, [#allocation11], %s3836_s8, %s3836_s8, %s3837_s17  }
  0x26   : > { %s287_s18 = sshll.u32 %s3838_s29, 4  ;;  %308 = sbr.rel (%p3928_p10) target bundleno = 903 (0x387), region = 48  ;;  %s288_s18 = int_to_ptr.vmem [resolvable:$true] %s287_s18 }
  0x27   : > { %3509 = dma.hbm_to_vmem [thread:$0]  (!%p3942_p12), %s286_s1, 16, %s288_s18, [#allocation14]  }
  0x2b   : > { %3794 = dma.done.wait (%p3514_p9), [#allocation5], 36864  }
  0x2c   : > { %3796 = vsyncadd (%p3514_p9), [#allocation5], 4294930432 }
  0x2d   : > { %3798 = dma.done.wait (%p3514_p9), [#allocation8], 32800  }
  0x2e   : > { %3800 = vsyncadd (%p3514_p9), [#allocation8], 4294934496 }
  0x2f   : > { %3802 = dma.done.wait (%p3514_p9), [#allocation11], 9248  }
  0x30   : > { %3804 = vsyncadd (%p3514_p9), [#allocation11], 4294958048 }
  0x31   : > { %3806 = dma.done.wait (%p3514_p9), [#allocation14], 16  }
  0x32   : > { %3808 = vsyncadd (%p3514_p9), [#allocation14], 4294967280  ;;  %p365_p13 = scmp.lt.s32.totalorder %s3900_s28, 1  ;;  %v442_v0 = vld [vmem:[#allocation4 + $0x210] sm:$0xff]  ;;  %v443_v2 = vld [vmem:[#allocation4 + $0x218] sm:$0xff]  ;;  %vm448_vm0 = vcmask 130048   ;;  %s3262_s21 = scalar_lea.hbm %s4311_s7, %s3900_s28 }
  0x33   : > { %v446_v1 = vld [vmem:[#allocation4 + $0x230] sm:$0xff]  ;;  %452 = vmatpush.msra.mxu0 %v442_v0  ;;  %v447_v3 = vld [vmem:[#allocation4 + $0x238] sm:$0xff]  ;;  %v440_v4 = vld [vmem:[#allocation4 + $0x200] sm:$0xff]  ;;  %492 = vmatpush.msra.mxu2 %v443_v2  ;;  %vm1378_vm1 = vcmask 1043456   ;;  %vm3025_vm2 = vcmask 1042432   ;;  %vm3026_vm3 = vcmask 522244  }
  0x34   : > { %s366_s1 = scalar_select %p365_p13, %s3900_s28, 1  ;;  %486 = vmatpush.msra.mxu1 %v446_v1  ;;  %v444_v5 = vld [vmem:[#allocation4 + $0x220] sm:$0xff]  ;;  %526 = vmatpush.msra.mxu3 %v447_v3  ;;  %v441_v6 = vld [vmem:[#allocation4 + $0x208] sm:$0xff]  ;;  %v402_v8 = vld [vmem:[#allocation4 + $0xf0] sm:$0xff]  ;;  %vm3085_vm5 = vcmask 523264   ;;  %vm3251_vm6 = vcmask 516096  }
  0x35   : > { %v445_v7 = vld [vmem:[#allocation4 + $0x228] sm:$0xff]  ;;  %453 = vmatpush.msra.mxu0 %v440_v4  ;;  %v406_v9 = vld [vmem:[#allocation4 + $0x110] sm:$0xff]  ;;  %v439_v11 = vld [vmem:[#allocation4 + $0x1f8] sm:$0xff]  ;;  %493 = vmatpush.msra.mxu2 %v441_v6  ;;  %s363_s23 = sand.u32 1, %s3819_s25   ;;  %s3266_s19 = sshll.u32 %s3262_s21, 4  ;;  %s3267_s19 = int_to_ptr.hbm [resolvable:$true] %s3266_s19 }
  0x36   : > { %s3464_s2 = sshll.u32 %s366_s1, 7  ;;  %487 = vmatpush.msra.mxu1 %v444_v5  ;;  %v438_v10 = vld [vmem:[#allocation4 + $0x1f0] sm:$0xff]  ;;  %527 = vmatpush.msra.mxu3 %v445_v7  ;;  %v400_v12 = vld [vmem:[#allocation4 + $0xe0] sm:$0xff]  ;;  %v437_v15 = vld [vmem:[#allocation4 + $0x1e8] sm:$0xff]  ;;  %s364_s14 = scalar_lea.vmem [#allocation15], %s363_s23 }
  0x37   : > { %s3993_s22 = scalar_lea.vmem %s4304_s0, %s3464_s2  ;;  %v404_v13 = vld [vmem:[#allocation4 + $0x100] sm:$0xff]  ;;  %454 = vmatpush.msra.mxu0 %v438_v10  ;;  %494 = vmatpush.msra.mxu2 %v439_v11  ;;  %v398_v17 = vld [vmem:[#allocation4 + $0xd0] sm:$0xff]  ;;  %v403_v18 = vld [vmem:[#allocation4 + $0xf8] sm:$0xff]  ;;  %s3264_s15 = sshll.u32 %s364_s14, 4  ;;  %s3265_s15 = int_to_ptr.vmem [resolvable:$true] %s3264_s15 }
  0x38   : > { %535 = vmatpush.msrb.mxu1 %v402_v8  ;;  %569 = vmatpush.msrb.mxu3 %v406_v9  ;;  %v436_v14 = vld [vmem:[#allocation4 + $0x1e0] sm:$0xff]  ;;  %v3996_v16 = vld [vmem:[%s3993_s22 + $0x18] sm:$0xf]  ;;  %v434_v19 = vld [vmem:[#allocation4 + $0x1d0] sm:$0xff]  ;;  %s3254_s20 = scalar_lea.sflag [#allocation6], %s363_s23  ;;  %s3763_s8 = sshra.s32 %s3267_s19, 4  ;;  %s3764_s8 = int_to_ptr.hbm [resolvable:$true] %s3763_s8 }
  0x39   : > { %455 = vmatpush.msra.mxu0 %v436_v14  ;;  %495 = vmatpush.msra.mxu2 %v437_v15  ;;  %v435_v20 = vld [vmem:[#allocation4 + $0x1d8] sm:$0xff]  ;;  %v396_v21 = vld [vmem:[#allocation4 + $0xc0] sm:$0xff]  ;;  %v401_v22 = vld [vmem:[#allocation4 + $0xe8] sm:$0xff]  ;;  %s3765_s17 = scalar_lea.hbm %s3764_s8, 1  ;;  %s3769_s18 = scalar_lea.hbm %s4311_s7, 2 }
  0x3a   : > { %536 = vmatpush.msrb.mxu1 %v400_v12  ;;  %570 = vmatpush.msrb.mxu3 %v404_v13  ;;  %v432_v23 = vld [vmem:[#allocation4 + $0x1c0] sm:$0xff]  ;;  %v433_v24 = vld [vmem:[#allocation4 + $0x1c8] sm:$0xff]  ;;  %v394_v25 = vld [vmem:[#allocation4 + $0xb0] sm:$0xff]  ;;  %p3766_p0 = scmp.ne.s32.totalorder %s3764_s8, %s3765_s17  ;;  %p3770_p3 = scmp.lt.s32.totalorder %s3764_s8, %s4311_s7 }
  0x3b   : > { %3402 = vmatmul.msk.f32.vlgmr.msra.gmra.mxu3 %vm448_vm0, %v3996_v16  ;;  %456 = vmatpush.msra.mxu0 %v434_v19  ;;  %v399_v26 = vld [vmem:[#allocation4 + $0xd8] sm:$0xff]  ;;  %v430_v27 = vld [vmem:[#allocation4 + $0x1b0] sm:$0xff]  ;;  %v392_v29 = vld [vmem:[#allocation4 + $0xa0] sm:$0xff]  ;;  %p3771_p4 = scmp.lt.s32.totalorder %s3769_s18, %s3765_s17 }
  0x3c   : > { %537 = vmatpush.msrb.mxu1 %v398_v17  ;;  %575 = vmatpush.msra.mxu3 %v403_v18  ;;  %v431_v28 = vld [vmem:[#allocation4 + $0x1b8] sm:$0xff]  ;;  %v397_v30 = vld [vmem:[#allocation4 + $0xc8] sm:$0xff]  ;;  %v428_v31 = vld [vmem:[#allocation4 + $0x1a0] sm:$0xff]  ;;  %p3767_p1 = pnand %p3766_p0, %p3917_p5 }
  0x3d   : > { %496 = vmatpush.msra.mxu2 %v435_v20  ;;  %457 = vmatpush.msra.mxu0 %v432_v23  ;;  %v429_v32 = vld [vmem:[#allocation4 + $0x1a8] sm:$0xff]  ;;  %v390_v33 = vld [vmem:[#allocation4 + $0x90] sm:$0xff]  ;;  %v395_v34 = vld [vmem:[#allocation4 + $0xb8] sm:$0xff]  ;;  %p3772_p7 = por %p3771_p4, %p3770_p3 }
  0x3e   : > { %538 = vmatpush.msrb.mxu1 %v396_v21  ;;  %576 = vmatpush.msra.mxu3 %v401_v22  ;;  %v426_v35 = vld [vmem:[#allocation4 + $0x190] sm:$0xff]  ;;  %v427_v36 = vld [vmem:[#allocation4 + $0x198] sm:$0xff]  ;;  %v388_v37 = vld [vmem:[#allocation4 + $0x80] sm:$0xff]  ;;  %p3768_p2 = pneg %p3767_p1 }
  0x3f   : > { %497 = vmatpush.msra.mxu2 %v433_v24  ;;  %458 = vmatpush.msra.mxu0 %v430_v27  ;;  %v393_v38 = vld [vmem:[#allocation4 + $0xa8] sm:$0xff]  ;;  %v424_v39 = vld [vmem:[#allocation4 + $0x180] sm:$0xff]  ;;  %v386_v41 = vld [vmem:[#allocation4 + $0x70] sm:$0xff] }
  0x40   : > { %539 = vmatpush.msrb.mxu1 %v394_v25  ;;  %577 = vmatpush.msra.mxu3 %v399_v26  ;;  %v425_v40 = vld [vmem:[#allocation4 + $0x188] sm:$0xff]  ;;  %v391_v42 = vld [vmem:[#allocation4 + $0x98] sm:$0xff]  ;;  %v422_v43 = vld [vmem:[#allocation4 + $0x170] sm:$0xff]  ;;  %p3773_p8 = pnand %p3772_p7, %p3768_p2 }
  0x41   : > { %498 = vmatpush.msra.mxu2 %v431_v28  ;;  %459 = vmatpush.msra.mxu0 %v428_v31  ;;  %v423_v44 = vld [vmem:[#allocation4 + $0x178] sm:$0xff]  ;;  %v384_v45 = vld [vmem:[#allocation4 + $0x60] sm:$0xff]  ;;  %v389_v46 = vld [vmem:[#allocation4 + $0x88] sm:$0xff] }
  0x42   : > { %540 = vmatpush.msrb.mxu1 %v392_v29  ;;  %578 = vmatpush.msra.mxu3 %v397_v30  ;;  %v420_v47 = vld [vmem:[#allocation4 + $0x160] sm:$0xff]  ;;  %v421_v48 = vld [vmem:[#allocation4 + $0x168] sm:$0xff]  ;;  %v382_v49 = vld [vmem:[#allocation4 + $0x50] sm:$0xff] }
  0x43   : > { %499 = vmatpush.msra.mxu2 %v429_v32  ;;  %460 = vmatpush.msra.mxu0 %v426_v35  ;;  %v387_v50 = vld [vmem:[#allocation4 + $0x78] sm:$0xff]  ;;  %v418_v51 = vld [vmem:[#allocation4 + $0x150] sm:$0xff]  ;;  %v380_v53 = vld [vmem:[#allocation4 + $0x40] sm:$0xff] }
  0x44   : > { %541 = vmatpush.msrb.mxu1 %v390_v33  ;;  %579 = vmatpush.msra.mxu3 %v395_v34  ;;  %v419_v52 = vld [vmem:[#allocation4 + $0x158] sm:$0xff]  ;;  %v385_v54 = vld [vmem:[#allocation4 + $0x68] sm:$0xff]  ;;  %v416_v55 = vld [vmem:[#allocation4 + $0x140] sm:$0xff] }
  0x45   : > { %500 = vmatpush.msra.mxu2 %v427_v36  ;;  %461 = vmatpush.msra.mxu0 %v424_v39  ;;  %v417_v56 = vld [vmem:[#allocation4 + $0x148] sm:$0xff]  ;;  %v383_v57 = vld [vmem:[#allocation4 + $0x58] sm:$0xff]  ;;  %v378_v58 = vld [vmem:[#allocation4 + $0x30] sm:$0xff] }
  0x46   : > { %542 = vmatpush.msrb.mxu1 %v388_v37  ;;  %580 = vmatpush.msra.mxu3 %v393_v38  ;;  %v414_v59 = vld [vmem:[#allocation4 + $0x130] sm:$0xff]  ;;  %v415_v60 = vld [vmem:[#allocation4 + $0x138] sm:$0xff]  ;;  %v381_v61 = vld [vmem:[#allocation4 + $0x48] sm:$0xff] }
  0x47   : > { %501 = vmatpush.msra.mxu2 %v425_v40  ;;  %462 = vmatpush.msra.mxu0 %v422_v43  ;;  %v376_v62 = vld [vmem:[#allocation4 + $0x20] sm:$0xff]  ;;  %v371_v63 = vld [vmem:[%s3993_s22 + $0x8] sm:$0xf]  ;;  %v379_v2 = vld [vmem:[#allocation4 + $0x38] sm:$0xff] }
  0x48   : > { %543 = vmatpush.msrb.mxu1 %v386_v41  ;;  %581 = vmatpush.msra.mxu3 %v391_v42  ;;  %v412_v0 = vld [vmem:[#allocation4 + $0x120] sm:$0xff]  ;;  %v413_v1 = vld [vmem:[#allocation4 + $0x128] sm:$0xff]  ;;  %v3399_v3 = vld [vmem:[%s3993_s22 + $0x10] sm:$0xf] }
  0x49   : > { %502 = vmatpush.msra.mxu2 %v423_v44  ;;  %463 = vmatpush.msra.mxu0 %v420_v47  ;;  %v374_v4 = vld [vmem:[#allocation4 + $0x10] sm:$0xff]  ;;  %v377_v6 = vld [vmem:[#allocation4 + $0x28] sm:$0xff]  ;;  %v407_v7 = vld [vmem:[#allocation4 + $0x118] sm:$0xff] }
  0x4a   : > { %544 = vmatpush.msrb.mxu1 %v384_v45  ;;  %582 = vmatpush.msra.mxu3 %v389_v46  ;;  %v649_v5 = vld [vmem:[#allocation4 + $0x330] sm:$0xff]  ;;  %v372_v8 = vld [vmem:[#allocation4] sm:$0xff]  ;;  %v375_v11 = vld [vmem:[#allocation4 + $0x18] sm:$0xff] }
  0x4b   : > { %503 = vmatpush.msra.mxu2 %v421_v48  ;;  %464 = vmatpush.msra.mxu0 %v418_v51  ;;  %v647_v9 = vld [vmem:[#allocation4 + $0x320] sm:$0xff]  ;;  %v405_v12 = vld [vmem:[#allocation4 + $0x108] sm:$0xff]  ;;  %v645_v13 = vld [vmem:[#allocation4 + $0x310] sm:$0xff] }
  0x4c   : > { %545 = vmatpush.msrb.mxu1 %v382_v49  ;;  %583 = vmatpush.msra.mxu3 %v387_v50  ;;  %v370_v10 = vld [vmem:[%s3993_s22] sm:$0xf]  ;;  %v373_v14 = vld [vmem:[#allocation4 + $0x8] sm:$0xff]  ;;  %v653_v15 = vld [vmem:[#allocation4 + $0x350] sm:$0xff] }
  0x4d   : > { %504 = vmatpush.msra.mxu2 %v419_v52  ;;  %465 = vmatpush.msra.mxu0 %v416_v55  ;;  %v774_v17 = vld [vmem:[#allocation4 + $0x450] sm:$0xff]  ;;  %v651_v18 = vld [vmem:[#allocation4 + $0x340] sm:$0xff]  ;;  %v654_v19 = vld [vmem:[#allocation4 + $0x358] sm:$0xff] }
  0x4e   : > { %546 = vmatpush.msrb.mxu1 %v380_v53  ;;  %584 = vmatpush.msra.mxu3 %v385_v54  ;;  %v641_v20 = vld [vmem:[#allocation4 + $0x2f0] sm:$0xff]  ;;  %v650_v21 = vld [vmem:[#allocation4 + $0x338] sm:$0xff]  ;;  %v772_v22 = vld [vmem:[#allocation4 + $0x440] sm:$0xff] }
  0x4f   : > { %3401 = vmatmul.msk.f32.vlgmr.msra.gmra.mxu1 %vm448_vm0, %v3996_v16  ;;  %505 = vmatpush.msra.mxu2 %v417_v56  ;;  %v643_v16 = vld [vmem:[#allocation4 + $0x300] sm:$0xff]  ;;  %v652_v23 = vld [vmem:[#allocation4 + $0x348] sm:$0xff]  ;;  %v770_v26 = vld [vmem:[#allocation4 + $0x430] sm:$0xff] }
  0x50   : > { %585 = vmatpush.msra.mxu3 %v383_v57  ;;  %547 = vmatpush.msrb.mxu1 %v378_v58  ;;  %v639_v24 = vld [vmem:[#allocation4 + $0x2e0] sm:$0xff]  ;;  %v648_v25 = vld [vmem:[#allocation4 + $0x328] sm:$0xff]  ;;  %v778_v27 = vld [vmem:[#allocation4 + $0x470] sm:$0xff] }
  0x51   : > { %466 = vmatpush.msra.mxu0 %v414_v59  ;;  %506 = vmatpush.msra.mxu2 %v415_v60  ;;  %v637_v28 = vld [vmem:[#allocation4 + $0x2d0] sm:$0xff]  ;;  %v646_v29 = vld [vmem:[#allocation4 + $0x318] sm:$0xff]  ;;  %v768_v30 = vld [vmem:[#allocation4 + $0x420] sm:$0xff] }
  0x52   : > { %586 = vmatpush.msra.mxu3 %v381_v61  ;;  %548 = vmatpush.msrb.mxu1 %v376_v62  ;;  %v776_v31 = vld [vmem:[#allocation4 + $0x460] sm:$0xff]  ;;  %v4008_v32 = vld [vmem:[%s3993_s22 + $0x28] sm:$0xf]  ;;  %v775_v34 = vld [vmem:[#allocation4 + $0x458] sm:$0xff] }
  0x53   : > { %3403 = vmatmul.msk.f32.vlgmr.msrb.gmra.mxu3 %vm448_vm0, %v371_v63  ;;  %467 = vmatpush.msra.mxu0 %v412_v0  ;;  %v635_v33 = vld [vmem:[#allocation4 + $0x2c0] sm:$0xff]  ;;  %v644_v35 = vld [vmem:[#allocation4 + $0x308] sm:$0xff]  ;;  %v766_v36 = vld [vmem:[#allocation4 + $0x410] sm:$0xff] }
  0x54   : > { %507 = vmatpush.msra.mxu2 %v413_v1  ;;  %587 = vmatpush.msra.mxu3 %v379_v2  ;;  %v633_v37 = vld [vmem:[#allocation4 + $0x2b0] sm:$0xff]  ;;  %v773_v38 = vld [vmem:[#allocation4 + $0x448] sm:$0xff]  ;;  %v642_v39 = vld [vmem:[#allocation4 + $0x2f8] sm:$0xff] }
  0x55   : > { %468 = vmatmul.f32.vlgmr.msra.gmra.mxu0 %v3399_v3  ;;  %508 = vmatmul.f32.vlgmr.msra.gmra.mxu2 %v3399_v3  ;;  %v764_v40 = vld [vmem:[#allocation4 + $0x400] sm:$0xff]  ;;  %v771_v42 = vld [vmem:[#allocation4 + $0x438] sm:$0xff]  ;;  %v640_v43 = vld [vmem:[#allocation4 + $0x2e8] sm:$0xff] }
  0x56   : > { %549 = vmatpush.msrb.mxu1 %v374_v4  ;;  %658 = vmatpush.msrb.mxu2 %v649_v5  ;;  %v631_v41 = vld [vmem:[#allocation4 + $0x2a0] sm:$0xff]  ;;  %v762_v44 = vld [vmem:[#allocation4 + $0x3f0] sm:$0xff]  ;;  %v769_v46 = vld [vmem:[#allocation4 + $0x428] sm:$0xff] }
  0x57   : > { %588 = vmatpush.msra.mxu3 %v377_v6  ;;  %609 = vmatpush.msrb.mxu0 %v407_v7  ;;  %v629_v45 = vld [vmem:[#allocation4 + $0x290] sm:$0xff]  ;;  %v638_v47 = vld [vmem:[#allocation4 + $0x2d8] sm:$0xff]  ;;  %v760_v48 = vld [vmem:[#allocation4 + $0x3e0] sm:$0xff] }
  0x58   : > { %550 = vmatpush.msrb.mxu1 %v372_v8  ;;  %659 = vmatpush.msrb.mxu2 %v647_v9  ;;  %v627_v49 = vld [vmem:[#allocation4 + $0x280] sm:$0xff]  ;;  %v767_v50 = vld [vmem:[#allocation4 + $0x418] sm:$0xff]  ;;  %v636_v51 = vld [vmem:[#allocation4 + $0x2c8] sm:$0xff] }
  0x59   : > { %551 = vmatmul.f32.vlgmr.msrb.gmra.mxu1 %v370_v10  ;;  %589 = vmatpush.msra.mxu3 %v375_v11  ;;  %v758_v52 = vld [vmem:[#allocation4 + $0x3d0] sm:$0xff]  ;;  %v765_v54 = vld [vmem:[#allocation4 + $0x408] sm:$0xff]  ;;  %v634_v55 = vld [vmem:[#allocation4 + $0x2b8] sm:$0xff] }
  0x5a   : > { %610 = vmatpush.msrb.mxu0 %v405_v12  ;;  %660 = vmatpush.msrb.mxu2 %v645_v13  ;;  %v625_v53 = vld [vmem:[#allocation4 + $0x270] sm:$0xff]  ;;  %v756_v56 = vld [vmem:[#allocation4 + $0x3c0] sm:$0xff]  ;;  %v763_v58 = vld [vmem:[#allocation4 + $0x3f8] sm:$0xff] }
  0x5b   : > { %590 = vmatpush.msra.mxu3 %v373_v14  ;;  %732 = vmatpush.msra.mxu1 %v654_v19  ;;  %v623_v57 = vld [vmem:[#allocation4 + $0x260] sm:$0xff]  ;;  %v632_v59 = vld [vmem:[#allocation4 + $0x2a8] sm:$0xff]  ;;  %v754_v60 = vld [vmem:[#allocation4 + $0x3b0] sm:$0xff] }
  0x5c   : > { %692 = vmatpush.msra.mxu0 %v653_v15  ;;  %591 = vmatmul.f32.vlgmr.msra.gmra.mxu3 %v370_v10  ;;  %v621_v61 = vld [vmem:[#allocation4 + $0x250] sm:$0xff]  ;;  %v761_v62 = vld [vmem:[#allocation4 + $0x3e8] sm:$0xff]  ;;  %v752_v0 = vld [vmem:[#allocation4 + $0x3a0] sm:$0xff] }
  0x5d   : > { %661 = vmatpush.msrb.mxu2 %v643_v16  ;;  %783 = vmatpush.msrb.mxu3 %v774_v17  ;;  %v619_v1 = vld [vmem:[#allocation4 + $0x240] sm:$0xff]  ;;  %v759_v2 = vld [vmem:[#allocation4 + $0x3d8] sm:$0xff]  ;;  %v628_v3 = vld [vmem:[#allocation4 + $0x288] sm:$0xff] }
  0x5e   : > { %693 = vmatpush.msra.mxu0 %v651_v18  ;;  %733 = vmatpush.msra.mxu1 %v652_v23  ;;  %v750_v4 = vld [vmem:[#allocation4 + $0x390] sm:$0xff]  ;;  %v3405_v5 = vld [vmem:[%s3993_s22 + $0x20] sm:$0xf]  ;;  %v757_v6 = vld [vmem:[#allocation4 + $0x3c8] sm:$0xff] }
  0x5f   : > { %3404 = vmatmul.msk.f32.vlgmr.msrb.gmra.mxu0 %vm448_vm0, %v371_v63  ;;  %662 = vmatpush.msrb.mxu2 %v641_v20  ;;  %v630_v63 = vld [vmem:[#allocation4 + $0x298] sm:$0xff]  ;;  %v748_v8 = vld [vmem:[#allocation4 + $0x380] sm:$0xff]  ;;  %v624_v11 = vld [vmem:[#allocation4 + $0x268] sm:$0xff] }
  0x60   : > { %698 = vmatpush.msrb.mxu0 %v650_v21  ;;  %784 = vmatpush.msrb.mxu3 %v772_v22  ;;  %v626_v7 = vld [vmem:[#allocation4 + $0x278] sm:$0xff]  ;;  %v746_v12 = vld [vmem:[#allocation4 + $0x370] sm:$0xff]  ;;  %v753_v13 = vld [vmem:[#allocation4 + $0x3a8] sm:$0xff] }
  0x61   : > { %663 = vmatpush.msrb.mxu2 %v639_v24  ;;  %817 = vmatpush.msrb.mxu1 %v778_v27  ;;  %v755_v9 = vld [vmem:[#allocation4 + $0x3b8] sm:$0xff]  ;;  %v777_v14 = vld [vmem:[#allocation4 + $0x468] sm:$0xff]  ;;  %v744_v16 = vld [vmem:[#allocation4 + $0x360] sm:$0xff] }
  0x62   : > { %699 = vmatpush.msrb.mxu0 %v648_v25  ;;  %785 = vmatpush.msrb.mxu3 %v770_v26  ;;  %v779_v10 = vld [vmem:[#allocation4 + $0x478] sm:$0xff]  ;;  %v3409_v17 = vld [vmem:[%s3993_s22 + $0x30] sm:$0xf]  ;;  %v620_v21 = vld [vmem:[#allocation4 + $0x248] sm:$0xff] }
  0x63   : > { %664 = vmatpush.msrb.mxu2 %v637_v28  ;;  %818 = vmatpush.msrb.mxu1 %v776_v31  ;;  %v622_v15 = vld [vmem:[#allocation4 + $0x258] sm:$0xff]  ;;  %v749_v22 = vld [vmem:[#allocation4 + $0x388] sm:$0xff]  ;;  %v899_v23 = vld [vmem:[#allocation4 + $0x570] sm:$0xff] }
  0x64   : > { %700 = vmatpush.msrb.mxu0 %v646_v29  ;;  %786 = vmatpush.msrb.mxu3 %v768_v30  ;;  %v3410_v18 = vld [vmem:[%s3993_s22 + $0x38] sm:$0xf]  ;;  %v898_v24 = vld [vmem:[#allocation4 + $0x568] sm:$0xff]  ;;  %v903_v26 = vld [vmem:[#allocation4 + $0x590] sm:$0xff] }
  0x65   : > { %3408 = vmatmul.msk.f32.vlgmr.msra.gmra.mxu1 %vm448_vm0, %v4008_v32  ;;  %665 = vmatpush.msrb.mxu2 %v635_v33  ;;  %v751_v19 = vld [vmem:[#allocation4 + $0x398] sm:$0xff]  ;;  %v897_v27 = vld [vmem:[#allocation4 + $0x560] sm:$0xff]  ;;  %v745_v29 = vld [vmem:[#allocation4 + $0x368] sm:$0xff] }
  0x66   : > { %823 = vmatpush.msra.mxu1 %v775_v34  ;;  %701 = vmatpush.msrb.mxu0 %v644_v35  ;;  %v900_v20 = vld [vmem:[#allocation4 + $0x578] sm:$0xff]  ;;  %v901_v30 = vld [vmem:[#allocation4 + $0x580] sm:$0xff]  ;;  %v895_v31 = vld [vmem:[#allocation4 + $0x550] sm:$0xff] }
  0x67   : > { %787 = vmatpush.msrb.mxu3 %v766_v36  ;;  %666 = vmatpush.msrb.mxu2 %v633_v37  ;;  %v747_v25 = vld [vmem:[#allocation4 + $0x378] sm:$0xff]  ;;  %v1028_v34 = vld [vmem:[#allocation4 + $0x6b0] sm:$0xff]  ;;  %v893_v35 = vld [vmem:[#allocation4 + $0x540] sm:$0xff] }
  0x68   : > { %824 = vmatpush.msra.mxu1 %v773_v38  ;;  %702 = vmatpush.msrb.mxu0 %v642_v39  ;;  %v896_v28 = vld [vmem:[#allocation4 + $0x558] sm:$0xff]  ;;  %v902_v37 = vld [vmem:[#allocation4 + $0x588] sm:$0xff]  ;;  %v1026_v38 = vld [vmem:[#allocation4 + $0x6a0] sm:$0xff] }
  0x69   : > { %788 = vmatpush.msrb.mxu3 %v764_v40  ;;  %667 = vmatpush.msrb.mxu2 %v631_v41  ;;  %v904_v33 = vld [vmem:[#allocation4 + $0x598] sm:$0xff]  ;;  %v891_v39 = vld [vmem:[#allocation4 + $0x530] sm:$0xff]  ;;  %v4020_v40 = vld [vmem:[%s3993_s22 + $0x48] sm:$0xf] }
  0x6a   : > { %825 = vmatpush.msra.mxu1 %v771_v42  ;;  %703 = vmatpush.msrb.mxu0 %v640_v43  ;;  %v892_v36 = vld [vmem:[#allocation4 + $0x538] sm:$0xff]  ;;  %v890_v41 = vld [vmem:[#allocation4 + $0x528] sm:$0xff]  ;;  %v1024_v42 = vld [vmem:[#allocation4 + $0x690] sm:$0xff] }
  0x6b   : > { %789 = vmatpush.msrb.mxu3 %v762_v44  ;;  %668 = vmatpush.msrb.mxu2 %v629_v45  ;;  %v1025_v43 = vld [vmem:[#allocation4 + $0x698] sm:$0xff]  ;;  %v889_v44 = vld [vmem:[#allocation4 + $0x520] sm:$0xff]  ;;  %vm3027_vm4 = vmor %vm3026_vm3, %vm3025_vm2 }
  0x6c   : > { %826 = vmatpush.msra.mxu1 %v769_v46  ;;  %704 = vmatpush.msrb.mxu0 %v638_v47  ;;  %v888_v45 = vld [vmem:[#allocation4 + $0x518] sm:$0xff]  ;;  %v1022_v46 = vld [vmem:[#allocation4 + $0x680] sm:$0xff]  ;;  %v1023_v47 = vld [vmem:[#allocation4 + $0x688] sm:$0xff] }
  0x6d   : > { %790 = vmatpush.msrb.mxu3 %v760_v48  ;;  %669 = vmatpush.msrb.mxu2 %v627_v49  ;;  %v887_v48 = vld [vmem:[#allocation4 + $0x510] sm:$0xff]  ;;  %v886_v49 = vld [vmem:[#allocation4 + $0x508] sm:$0xff] }
  0x6e   : > { %827 = vmatpush.msra.mxu1 %v767_v50  ;;  %705 = vmatpush.msrb.mxu0 %v636_v51  ;;  %v1020_v50 = vld [vmem:[#allocation4 + $0x670] sm:$0xff]  ;;  %v1021_v51 = vld [vmem:[#allocation4 + $0x678] sm:$0xff] }
  0x6f   : > { %791 = vmatpush.msrb.mxu3 %v758_v52  ;;  %670 = vmatpush.msrb.mxu2 %v625_v53  ;;  %v885_v52 = vld [vmem:[#allocation4 + $0x500] sm:$0xff]  ;;  %v884_v53 = vld [vmem:[#allocation4 + $0x4f8] sm:$0xff] }
  0x70   : > { %828 = vmatpush.msra.mxu1 %v765_v54  ;;  %706 = vmatpush.msrb.mxu0 %v634_v55  ;;  %v1018_v54 = vld [vmem:[#allocation4 + $0x660] sm:$0xff]  ;;  %v1019_v55 = vld [vmem:[#allocation4 + $0x668] sm:$0xff] }
  0x71   : > { %792 = vmatpush.msrb.mxu3 %v756_v56  ;;  %671 = vmatpush.msrb.mxu2 %v623_v57  ;;  %v883_v56 = vld [vmem:[#allocation4 + $0x4f0] sm:$0xff]  ;;  %v882_v57 = vld [vmem:[#allocation4 + $0x4e8] sm:$0xff] }
  0x72   : > { %829 = vmatpush.msra.mxu1 %v763_v58  ;;  %707 = vmatpush.msrb.mxu0 %v632_v59  ;;  %v1016_v58 = vld [vmem:[#allocation4 + $0x650] sm:$0xff]  ;;  %v1017_v59 = vld [vmem:[#allocation4 + $0x658] sm:$0xff] }
  0x73   : > { %793 = vmatpush.msrb.mxu3 %v754_v60  ;;  %672 = vmatpush.msrb.mxu2 %v621_v61  ;;  %v881_v60 = vld [vmem:[#allocation4 + $0x4e0] sm:$0xff]  ;;  %v880_v61 = vld [vmem:[#allocation4 + $0x4d8] sm:$0xff] }
  0x74   : > { %830 = vmatpush.msra.mxu1 %v761_v62  ;;  %708 = vmatpush.msrb.mxu0 %v630_v63  ;;  %v1014_v62 = vld [vmem:[#allocation4 + $0x640] sm:$0xff]  ;;  %v1015_v63 = vld [vmem:[#allocation4 + $0x648] sm:$0xff] }
  0x75   : > { %794 = vmatpush.msrb.mxu3 %v752_v0  ;;  %673 = vmatpush.msrb.mxu2 %v619_v1  ;;  %v879_v0 = vld [vmem:[#allocation4 + $0x4d0] sm:$0xff]  ;;  %v878_v1 = vld [vmem:[#allocation4 + $0x4c8] sm:$0xff] }
  0x76   : > { %831 = vmatpush.msra.mxu1 %v759_v2  ;;  %709 = vmatpush.msrb.mxu0 %v628_v3  ;;  %v1012_v2 = vld [vmem:[#allocation4 + $0x630] sm:$0xff]  ;;  %v1013_v3 = vld [vmem:[#allocation4 + $0x638] sm:$0xff] }
  0x77   : > { %795 = vmatpush.msrb.mxu3 %v750_v4  ;;  %674 = vmatmul.f32.vlgmr.msrb.gmra.mxu2 %v3405_v5  ;;  %v877_v4 = vld [vmem:[#allocation4 + $0x4c0] sm:$0xff] }
  0x78   : > { %3407 = vmatmul.msk.f32.vlgmr.msra.gmra.mxu0 %vm448_vm0, %v4008_v32  ;;  %832 = vmatpush.msra.mxu1 %v757_v6  ;;  %v894_v32 = vld [vmem:[#allocation4 + $0x548] sm:$0xff]  ;;  %v1010_v6 = vld [vmem:[#allocation4 + $0x620] sm:$0xff] }
  0x79   : > { %710 = vmatpush.msrb.mxu0 %v626_v7  ;;  %796 = vmatpush.msrb.mxu3 %v748_v8  ;;  %v1011_v7 = vld [vmem:[#allocation4 + $0x628] sm:$0xff]  ;;  %v875_v8 = vld [vmem:[#allocation4 + $0x4b0] sm:$0xff] }
  0x7a   : > { %833 = vmatpush.msra.mxu1 %v755_v9  ;;  %857 = vmatpush.msra.mxu2 %v779_v10  ;;  %v874_v9 = vld [vmem:[#allocation4 + $0x4a8] sm:$0xff]  ;;  %v1008_v10 = vld [vmem:[#allocation4 + $0x610] sm:$0xff] }
  0x7b   : > { %711 = vmatpush.msrb.mxu0 %v624_v11  ;;  %797 = vmatpush.msrb.mxu3 %v746_v12  ;;  %v1009_v11 = vld [vmem:[#allocation4 + $0x618] sm:$0xff]  ;;  %v873_v12 = vld [vmem:[#allocation4 + $0x4a0] sm:$0xff] }
  0x7c   : > { %834 = vmatpush.msra.mxu1 %v753_v13  ;;  %858 = vmatpush.msra.mxu2 %v777_v14  ;;  %v872_v13 = vld [vmem:[#allocation4 + $0x498] sm:$0xff]  ;;  %v1006_v14 = vld [vmem:[#allocation4 + $0x600] sm:$0xff] }
  0x7d   : > { %712 = vmatpush.msrb.mxu0 %v622_v15  ;;  %798 = vmatpush.msrb.mxu3 %v744_v16  ;;  %v1007_v15 = vld [vmem:[#allocation4 + $0x608] sm:$0xff]  ;;  %v871_v16 = vld [vmem:[#allocation4 + $0x490] sm:$0xff] }
  0x7e   : > { %799 = vmatmul.f32.vlgmr.msrb.gmra.mxu3 %v3409_v17  ;;  %3411 = vmatmul.msk.f32.vlgmr.msrb.gmra.mxu1 %vm448_vm0, %v3410_v18 }
  0x7f   : > { %835 = vmatpush.msra.mxu1 %v751_v19  ;;  %948 = vmatpush.msra.mxu3 %v900_v20  ;;  %v1005_v19 = vld [vmem:[#allocation4 + $0x5f8] sm:$0xff]  ;;  %v3413_v20 = vld [vmem:[%s3993_s22 + $0x40] sm:$0xf] }
  0x80   : > { %713 = vmatpush.msrb.mxu0 %v620_v21  ;;  %3412 = vmatmul.msk.f32.vlgmr.msra.gmra.mxu2 %vm448_vm0, %v3410_v18  ;;  %v1004_v18 = vld [vmem:[#allocation4 + $0x5f0] sm:$0xff] }
  0x81   : > { %714 = vmatmul.f32.vlgmr.msrb.gmra.mxu0 %v3405_v5  ;;  %836 = vmatpush.msra.mxu1 %v749_v22  ;;  %v876_v5 = vld [vmem:[#allocation4 + $0x4b8] sm:$0xff]  ;;  %v1149_v21 = vld [vmem:[#allocation4 + $0x7b0] sm:$0xff]  ;;  %v869_v22 = vld [vmem:[#allocation4 + $0x480] sm:$0xff] }
  0x82   : > { %908 = vmatpush.msra.mxu0 %v899_v23  ;;  %949 = vmatpush.msra.mxu3 %v898_v24  ;;  %v1002_v23 = vld [vmem:[#allocation4 + $0x5e0] sm:$0xff]  ;;  %v1003_v24 = vld [vmem:[#allocation4 + $0x5e8] sm:$0xff] }
  0x83   : > { %837 = vmatpush.msra.mxu1 %v747_v25  ;;  %942 = vmatpush.msrb.mxu2 %v903_v26  ;;  %v3418_v25 = vld [vmem:[%s3993_s22 + $0x58] sm:$0xf]  ;;  %v1147_v26 = vld [vmem:[#allocation4 + $0x7a0] sm:$0xff] }
  0x84   : > { %909 = vmatpush.msra.mxu0 %v897_v27  ;;  %950 = vmatpush.msra.mxu3 %v896_v28  ;;  %v1000_v27 = vld [vmem:[#allocation4 + $0x5d0] sm:$0xff]  ;;  %v1001_v28 = vld [vmem:[#allocation4 + $0x5d8] sm:$0xff] }
  0x85   : > { %838 = vmatpush.msra.mxu1 %v745_v29  ;;  %943 = vmatpush.msrb.mxu2 %v901_v30  ;;  %v1029_v29 = vld [vmem:[#allocation4 + $0x6b8] sm:$0xff]  ;;  %v1145_v30 = vld [vmem:[#allocation4 + $0x790] sm:$0xff] }
  0x86   : > { %910 = vmatpush.msra.mxu0 %v895_v31  ;;  %951 = vmatpush.msra.mxu3 %v894_v32  ;;  %v998_v31 = vld [vmem:[#allocation4 + $0x5c0] sm:$0xff]  ;;  %v999_v32 = vld [vmem:[#allocation4 + $0x5c8] sm:$0xff] }
  0x87   : > { %982 = vmatpush.msra.mxu2 %v904_v33  ;;  %1067 = vmatpush.msrb.mxu1 %v1028_v34  ;;  %v1027_v33 = vld [vmem:[#allocation4 + $0x6a8] sm:$0xff]  ;;  %v1143_v34 = vld [vmem:[#allocation4 + $0x780] sm:$0xff] }
  0x88   : > { %839 = vmatmul.f32.vlgmr.msra.gmra.mxu1 %v3409_v17  ;;  %911 = vmatpush.msra.mxu0 %v893_v35  ;;  %v870_v17 = vld [vmem:[#allocation4 + $0x488] sm:$0xff]  ;;  %v996_v35 = vld [vmem:[#allocation4 + $0x5b0] sm:$0xff] }
  0x89   : > { %952 = vmatpush.msra.mxu3 %v892_v36  ;;  %983 = vmatpush.msra.mxu2 %v902_v37  ;;  %v997_v36 = vld [vmem:[#allocation4 + $0x5b8] sm:$0xff]  ;;  %v1153_v37 = vld [vmem:[#allocation4 + $0x7d0] sm:$0xff] }
  0x8a   : > { %1068 = vmatpush.msrb.mxu1 %v1026_v38  ;;  %912 = vmatpush.msra.mxu0 %v891_v39  ;;  %v1141_v38 = vld [vmem:[#allocation4 + $0x770] sm:$0xff]  ;;  %v994_v39 = vld [vmem:[#allocation4 + $0x5a0] sm:$0xff] }
  0x8b   : > { %3415 = vmatmul.msk.f32.vlgmr.msrb.gmra.mxu2 %vm448_vm0, %v4020_v40  ;;  %953 = vmatpush.msra.mxu3 %v890_v41  ;;  %v1151_v41 = vld [vmem:[#allocation4 + $0x7c0] sm:$0xff] }
  0x8c   : > { %1033 = vmatpush.msrb.mxu2 %v1024_v42  ;;  %1073 = vmatpush.msra.mxu1 %v1025_v43  ;;  %v3417_v42 = vld [vmem:[%s3993_s22 + $0x50] sm:$0xf]  ;;  %v1139_v43 = vld [vmem:[#allocation4 + $0x760] sm:$0xff] }
  0x8d   : > { %913 = vmatpush.msra.mxu0 %v889_v44  ;;  %954 = vmatpush.msra.mxu3 %v888_v45  ;;  %v1150_v44 = vld [vmem:[#allocation4 + $0x7b8] sm:$0xff] }
  0x8e   : > { %1034 = vmatpush.msrb.mxu2 %v1022_v46  ;;  %1074 = vmatpush.msra.mxu1 %v1023_v47  ;;  %v1154_v45 = vld [vmem:[#allocation4 + $0x7d8] sm:$0xff]  ;;  %v1278_v46 = vld [vmem:[#allocation4 + $0x8f0] sm:$0xff] }
  0x8f   : > { %914 = vmatpush.msra.mxu0 %v887_v48  ;;  %955 = vmatpush.msra.mxu3 %v886_v49  ;;  %v1137_v47 = vld [vmem:[#allocation4 + $0x750] sm:$0xff]  ;;  %v1148_v48 = vld [vmem:[#allocation4 + $0x7a8] sm:$0xff] }
  0x90   : > { %1035 = vmatpush.msrb.mxu2 %v1020_v50  ;;  %1075 = vmatpush.msra.mxu1 %v1021_v51  ;;  %v1152_v49 = vld [vmem:[#allocation4 + $0x7c8] sm:$0xff]  ;;  %v1274_v50 = vld [vmem:[#allocation4 + $0x8d0] sm:$0xff]  ;;  %v1276_v51 = vld [vmem:[#allocation4 + $0x8e0] sm:$0xff] }
  0x91   : > { %915 = vmatpush.msra.mxu0 %v885_v52  ;;  %956 = vmatpush.msra.mxu3 %v884_v53  ;;  %v1135_v52 = vld [vmem:[#allocation4 + $0x740] sm:$0xff]  ;;  %v1146_v53 = vld [vmem:[#allocation4 + $0x798] sm:$0xff] }
  0x92   : > { %1036 = vmatpush.msrb.mxu2 %v1018_v54  ;;  %1076 = vmatpush.msra.mxu1 %v1019_v55  ;;  %v1275_v54 = vld [vmem:[#allocation4 + $0x8d8] sm:$0xff]  ;;  %v1272_v55 = vld [vmem:[#allocation4 + $0x8c0] sm:$0xff] }
  0x93   : > { %916 = vmatpush.msra.mxu0 %v883_v56  ;;  %957 = vmatpush.msra.mxu3 %v882_v57  ;;  %v1133_v56 = vld [vmem:[#allocation4 + $0x730] sm:$0xff]  ;;  %v1144_v57 = vld [vmem:[#allocation4 + $0x788] sm:$0xff] }
  0x94   : > { %1037 = vmatpush.msrb.mxu2 %v1016_v58  ;;  %1077 = vmatpush.msra.mxu1 %v1017_v59  ;;  %v1273_v58 = vld [vmem:[#allocation4 + $0x8c8] sm:$0xff]  ;;  %v1270_v59 = vld [vmem:[#allocation4 + $0x8b0] sm:$0xff] }
  0x95   : > { %917 = vmatpush.msra.mxu0 %v881_v60  ;;  %958 = vmatpush.msra.mxu3 %v880_v61  ;;  %v1131_v60 = vld [vmem:[#allocation4 + $0x720] sm:$0xff]  ;;  %v1142_v61 = vld [vmem:[#allocation4 + $0x778] sm:$0xff] }
  0x96   : > { %1038 = vmatpush.msrb.mxu2 %v1014_v62  ;;  %1078 = vmatpush.msra.mxu1 %v1015_v63  ;;  %v1271_v62 = vld [vmem:[#allocation4 + $0x8b8] sm:$0xff]  ;;  %v1268_v63 = vld [vmem:[#allocation4 + $0x8a0] sm:$0xff] }
  0x97   : > { %918 = vmatpush.msra.mxu0 %v879_v0  ;;  %959 = vmatpush.msra.mxu3 %v878_v1  ;;  %v1129_v0 = vld [vmem:[#allocation4 + $0x710] sm:$0xff]  ;;  %v1140_v1 = vld [vmem:[#allocation4 + $0x768] sm:$0xff] }
  0x98   : > { %1039 = vmatpush.msrb.mxu2 %v1012_v2  ;;  %1079 = vmatpush.msra.mxu1 %v1013_v3  ;;  %v1269_v2 = vld [vmem:[#allocation4 + $0x8a8] sm:$0xff]  ;;  %v1266_v3 = vld [vmem:[#allocation4 + $0x890] sm:$0xff] }
  0x99   : > { %919 = vmatpush.msra.mxu0 %v877_v4  ;;  %960 = vmatpush.msra.mxu3 %v876_v5  ;;  %v1127_v4 = vld [vmem:[#allocation4 + $0x700] sm:$0xff]  ;;  %v1138_v5 = vld [vmem:[#allocation4 + $0x758] sm:$0xff] }
  0x9a   : > { %1040 = vmatpush.msrb.mxu2 %v1010_v6  ;;  %1080 = vmatpush.msra.mxu1 %v1011_v7  ;;  %v1267_v6 = vld [vmem:[#allocation4 + $0x898] sm:$0xff]  ;;  %v1264_v7 = vld [vmem:[#allocation4 + $0x880] sm:$0xff] }
  0x9b   : > { %920 = vmatpush.msra.mxu0 %v875_v8  ;;  %961 = vmatpush.msra.mxu3 %v874_v9  ;;  %v1125_v8 = vld [vmem:[#allocation4 + $0x6f0] sm:$0xff]  ;;  %v1136_v9 = vld [vmem:[#allocation4 + $0x748] sm:$0xff] }
  0x9c   : > { %1041 = vmatpush.msrb.mxu2 %v1008_v10  ;;  %1081 = vmatpush.msra.mxu1 %v1009_v11  ;;  %v1265_v10 = vld [vmem:[#allocation4 + $0x888] sm:$0xff]  ;;  %v1262_v11 = vld [vmem:[#allocation4 + $0x870] sm:$0xff] }
  0x9d   : > { %921 = vmatpush.msra.mxu0 %v873_v12  ;;  %962 = vmatpush.msra.mxu3 %v872_v13  ;;  %v1123_v12 = vld [vmem:[#allocation4 + $0x6e0] sm:$0xff]  ;;  %v1134_v13 = vld [vmem:[#allocation4 + $0x738] sm:$0xff] }
  0x9e   : > { %1042 = vmatpush.msrb.mxu2 %v1006_v14  ;;  %1082 = vmatpush.msra.mxu1 %v1007_v15  ;;  %v1263_v14 = vld [vmem:[#allocation4 + $0x878] sm:$0xff]  ;;  %v1260_v15 = vld [vmem:[#allocation4 + $0x860] sm:$0xff] }
  0x9f   : > { %922 = vmatpush.msra.mxu0 %v871_v16  ;;  %963 = vmatpush.msra.mxu3 %v870_v17  ;;  %v1121_v16 = vld [vmem:[#allocation4 + $0x6d0] sm:$0xff]  ;;  %v1132_v17 = vld [vmem:[#allocation4 + $0x728] sm:$0xff] }
  0xa0   : > { %1043 = vmatpush.msrb.mxu2 %v1004_v18  ;;  %1083 = vmatpush.msra.mxu1 %v1005_v19  ;;  %v1261_v18 = vld [vmem:[#allocation4 + $0x868] sm:$0xff]  ;;  %v1258_v19 = vld [vmem:[#allocation4 + $0x850] sm:$0xff] }
  0xa1   : > { %964 = vmatmul.f32.vlgmr.msra.gmra.mxu3 %v3413_v20  ;;  %3416 = vmatmul.msk.f32.vlgmr.msra.gmra.mxu2 %vm448_vm0, %v4020_v40  ;;  %v995_v40 = vld [vmem:[#allocation4 + $0x5a8] sm:$0xff] }
  0xa2   : > { %1158 = vmatpush.msrb.mxu3 %v1149_v21  ;;  %923 = vmatpush.msra.mxu0 %v869_v22  ;;  %v1130_v21 = vld [vmem:[#allocation4 + $0x718] sm:$0xff] }
  0xa3   : > { %1044 = vmatpush.msrb.mxu2 %v1002_v23  ;;  %1084 = vmatpush.msra.mxu1 %v1003_v24  ;;  %v1259_v22 = vld [vmem:[#allocation4 + $0x858] sm:$0xff]  ;;  %v3421_v23 = vld [vmem:[%s3993_s22 + $0x60] sm:$0xf] }
  0xa4   : > { %924 = vmatmul.f32.vlgmr.msra.gmra.mxu0 %v3413_v20  ;;  %3419 = vmatmul.msk.f32.vlgmr.msrb.gmra.mxu1 %vm448_vm0, %v3418_v25  ;;  %v1119_v20 = vld [vmem:[#allocation4 + $0x6c0] sm:$0xff] }
  0xa5   : > { %1159 = vmatpush.msrb.mxu3 %v1147_v26  ;;  %1045 = vmatpush.msrb.mxu2 %v1000_v27  ;;  %v1256_v24 = vld [vmem:[#allocation4 + $0x840] sm:$0xff]  ;;  %v1128_v26 = vld [vmem:[#allocation4 + $0x708] sm:$0xff] }
  0xa6   : > { %1085 = vmatpush.msra.mxu1 %v1001_v28  ;;  %1107 = vmatpush.msrb.mxu0 %v1029_v29  ;;  %v1257_v27 = vld [vmem:[#allocation4 + $0x848] sm:$0xff]  ;;  %v1254_v29 = vld [vmem:[#allocation4 + $0x830] sm:$0xff] }
  0xa7   : > { %1160 = vmatpush.msrb.mxu3 %v1145_v30  ;;  %1046 = vmatpush.msrb.mxu2 %v998_v31  ;;  %v3422_v28 = vld [vmem:[%s3993_s22 + $0x68] sm:$0xf]  ;;  %v1126_v31 = vld [vmem:[#allocation4 + $0x6f8] sm:$0xff] }
  0xa8   : > { %1086 = vmatpush.msra.mxu1 %v999_v32  ;;  %1108 = vmatpush.msrb.mxu0 %v1027_v33  ;;  %v1277_v30 = vld [vmem:[#allocation4 + $0x8e8] sm:$0xff]  ;;  %v1255_v32 = vld [vmem:[#allocation4 + $0x838] sm:$0xff]  ;;  %v1452_v33 = vld [vmem:[#allocation4 + $0x210] sm:$0xff] }
  0xa9   : > { %1161 = vmatpush.msrb.mxu3 %v1143_v34  ;;  %1047 = vmatpush.msrb.mxu2 %v996_v35  ;;  %v1124_v34 = vld [vmem:[#allocation4 + $0x6e8] sm:$0xff]  ;;  %v1252_v35 = vld [vmem:[#allocation4 + $0x820] sm:$0xff] }
  0xaa   : > { %1087 = vmatpush.msra.mxu1 %v997_v36  ;;  %1192 = vmatpush.msra.mxu0 %v1153_v37  ;;  %v1253_v36 = vld [vmem:[#allocation4 + $0x828] sm:$0xff]  ;;  %v1450_v37 = vld [vmem:[#allocation4 + $0x200] sm:$0xff] }
  0xab   : > { %1162 = vmatpush.msrb.mxu3 %v1141_v38  ;;  %1048 = vmatpush.msrb.mxu2 %v994_v39  ;;  %v3426_v38 = vld [vmem:[%s3993_s22 + $0x78] sm:$0xf]  ;;  %v1250_v39 = vld [vmem:[#allocation4 + $0x810] sm:$0xff] }
  0xac   : > { %1088 = vmatpush.msra.mxu1 %v995_v40  ;;  %1193 = vmatpush.msra.mxu0 %v1151_v41  ;;  %v1122_v40 = vld [vmem:[#allocation4 + $0x6d8] sm:$0xff] }
  0xad   : > { %1049 = vmatmul.f32.vlgmr.msrb.gmra.mxu2 %v3417_v42  ;;  %1089 = vmatmul.f32.vlgmr.msra.gmra.mxu1 %v3417_v42  ;;  %v1251_v41 = vld [vmem:[#allocation4 + $0x818] sm:$0xff]  ;;  %v1448_v42 = vld [vmem:[#allocation4 + $0x1f0] sm:$0xff] }
  0xae   : > { %3420 = vmatmul.msk.f32.vlgmr.msrb.gmra.mxu0 %vm448_vm0, %v3418_v25  ;;  %1163 = vmatpush.msrb.mxu3 %v1139_v43  ;;  %v1279_v25 = vld [vmem:[#allocation4 + $0x8f8] sm:$0xff]  ;;  %v1248_v43 = vld [vmem:[#allocation4 + $0x800] sm:$0xff] }
  0xaf   : > { %1198 = vmatpush.msrb.mxu0 %v1150_v44  ;;  %1232 = vmatpush.msra.mxu2 %v1154_v45  ;;  %v1120_v44 = vld [vmem:[#allocation4 + $0x6c8] sm:$0xff] }
  0xb0   : > { %1317 = vmatpush.msrb.mxu1 %v1278_v46  ;;  %1164 = vmatpush.msrb.mxu3 %v1137_v47  ;;  %v1249_v45 = vld [vmem:[#allocation4 + $0x808] sm:$0xff]  ;;  %v1446_v46 = vld [vmem:[#allocation4 + $0x1e0] sm:$0xff]  ;;  %v1246_v47 = vld [vmem:[#allocation4 + $0x7f0] sm:$0xff] }
  0xb1   : > { %1199 = vmatpush.msrb.mxu0 %v1148_v48  ;;  %1233 = vmatpush.msra.mxu2 %v1152_v49  ;;  %v1456_v48 = vld [vmem:[#allocation4 + $0x230] sm:$0xff]  ;;  %v1247_v49 = vld [vmem:[#allocation4 + $0x7f8] sm:$0xff] }
  0xb2   : > { %1318 = vmatpush.msrb.mxu1 %v1276_v51  ;;  %1165 = vmatpush.msrb.mxu3 %v1135_v52  ;;  %v1244_v51 = vld [vmem:[#allocation4 + $0x7e0] sm:$0xff] }
  0xb3   : > { %1283 = vmatpush.msrb.mxu2 %v1274_v50  ;;  %1200 = vmatpush.msrb.mxu0 %v1146_v53  ;;  %v1444_v50 = vld [vmem:[#allocation4 + $0x1d0] sm:$0xff]  ;;  %v1454_v52 = vld [vmem:[#allocation4 + $0x220] sm:$0xff] }
  0xb4   : > { %1323 = vmatpush.msra.mxu1 %v1275_v54  ;;  %1166 = vmatpush.msrb.mxu3 %v1133_v56  ;;  %v3425_v53 = vld [vmem:[%s3993_s22 + $0x70] sm:$0xf]  ;;  %v1245_v54 = vld [vmem:[#allocation4 + $0x7e8] sm:$0xff]  ;;  %v1453_v56 = vld [vmem:[#allocation4 + $0x218] sm:$0xff] }
  0xb5   : > { %1284 = vmatpush.msrb.mxu2 %v1272_v55  ;;  %1201 = vmatpush.msrb.mxu0 %v1144_v57  ;;  %v1442_v55 = vld [vmem:[#allocation4 + $0x1c0] sm:$0xff]  ;;  %v1457_v57 = vld [vmem:[#allocation4 + $0x238] sm:$0xff] }
  0xb6   : > { %1324 = vmatpush.msra.mxu1 %v1273_v58  ;;  %1167 = vmatpush.msrb.mxu3 %v1131_v60  ;;  %v1418_v58 = vld [vmem:[#allocation4 + $0x110] sm:$0xff]  ;;  %v1451_v60 = vld [vmem:[#allocation4 + $0x208] sm:$0xff] }
  0xb7   : > { %1285 = vmatpush.msrb.mxu2 %v1270_v59  ;;  %1202 = vmatpush.msrb.mxu0 %v1142_v61  ;;  %v1440_v59 = vld [vmem:[#allocation4 + $0x1b0] sm:$0xff]  ;;  %v1455_v61 = vld [vmem:[#allocation4 + $0x228] sm:$0xff] }
  0xb8   : > { %1325 = vmatpush.msra.mxu1 %v1271_v62  ;;  %1168 = vmatpush.msrb.mxu3 %v1129_v0  ;;  %v1414_v62 = vld [vmem:[#allocation4 + $0xf0] sm:$0xff]  ;;  %v1438_v0 = vld [vmem:[#allocation4 + $0x1a0] sm:$0xff] }
  0xb9   : > { %1286 = vmatpush.msrb.mxu2 %v1268_v63  ;;  %1203 = vmatpush.msrb.mxu0 %v1140_v1  ;;  %v1416_v63 = vld [vmem:[#allocation4 + $0x100] sm:$0xff]  ;;  %v1449_v1 = vld [vmem:[#allocation4 + $0x1f8] sm:$0xff] }
  0xba   : > { %1326 = vmatpush.msra.mxu1 %v1269_v2  ;;  %1169 = vmatpush.msrb.mxu3 %v1127_v4  ;;  %v1415_v2 = vld [vmem:[#allocation4 + $0xf8] sm:$0xff]  ;;  %v1436_v4 = vld [vmem:[#allocation4 + $0x190] sm:$0xff] }
  0xbb   : > { %1287 = vmatpush.msrb.mxu2 %v1266_v3  ;;  %1204 = vmatpush.msrb.mxu0 %v1138_v5  ;;  %v1412_v3 = vld [vmem:[#allocation4 + $0xe0] sm:$0xff]  ;;  %v1447_v5 = vld [vmem:[#allocation4 + $0x1e8] sm:$0xff] }
  0xbc   : > { %1327 = vmatpush.msra.mxu1 %v1267_v6  ;;  %1170 = vmatpush.msrb.mxu3 %v1125_v8  ;;  %v1413_v6 = vld [vmem:[#allocation4 + $0xe8] sm:$0xff]  ;;  %v1434_v8 = vld [vmem:[#allocation4 + $0x180] sm:$0xff] }
  0xbd   : > { %1288 = vmatpush.msrb.mxu2 %v1264_v7  ;;  %1205 = vmatpush.msrb.mxu0 %v1136_v9  ;;  %v1410_v7 = vld [vmem:[#allocation4 + $0xd0] sm:$0xff]  ;;  %v1445_v9 = vld [vmem:[#allocation4 + $0x1d8] sm:$0xff] }
  0xbe   : > { %1328 = vmatpush.msra.mxu1 %v1265_v10  ;;  %1171 = vmatpush.msrb.mxu3 %v1123_v12  ;;  %v1411_v10 = vld [vmem:[#allocation4 + $0xd8] sm:$0xff]  ;;  %v1432_v12 = vld [vmem:[#allocation4 + $0x170] sm:$0xff] }
  0xbf   : > { %1289 = vmatpush.msrb.mxu2 %v1262_v11  ;;  %1206 = vmatpush.msrb.mxu0 %v1134_v13  ;;  %v1408_v11 = vld [vmem:[#allocation4 + $0xc0] sm:$0xff]  ;;  %v1443_v13 = vld [vmem:[#allocation4 + $0x1c8] sm:$0xff] }
  0xc0   : > { %1329 = vmatpush.msra.mxu1 %v1263_v14  ;;  %1172 = vmatpush.msrb.mxu3 %v1121_v16  ;;  %v1409_v14 = vld [vmem:[#allocation4 + $0xc8] sm:$0xff]  ;;  %v1430_v16 = vld [vmem:[#allocation4 + $0x160] sm:$0xff] }
  0xc1   : > { %1290 = vmatpush.msrb.mxu2 %v1260_v15  ;;  %1207 = vmatpush.msrb.mxu0 %v1132_v17  ;;  %v1406_v15 = vld [vmem:[#allocation4 + $0xb0] sm:$0xff]  ;;  %v1441_v17 = vld [vmem:[#allocation4 + $0x1b8] sm:$0xff] }
  0xc2   : > { %1330 = vmatpush.msra.mxu1 %v1261_v18  ;;  %1173 = vmatpush.msrb.mxu3 %v1119_v20  ;;  %v1407_v18 = vld [vmem:[#allocation4 + $0xb8] sm:$0xff]  ;;  %v1428_v20 = vld [vmem:[#allocation4 + $0x150] sm:$0xff] }
  0xc3   : > { %1291 = vmatpush.msrb.mxu2 %v1258_v19  ;;  %1208 = vmatpush.msrb.mxu0 %v1130_v21  ;;  %v1404_v19 = vld [vmem:[#allocation4 + $0xa0] sm:$0xff]  ;;  %v1439_v21 = vld [vmem:[#allocation4 + $0x1a8] sm:$0xff] }
  0xc4   : > { %1331 = vmatpush.msra.mxu1 %v1259_v22  ;;  %1174 = vmatmul.f32.vlgmr.msrb.gmra.mxu3 %v3421_v23  ;;  %v1405_v22 = vld [vmem:[#allocation4 + $0xa8] sm:$0xff] }
  0xc5   : > { %1292 = vmatpush.msrb.mxu2 %v1256_v24  ;;  %1357 = vmatpush.msra.mxu3 %v1279_v25  ;;  %v1426_v24 = vld [vmem:[#allocation4 + $0x140] sm:$0xff]  ;;  %v1437_v25 = vld [vmem:[#allocation4 + $0x198] sm:$0xff] }
  0xc6   : > { %1209 = vmatpush.msrb.mxu0 %v1128_v26  ;;  %1332 = vmatpush.msra.mxu1 %v1257_v27  ;;  %v1403_v26 = vld [vmem:[#allocation4 + $0x98] sm:$0xff]  ;;  %v1400_v27 = vld [vmem:[#allocation4 + $0x80] sm:$0xff] }
  0xc7   : > { %3423 = vmatmul.msk.f32.vlgmr.msra.gmra.mxu0 %vm448_vm0, %v3422_v28  ;;  %1293 = vmatpush.msrb.mxu2 %v1254_v29  ;;  %v1435_v29 = vld [vmem:[#allocation4 + $0x188] sm:$0xff] }
  0xc8   : > { %1358 = vmatpush.msra.mxu3 %v1277_v30  ;;  %1210 = vmatpush.msrb.mxu0 %v1126_v31  ;;  %v1401_v30 = vld [vmem:[#allocation4 + $0x88] sm:$0xff]  ;;  %v1398_v31 = vld [vmem:[#allocation4 + $0x70] sm:$0xff] }
  0xc9   : > { %1333 = vmatpush.msra.mxu1 %v1255_v32  ;;  %3424 = vmatmul.msk.f32.vlgmr.msra.gmra.mxu2 %vm448_vm0, %v3422_v28  ;;  %v1424_v28 = vld [vmem:[#allocation4 + $0x130] sm:$0xff]  ;;  %v1422_v32 = vld [vmem:[#allocation4 + $0x120] sm:$0xff] }
  0xca   : > { %1461 = vmatpush.msrb.mxu3 %v1452_v33  ;;  %1211 = vmatpush.msrb.mxu0 %v1124_v34  ;;  %v1433_v33 = vld [vmem:[#allocation4 + $0x178] sm:$0xff] }
  0xcb   : > { %1294 = vmatpush.msrb.mxu2 %v1252_v35  ;;  %1334 = vmatpush.msra.mxu1 %v1253_v36  ;;  %v1399_v34 = vld [vmem:[#allocation4 + $0x78] sm:$0xff]  ;;  %v1396_v35 = vld [vmem:[#allocation4 + $0x60] sm:$0xff] }
  0xcc   : > { %1462 = vmatpush.msrb.mxu3 %v1450_v37  ;;  %3427 = vmatmul.msk.f32.vlgmr.msrb.gmra.mxu1 %vm448_vm0, %v3426_v38  ;;  %v1419_v36 = vld [vmem:[#allocation4 + $0x118] sm:$0xff]  ;;  %v1431_v37 = vld [vmem:[#allocation4 + $0x168] sm:$0xff] }
  0xcd   : > { %1295 = vmatpush.msrb.mxu2 %v1250_v39  ;;  %1212 = vmatpush.msrb.mxu0 %v1122_v40  ;;  %v1394_v39 = vld [vmem:[#allocation4 + $0x50] sm:$0xff]  ;;  %v1417_v40 = vld [vmem:[#allocation4 + $0x108] sm:$0xff] }
  0xce   : > { %1335 = vmatpush.msra.mxu1 %v1251_v41  ;;  %1463 = vmatpush.msrb.mxu3 %v1448_v42  ;;  %v1429_v41 = vld [vmem:[#allocation4 + $0x158] sm:$0xff]  ;;  %v3431_v42 = vld [vmem:[%s3993_s22 + $0x50] sm:$0xf] }
  0xcf   : > { %1296 = vmatpush.msrb.mxu2 %v1248_v43  ;;  %3428 = vmatmul.msk.f32.vlgmr.msra.gmra.mxu3 %vm448_vm0, %v3426_v38  ;;  %v1397_v38 = vld [vmem:[#allocation4 + $0x68] sm:$0xff]  ;;  %v1395_v43 = vld [vmem:[#allocation4 + $0x58] sm:$0xff] }
  0xd0   : > { %1213 = vmatpush.msrb.mxu0 %v1120_v44  ;;  %1336 = vmatpush.msra.mxu1 %v1249_v45  ;;  %v1656_v44 = vld [vmem:[#allocation4 + $0x330] sm:$0xff]  ;;  %v1392_v45 = vld [vmem:[#allocation4 + $0x40] sm:$0xff] }
  0xd1   : > { %1464 = vmatpush.msrb.mxu3 %v1446_v46  ;;  %1214 = vmatmul.f32.vlgmr.msrb.gmra.mxu0 %v3421_v23  ;;  %v1402_v23 = vld [vmem:[#allocation4 + $0x90] sm:$0xff]  ;;  %v3432_v46 = vld [vmem:[%s3993_s22 + $0x58] sm:$0xf] }
  0xd2   : > { %1297 = vmatpush.msrb.mxu2 %v1246_v47  ;;  %1495 = vmatpush.msra.mxu0 %v1456_v48  ;;  %v1427_v47 = vld [vmem:[#allocation4 + $0x148] sm:$0xff] }
  0xd3   : > { %1337 = vmatpush.msra.mxu1 %v1247_v49  ;;  %1465 = vmatpush.msrb.mxu3 %v1444_v50  ;;  %v1393_v48 = vld [vmem:[#allocation4 + $0x48] sm:$0xff]  ;;  %v1654_v49 = vld [vmem:[#allocation4 + $0x320] sm:$0xff]  ;;  %v1390_v50 = vld [vmem:[#allocation4 + $0x30] sm:$0xff] }
  0xd4   : > { %1298 = vmatpush.msrb.mxu2 %v1244_v51  ;;  %1496 = vmatpush.msra.mxu0 %v1454_v52  ;;  %v1425_v51 = vld [vmem:[#allocation4 + $0x138] sm:$0xff] }
  0xd5   : > { %1299 = vmatmul.f32.vlgmr.msrb.gmra.mxu2 %v3425_v53  ;;  %1338 = vmatpush.msra.mxu1 %v1245_v54  ;;  %v1391_v52 = vld [vmem:[#allocation4 + $0x38] sm:$0xff]  ;;  %v1388_v54 = vld [vmem:[#allocation4 + $0x20] sm:$0xff] }
  0xd6   : > { %1466 = vmatpush.msrb.mxu3 %v1442_v55  ;;  %1501 = vmatpush.msrb.mxu0 %v1453_v56  ;;  %v3430_v55 = vld [vmem:[%s3993_s22 + $0x48] sm:$0xf] }
  0xd7   : > { %1535 = vmatpush.msra.mxu2 %v1457_v57  ;;  %1339 = vmatmul.f32.vlgmr.msra.gmra.mxu1 %v3425_v53  ;;  %v1652_v53 = vld [vmem:[#allocation4 + $0x310] sm:$0xff]  ;;  %v1423_v56 = vld [vmem:[#allocation4 + $0x128] sm:$0xff] }
  0xd8   : > { %1578 = vmatpush.msrb.mxu1 %v1418_v58  ;;  %1467 = vmatpush.msrb.mxu3 %v1440_v59  ;;  %v1389_v57 = vld [vmem:[#allocation4 + $0x28] sm:$0xff]  ;;  %v1650_v58 = vld [vmem:[#allocation4 + $0x300] sm:$0xff]  ;;  %v1386_v59 = vld [vmem:[#allocation4 + $0x10] sm:$0xff] }
  0xd9   : > { %1502 = vmatpush.msrb.mxu0 %v1451_v60  ;;  %1536 = vmatpush.msra.mxu2 %v1455_v61  ;;  %v1660_v60 = vld [vmem:[#allocation4 + $0x350] sm:$0xff]  ;;  %v1387_v61 = vld [vmem:[#allocation4 + $0x18] sm:$0xff] }
  0xda   : > { %1579 = vmatpush.msrb.mxu1 %v1416_v63  ;;  %1468 = vmatpush.msrb.mxu3 %v1438_v0  ;;  %v1384_v63 = vld [vmem:[#allocation4] sm:$0xff] }
  0xdb   : > { %1544 = vmatpush.msrb.mxu2 %v1414_v62  ;;  %1503 = vmatpush.msrb.mxu0 %v1449_v1  ;;  %v1648_v62 = vld [vmem:[#allocation4 + $0x2f0] sm:$0xff]  ;;  %v1658_v0 = vld [vmem:[#allocation4 + $0x340] sm:$0xff] }
  0xdc   : > { %1584 = vmatpush.msra.mxu1 %v1415_v2  ;;  %1469 = vmatpush.msrb.mxu3 %v1436_v4  ;;  %v3429_v1 = vld [vmem:[%s3993_s22 + $0x40] sm:$0xf]  ;;  %v1385_v2 = vld [vmem:[#allocation4 + $0x8] sm:$0xff]  ;;  %v1657_v4 = vld [vmem:[#allocation4 + $0x338] sm:$0xff] }
  0xdd   : > { %1545 = vmatpush.msrb.mxu2 %v1412_v3  ;;  %1504 = vmatpush.msrb.mxu0 %v1447_v5  ;;  %v1646_v3 = vld [vmem:[#allocation4 + $0x2e0] sm:$0xff]  ;;  %v1661_v5 = vld [vmem:[#allocation4 + $0x358] sm:$0xff] }
  0xde   : > { %1585 = vmatpush.msra.mxu1 %v1413_v6  ;;  %1470 = vmatpush.msrb.mxu3 %v1434_v8  ;;  %v1783_v6 = vld [vmem:[#allocation4 + $0x470] sm:$0xff]  ;;  %v1655_v8 = vld [vmem:[#allocation4 + $0x328] sm:$0xff] }
  0xdf   : > { %1546 = vmatpush.msrb.mxu2 %v1410_v7  ;;  %1505 = vmatpush.msrb.mxu0 %v1445_v9  ;;  %v1644_v7 = vld [vmem:[#allocation4 + $0x2d0] sm:$0xff]  ;;  %v1659_v9 = vld [vmem:[#allocation4 + $0x348] sm:$0xff] }
  0xe0   : > { %1586 = vmatpush.msra.mxu1 %v1411_v10  ;;  %1471 = vmatpush.msrb.mxu3 %v1432_v12  ;;  %v1779_v10 = vld [vmem:[#allocation4 + $0x450] sm:$0xff]  ;;  %v1642_v12 = vld [vmem:[#allocation4 + $0x2c0] sm:$0xff] }
  0xe1   : > { %1547 = vmatpush.msrb.mxu2 %v1408_v11  ;;  %1506 = vmatpush.msrb.mxu0 %v1443_v13  ;;  %v1781_v11 = vld [vmem:[#allocation4 + $0x460] sm:$0xff]  ;;  %v1653_v13 = vld [vmem:[#allocation4 + $0x318] sm:$0xff] }
  0xe2   : > { %1587 = vmatpush.msra.mxu1 %v1409_v14  ;;  %1472 = vmatpush.msrb.mxu3 %v1430_v16  ;;  %v1780_v14 = vld [vmem:[#allocation4 + $0x458] sm:$0xff]  ;;  %v1640_v16 = vld [vmem:[#allocation4 + $0x2b0] sm:$0xff] }
  0xe3   : > { %1548 = vmatpush.msrb.mxu2 %v1406_v15  ;;  %1507 = vmatpush.msrb.mxu0 %v1441_v17  ;;  %v1777_v15 = vld [vmem:[#allocation4 + $0x440] sm:$0xff]  ;;  %v1651_v17 = vld [vmem:[#allocation4 + $0x308] sm:$0xff] }
  0xe4   : > { %1588 = vmatpush.msra.mxu1 %v1407_v18  ;;  %1473 = vmatpush.msrb.mxu3 %v1428_v20  ;;  %v1778_v18 = vld [vmem:[#allocation4 + $0x448] sm:$0xff]  ;;  %v1638_v20 = vld [vmem:[#allocation4 + $0x2a0] sm:$0xff] }
  0xe5   : > { %1549 = vmatpush.msrb.mxu2 %v1404_v19  ;;  %1508 = vmatpush.msrb.mxu0 %v1439_v21  ;;  %v1775_v19 = vld [vmem:[#allocation4 + $0x430] sm:$0xff]  ;;  %v1649_v21 = vld [vmem:[#allocation4 + $0x2f8] sm:$0xff] }
  0xe6   : > { %1589 = vmatpush.msra.mxu1 %v1405_v22  ;;  %1474 = vmatpush.msrb.mxu3 %v1426_v24  ;;  %v1776_v22 = vld [vmem:[#allocation4 + $0x438] sm:$0xff]  ;;  %v1636_v24 = vld [vmem:[#allocation4 + $0x290] sm:$0xff] }
  0xe7   : > { %1550 = vmatpush.msrb.mxu2 %v1402_v23  ;;  %1509 = vmatpush.msrb.mxu0 %v1437_v25  ;;  %v1773_v23 = vld [vmem:[#allocation4 + $0x420] sm:$0xff]  ;;  %v1647_v25 = vld [vmem:[#allocation4 + $0x2e8] sm:$0xff] }
  0xe8   : > { %1590 = vmatpush.msra.mxu1 %v1403_v26  ;;  %1475 = vmatpush.msrb.mxu3 %v1424_v28  ;;  %v1774_v26 = vld [vmem:[#allocation4 + $0x428] sm:$0xff]  ;;  %v1634_v28 = vld [vmem:[#allocation4 + $0x280] sm:$0xff] }
  0xe9   : > { %1551 = vmatpush.msrb.mxu2 %v1400_v27  ;;  %1510 = vmatpush.msrb.mxu0 %v1435_v29  ;;  %v1771_v27 = vld [vmem:[#allocation4 + $0x410] sm:$0xff]  ;;  %v1645_v29 = vld [vmem:[#allocation4 + $0x2d8] sm:$0xff] }
  0xea   : > { %1591 = vmatpush.msra.mxu1 %v1401_v30  ;;  %1476 = vmatpush.msrb.mxu3 %v1422_v32  ;;  %v1772_v30 = vld [vmem:[#allocation4 + $0x418] sm:$0xff]  ;;  %v1632_v32 = vld [vmem:[#allocation4 + $0x270] sm:$0xff] }
  0xeb   : > { %1552 = vmatpush.msrb.mxu2 %v1398_v31  ;;  %1511 = vmatpush.msrb.mxu0 %v1433_v33  ;;  %v1769_v31 = vld [vmem:[#allocation4 + $0x400] sm:$0xff]  ;;  %v1643_v33 = vld [vmem:[#allocation4 + $0x2c8] sm:$0xff] }
  0xec   : > { %1592 = vmatpush.msra.mxu1 %v1399_v34  ;;  %1618 = vmatpush.msra.mxu3 %v1419_v36  ;;  %v1770_v34 = vld [vmem:[#allocation4 + $0x408] sm:$0xff]  ;;  %v4047_v36 = vpop.f32.mrf.mxu1 }
  0xed   : > { %1553 = vmatpush.msrb.mxu2 %v1396_v35  ;;  %1512 = vmatpush.msrb.mxu0 %v1431_v37  ;;  %v1767_v35 = vld [vmem:[#allocation4 + $0x3f0] sm:$0xff]  ;;  %v1630_v37 = vld [vmem:[#allocation4 + $0x260] sm:$0xff] }
  0xee   : > { %1593 = vmatpush.msra.mxu1 %v1397_v38  ;;  %1619 = vmatpush.msra.mxu3 %v1417_v40  ;;  %v1641_v38 = vld [vmem:[#allocation4 + $0x2b8] sm:$0xff]  ;;  %v1765_v40 = vld [vmem:[#allocation4 + $0x3e0] sm:$0xff] }
  0xef   : > { %1554 = vmatpush.msrb.mxu2 %v1394_v39  ;;  %1513 = vmatpush.msrb.mxu0 %v1429_v41  ;;  %v1768_v39 = vld [vmem:[#allocation4 + $0x3f8] sm:$0xff]  ;;  %v1628_v41 = vld [vmem:[#allocation4 + $0x250] sm:$0xff] }
  0xf0   : > { %1477 = vmatmul.f32.vlgmr.msrb.gmra.mxu3 %v3431_v42  ;;  %1594 = vmatpush.msra.mxu1 %v1395_v43  ;;  %v1766_v43 = vld [vmem:[#allocation4 + $0x3e8] sm:$0xff] }
  0xf1   : > { %1665 = vmatpush.msrb.mxu3 %v1656_v44  ;;  %1555 = vmatpush.msrb.mxu2 %v1392_v45  ;;  %v1763_v44 = vld [vmem:[#allocation4 + $0x3d0] sm:$0xff]  ;;  %v4049_v45 = vpop.f32.mrf.mxu0 }
  0xf2   : > { %3433 = vmatmul.msk.f32.vlgmr.msra.gmra.mxu0 %vm448_vm0, %v3432_v46  ;;  %3434 = vmatmul.msk.f32.vlgmr.msra.gmra.mxu2 %vm448_vm0, %v3432_v46  ;;  %v1626_v46 = vld [vmem:[#allocation4 + $0x240] sm:$0xff] }
  0xf3   : > { %1514 = vmatpush.msrb.mxu0 %v1427_v47  ;;  %1595 = vmatpush.msra.mxu1 %v1393_v48  ;;  %v1637_v47 = vld [vmem:[#allocation4 + $0x298] sm:$0xff] }
  0xf4   : > { %1666 = vmatpush.msrb.mxu3 %v1654_v49  ;;  %1556 = vmatpush.msrb.mxu2 %v1390_v50  ;;  %v1764_v48 = vld [vmem:[#allocation4 + $0x3d8] sm:$0xff]  ;;  %v4052_v49 = vld [vmem:[%s3993_s22 + $0x60] sm:$0xf] }
  0xf5   : > { %1515 = vmatpush.msrb.mxu0 %v1425_v51  ;;  %1596 = vmatpush.msra.mxu1 %v1391_v52  ;;  %v1761_v50 = vld [vmem:[#allocation4 + $0x3c0] sm:$0xff]  ;;  %v1784_v51 = vld [vmem:[#allocation4 + $0x478] sm:$0xff]  ;;  %v1635_v52 = vld [vmem:[#allocation4 + $0x288] sm:$0xff] }
  0xf6   : > { %1667 = vmatpush.msrb.mxu3 %v1652_v53  ;;  %1557 = vmatpush.msrb.mxu2 %v1388_v54  ;;  %v1762_v53 = vld [vmem:[#allocation4 + $0x3c8] sm:$0xff] }
  0xf7   : > { %3435 = vmatmul.msk.f32.vlgmr.msrb.gmra.mxu1 %vm448_vm0, %v3430_v55  ;;  %1516 = vmatpush.msrb.mxu0 %v1423_v56  ;;  %v3438_v54 = vld [vmem:[%s3993_s22 + $0x68] sm:$0xf] }
  0xf8   : > { %1597 = vmatpush.msra.mxu1 %v1389_v57  ;;  %1668 = vmatpush.msrb.mxu3 %v1650_v58  ;;  %v1782_v56 = vld [vmem:[#allocation4 + $0x468] sm:$0xff]  ;;  %v1633_v57 = vld [vmem:[#allocation4 + $0x278] sm:$0xff]  ;;  %v4056_v58 = vpop.f32.mrf.mxu1 }
  0xf9   : > { %1558 = vmatpush.msrb.mxu2 %v1386_v59  ;;  %1699 = vmatpush.msra.mxu0 %v1660_v60  ;;  %v1760_v59 = vld [vmem:[#allocation4 + $0x3b8] sm:$0xff]  ;;  %v1902_v60 = vld [vmem:[#allocation4 + $0x570] sm:$0xff] }
  0xfa   : > { %1598 = vmatpush.msra.mxu1 %v1387_v61  ;;  %1669 = vmatpush.msrb.mxu3 %v1648_v62  ;;  %v1631_v61 = vld [vmem:[#allocation4 + $0x268] sm:$0xff]  ;;  %v4059_v62 = vpop.f32.mrf.mxu0 }
  0xfb   : > { %1559 = vmatpush.msrb.mxu2 %v1384_v63  ;;  %3436 = vmatmul.msk.f32.vlgmr.msra.gmra.mxu3 %vm448_vm0, %v3430_v55  ;;  %v1759_v55 = vld [vmem:[#allocation4 + $0x3b0] sm:$0xff]  ;;  %v1757_v63 = vld [vmem:[#allocation4 + $0x3a0] sm:$0xff] }
  0xfc   : > { %1700 = vmatpush.msra.mxu0 %v1658_v0  ;;  %1560 = vmatmul.f32.vlgmr.msrb.gmra.mxu2 %v3429_v1  ;;  %v1758_v0 = vld [vmem:[#allocation4 + $0x3a8] sm:$0xff] }
  0xfd   : > { %1517 = vmatmul.f32.vlgmr.msrb.gmra.mxu0 %v3431_v42  ;;  %1599 = vmatpush.msra.mxu1 %v1385_v2  ;;  %v1639_v42 = vld [vmem:[#allocation4 + $0x2a8] sm:$0xff]  ;;  %v3442_v2 = vld [vmem:[%s3993_s22 + $0x78] sm:$0xf] }
  0xfe   : > { %1670 = vmatpush.msrb.mxu3 %v1646_v3  ;;  %1705 = vmatpush.msrb.mxu0 %v1657_v4  ;;  %v4062_v3 = vpop.f32.mrf.mxu2  ;;  %v1755_v4 = vld [vmem:[#allocation4 + $0x390] sm:$0xff] }
  0xff   : > { %1739 = vmatpush.msra.mxu2 %v1661_v5  ;;  %1822 = vmatpush.msrb.mxu1 %v1783_v6  ;;  %v1629_v5 = vld [vmem:[#allocation4 + $0x258] sm:$0xff] }
 0x100   : > { %1671 = vmatpush.msrb.mxu3 %v1644_v7  ;;  %1706 = vmatpush.msrb.mxu0 %v1655_v8  ;;  %v1756_v6 = vld [vmem:[#allocation4 + $0x398] sm:$0xff]  ;;  %v1898_v7 = vld [vmem:[#allocation4 + $0x550] sm:$0xff]  ;;  %v1753_v8 = vld [vmem:[#allocation4 + $0x380] sm:$0xff] }
 0x101   : > { %1740 = vmatpush.msra.mxu2 %v1659_v9  ;;  %1600 = vmatmul.f32.vlgmr.msra.gmra.mxu1 %v3429_v1  ;;  %v1900_v1 = vld [vmem:[#allocation4 + $0x560] sm:$0xff]  ;;  %v1627_v9 = vld [vmem:[#allocation4 + $0x248] sm:$0xff] }
 0x102   : > { %1823 = vmatpush.msrb.mxu1 %v1781_v11  ;;  %1672 = vmatpush.msrb.mxu3 %v1642_v12  ;;  %v4066_v11 = vpop.f32.mrf.mxu3  ;;  %v4068_v12 = vpop.f32.mrf.mxu1 }
 0x103   : > { %1788 = vmatpush.msrb.mxu2 %v1779_v10  ;;  %1707 = vmatpush.msrb.mxu0 %v1653_v13  ;;  %v1754_v10 = vld [vmem:[#allocation4 + $0x388] sm:$0xff]  ;;  %v1896_v13 = vld [vmem:[#allocation4 + $0x540] sm:$0xff] }
 0x104   : > { %1828 = vmatpush.msra.mxu1 %v1780_v14  ;;  %1673 = vmatpush.msrb.mxu3 %v1640_v16  ;;  %v1751_v14 = vld [vmem:[#allocation4 + $0x370] sm:$0xff]  ;;  %v4071_v16 = vpop.f32.mrf.mxu0 }
 0x105   : > { %1789 = vmatpush.msrb.mxu2 %v1777_v15  ;;  %1708 = vmatpush.msrb.mxu0 %v1651_v17  ;;  %v1906_v15 = vld [vmem:[#allocation4 + $0x590] sm:$0xff]  ;;  %v1752_v17 = vld [vmem:[#allocation4 + $0x378] sm:$0xff] }
 0x106   : > { %1829 = vmatpush.msra.mxu1 %v1778_v18  ;;  %1674 = vmatpush.msrb.mxu3 %v1638_v20  ;;  %v1894_v18 = vld [vmem:[#allocation4 + $0x530] sm:$0xff]  ;;  %v1904_v20 = vld [vmem:[#allocation4 + $0x580] sm:$0xff] }
 0x107   : > { %1790 = vmatpush.msrb.mxu2 %v1775_v19  ;;  %1709 = vmatpush.msrb.mxu0 %v1649_v21  ;;  %v1749_v19 = vld [vmem:[#allocation4 + $0x360] sm:$0xff]  ;;  %v4074_v21 = vpop.f32.mrf.mxu2 }
 0x108   : > { %1830 = vmatpush.msra.mxu1 %v1776_v22  ;;  %1675 = vmatpush.msrb.mxu3 %v1636_v24  ;;  %v3441_v22 = vld [vmem:[%s3993_s22 + $0x70] sm:$0xf]  ;;  %v1892_v24 = vld [vmem:[#allocation4 + $0x520] sm:$0xff] }
 0x109   : > { %1791 = vmatpush.msrb.mxu2 %v1773_v23  ;;  %1710 = vmatpush.msrb.mxu0 %v1647_v25  ;;  %v1750_v23 = vld [vmem:[#allocation4 + $0x368] sm:$0xff]  ;;  %v1903_v25 = vld [vmem:[#allocation4 + $0x578] sm:$0xff] }
 0x10a   : > { %1831 = vmatpush.msra.mxu1 %v1774_v26  ;;  %1676 = vmatpush.msrb.mxu3 %v1634_v28  ;;  %v1907_v26 = vld [vmem:[#allocation4 + $0x598] sm:$0xff]  ;;  %v1890_v28 = vld [vmem:[#allocation4 + $0x510] sm:$0xff] }
 0x10b   : > { %1792 = vmatpush.msrb.mxu2 %v1771_v27  ;;  %1711 = vmatpush.msrb.mxu0 %v1645_v29  ;;  %v2033_v27 = vld [vmem:[#allocation4 + $0x6b0] sm:$0xff]  ;;  %v4077_v29 = vpop.f32.mrf.mxu3 }
 0x10c   : > { %1832 = vmatpush.msra.mxu1 %v1772_v30  ;;  %1677 = vmatpush.msrb.mxu3 %v1632_v32  ;;  %v4079_v30 = vpop.f32.mrf.mxu1  ;;  %v1905_v32 = vld [vmem:[#allocation4 + $0x588] sm:$0xff] }
 0x10d   : > { %1793 = vmatpush.msrb.mxu2 %v1769_v31  ;;  %1712 = vmatpush.msrb.mxu0 %v1643_v33  ;;  %v1901_v31 = vld [vmem:[#allocation4 + $0x568] sm:$0xff]  ;;  %v2029_v33 = vld [vmem:[#allocation4 + $0x690] sm:$0xff] }
 0x10e   : > { %1833 = vmatpush.msra.mxu1 %v1770_v34  ;;  %1678 = vmatpush.msrb.mxu3 %v1630_v37  ;;  %v2031_v34 = vld [vmem:[#allocation4 + $0x6a0] sm:$0xff]  ;;  %v1899_v37 = vld [vmem:[#allocation4 + $0x558] sm:$0xff] }
 0x10f   : > { %1794 = vmatpush.msrb.mxu2 %v1767_v35  ;;  %1713 = vmatpush.msrb.mxu0 %v1641_v38  ;;  %v1888_v35 = vld [vmem:[#allocation4 + $0x500] sm:$0xff]  ;;  %v2030_v38 = vld [vmem:[#allocation4 + $0x698] sm:$0xff] }
 0x110   : > { %1834 = vmatpush.msra.mxu1 %v1768_v39  ;;  %1679 = vmatpush.msrb.mxu3 %v1628_v41  ;;  %v2027_v39 = vld [vmem:[#allocation4 + $0x680] sm:$0xff]  ;;  %v1886_v41 = vld [vmem:[#allocation4 + $0x4f0] sm:$0xff] }
 0x111   : > { %1795 = vmatpush.msrb.mxu2 %v1765_v40  ;;  %1714 = vmatpush.msrb.mxu0 %v1639_v42  ;;  %v4081_v40 = vpop.f32.mrf.mxu0  ;;  %v1897_v42 = vld [vmem:[#allocation4 + $0x548] sm:$0xff] }
 0x112   : > { %1835 = vmatpush.msra.mxu1 %v1766_v43  ;;  %1680 = vmatpush.msrb.mxu3 %v1626_v46  ;;  %v2028_v43 = vld [vmem:[#allocation4 + $0x688] sm:$0xff]  ;;  %v4083_v46 = vpop.f32.mrf.mxu2 }
 0x113   : > { %1796 = vmatpush.msrb.mxu2 %v1763_v44  ;;  %1715 = vmatpush.msrb.mxu0 %v1637_v47  ;;  %v2025_v44 = vld [vmem:[#allocation4 + $0x670] sm:$0xff]  ;;  %v1884_v47 = vld [vmem:[#allocation4 + $0x4e0] sm:$0xff] }
 0x114   : > { %1836 = vmatpush.msra.mxu1 %v1764_v48  ;;  %1681 = vmatmul.f32.vlgmr.msrb.gmra.mxu3 %v4052_v49  ;;  %v1895_v48 = vld [vmem:[#allocation4 + $0x538] sm:$0xff] }
 0x115   : > { %1797 = vmatpush.msrb.mxu2 %v1761_v50  ;;  %1862 = vmatpush.msra.mxu3 %v1784_v51  ;;  %v2023_v50 = vld [vmem:[#allocation4 + $0x660] sm:$0xff]  ;;  %v1882_v51 = vld [vmem:[#allocation4 + $0x4d0] sm:$0xff] }
 0x116   : > { %1716 = vmatpush.msrb.mxu0 %v1635_v52  ;;  %1837 = vmatpush.msra.mxu1 %v1762_v53  ;;  %v1893_v52 = vld [vmem:[#allocation4 + $0x528] sm:$0xff] }
 0x117   : > { %3439 = vmatmul.msk.f32.vlgmr.msra.gmra.mxu0 %vm448_vm0, %v3438_v54  ;;  %1798 = vmatpush.msrb.mxu2 %v1759_v55  ;;  %v2024_v53 = vld [vmem:[#allocation4 + $0x668] sm:$0xff]  ;;  %v4085_v55 = vpop.f32.mrf.mxu3 }
 0x118   : > { %1863 = vmatpush.msra.mxu3 %v1782_v56  ;;  %1717 = vmatpush.msrb.mxu0 %v1633_v57  ;;  %v4087_v56 = vpop.f32.mrf.mxu1  ;;  %v1880_v57 = vld [vmem:[#allocation4 + $0x4c0] sm:$0xff] }
 0x119   : > { %1838 = vmatpush.msra.mxu1 %v1760_v59  ;;  %3440 = vmatmul.msk.f32.vlgmr.msra.gmra.mxu2 %vm448_vm0, %v3438_v54  ;;  %v2021_v54 = vld [vmem:[#allocation4 + $0x650] sm:$0xff]  ;;  %v1891_v59 = vld [vmem:[#allocation4 + $0x518] sm:$0xff] }
 0x11a   : > { %1915 = vmatpush.msrb.mxu3 %v1902_v60  ;;  %1718 = vmatpush.msrb.mxu0 %v1631_v61  ;;  %v2022_v60 = vld [vmem:[#allocation4 + $0x658] sm:$0xff]  ;;  %v2019_v61 = vld [vmem:[#allocation4 + $0x640] sm:$0xff] }
 0x11b   : > { %1799 = vmatpush.msrb.mxu2 %v1757_v63  ;;  %1839 = vmatpush.msra.mxu1 %v1758_v0  ;;  %v1878_v63 = vld [vmem:[#allocation4 + $0x4b0] sm:$0xff]  ;;  %v1889_v0 = vld [vmem:[#allocation4 + $0x508] sm:$0xff] }
 0x11c   : > { %1916 = vmatpush.msrb.mxu3 %v1900_v1  ;;  %3443 = vmatmul.msk.f32.vlgmr.msrb.gmra.mxu1 %vm448_vm0, %v3442_v2 }
 0x11d   : > { %1800 = vmatpush.msrb.mxu2 %v1755_v4  ;;  %1719 = vmatpush.msrb.mxu0 %v1629_v5  ;;  %v2017_v4 = vld [vmem:[#allocation4 + $0x630] sm:$0xff]  ;;  %v1876_v5 = vld [vmem:[#allocation4 + $0x4a0] sm:$0xff] }
 0x11e   : > { %1840 = vmatpush.msra.mxu1 %v1756_v6  ;;  %1917 = vmatpush.msrb.mxu3 %v1898_v7  ;;  %v1887_v6 = vld [vmem:[#allocation4 + $0x4f8] sm:$0xff] }
 0x11f   : > { %1801 = vmatpush.msrb.mxu2 %v1753_v8  ;;  %3444 = vmatmul.msk.f32.vlgmr.msra.gmra.mxu3 %vm448_vm0, %v3442_v2  ;;  %v2020_v2 = vld [vmem:[#allocation4 + $0x648] sm:$0xff]  ;;  %v2018_v7 = vld [vmem:[#allocation4 + $0x638] sm:$0xff]  ;;  %v2015_v8 = vld [vmem:[#allocation4 + $0x620] sm:$0xff] }
 0x120   : > { %1720 = vmatpush.msrb.mxu0 %v1627_v9  ;;  %1841 = vmatpush.msra.mxu1 %v1754_v10  ;;  %v4092_v9 = vld [vmem:[%s3993_s22] sm:$0x1e]  ;;  %v4094_v10 = vpop.f32.mrf.mxu2 }
 0x121   : > { %1918 = vmatpush.msrb.mxu3 %v1896_v13  ;;  %1721 = vmatmul.f32.vlgmr.msrb.gmra.mxu0 %v4052_v49  ;;  %v2026_v49 = vld [vmem:[#allocation4 + $0x678] sm:$0xff]  ;;  %v4089_v1 = vpop.f32.mrf.mxu0  ;;  %v1874_v13 = vld [vmem:[#allocation4 + $0x490] sm:$0xff] }
 0x122   : > { %1802 = vmatpush.msrb.mxu2 %v1751_v14  ;;  %1949 = vmatpush.msra.mxu0 %v1906_v15  ;;  %v1885_v14 = vld [vmem:[#allocation4 + $0x4e8] sm:$0xff] }
 0x123   : > { %1842 = vmatpush.msra.mxu1 %v1752_v17  ;;  %1919 = vmatpush.msrb.mxu3 %v1894_v18  ;;  %v2016_v15 = vld [vmem:[#allocation4 + $0x628] sm:$0xff]  ;;  %v2013_v17 = vld [vmem:[#allocation4 + $0x610] sm:$0xff]  ;;  %v4096_v18 = vpop.f32.mrf.mxu3 }
 0x124   : > { %1803 = vmatpush.msrb.mxu2 %v1749_v19  ;;  %1950 = vmatpush.msra.mxu0 %v1904_v20  ;;  %v4098_v19 = vpop.f32.mrf.mxu1  ;;  %v1872_v20 = vld [vmem:[#allocation4 + $0x480] sm:$0xff] }
 0x125   : > { %1804 = vmatmul.f32.vlgmr.msrb.gmra.mxu2 %v3441_v22  ;;  %1843 = vmatpush.msra.mxu1 %v1750_v23  ;;  %v1910_v23 = vrot.slane %v4092_v9, 1  ;;  %v696_v9 = vadd.f32 %v4071_v16, %v4074_v21  ;;  %v2159_v16 = vld [vmem:[#allocation4 + $0x7c8] sm:$0xff] }
 0x126   : > { %1920 = vmatpush.msrb.mxu3 %v1892_v24  ;;  %1955 = vmatpush.msrb.mxu0 %v1903_v25  ;;  %v1871_v24 = vld [vmem:[%s3993_s22 + $0x8] sm:$0x1e]  ;;  %v2014_v25 = vld [vmem:[#allocation4 + $0x618] sm:$0xff] }
 0x127   : > { %1989 = vmatpush.msra.mxu2 %v1907_v26  ;;  %1844 = vmatmul.f32.vlgmr.msra.gmra.mxu1 %v3441_v22  ;;  %v1883_v22 = vld [vmem:[#allocation4 + $0x4d8] sm:$0xff]  ;;  %v2011_v26 = vld [vmem:[#allocation4 + $0x600] sm:$0xff] }
 0x128   : > { %2076 = vmatpush.msrb.mxu1 %v2033_v27  ;;  %1921 = vmatpush.msrb.mxu3 %v1890_v28  ;;  %v2034_v27 = vld [vmem:[#allocation4 + $0x6b8] sm:$0xff]  ;;  %v1881_v28 = vld [vmem:[#allocation4 + $0x4c8] sm:$0xff] }
 0x129   : > { %1956 = vmatpush.msrb.mxu0 %v1901_v31  ;;  %1990 = vmatpush.msra.mxu2 %v1905_v32  ;;  %v2012_v31 = vld [vmem:[#allocation4 + $0x608] sm:$0xff]  ;;  %v1911_v32 = vrot.slane %v1871_v24, 1 }
 0x12a   : > { %2077 = vmatpush.msrb.mxu1 %v2031_v34  ;;  %1922 = vmatpush.msrb.mxu3 %v1888_v35  ;;  %v2009_v34 = vld [vmem:[#allocation4 + $0x5f0] sm:$0xff]  ;;  %v2032_v35 = vld [vmem:[#allocation4 + $0x6a8] sm:$0xff] }
 0x12b   : > { %2042 = vmatpush.msrb.mxu2 %v2029_v33  ;;  %1957 = vmatpush.msrb.mxu0 %v1899_v37  ;;  %v4104_v33 = vpop.f32.mrf.mxu0  ;;  %v1879_v37 = vld [vmem:[#allocation4 + $0x4b8] sm:$0xff] }
 0x12c   : > { %2082 = vmatpush.msra.mxu1 %v2030_v38  ;;  %1923 = vmatpush.msrb.mxu3 %v1886_v41  ;;  %v3448_v38 = vld [vmem:[%s3993_s22 + $0x18] sm:$0x1e] }
 0x12d   : > { %2043 = vmatpush.msrb.mxu2 %v2027_v39  ;;  %1958 = vmatpush.msrb.mxu0 %v1897_v42  ;;  %v4107_v39 = vpop.f32.mrf.mxu2  ;;  %v2010_v41 = vld [vmem:[#allocation4 + $0x5f8] sm:$0xff]  ;;  %v2156_v42 = vld [vmem:[#allocation4 + $0x7b0] sm:$0xff] }
 0x12e   : > { %2083 = vmatpush.msra.mxu1 %v2028_v43  ;;  %1924 = vmatpush.msrb.mxu3 %v1884_v47  ;;  %v1877_v43 = vld [vmem:[#allocation4 + $0x4a8] sm:$0xff]  ;;  %v2007_v47 = vld [vmem:[#allocation4 + $0x5e0] sm:$0xff] }
 0x12f   : > { %2044 = vmatpush.msrb.mxu2 %v2025_v44  ;;  %1959 = vmatpush.msrb.mxu0 %v1895_v48  ;;  %v4110_v44 = vpop.f32.mrf.mxu3  ;;  %v2008_v48 = vld [vmem:[#allocation4 + $0x5e8] sm:$0xff] }
 0x130   : > { %2084 = vmatpush.msra.mxu1 %v2026_v49  ;;  %1925 = vmatpush.msrb.mxu3 %v1882_v51  ;;  %v2038_v49 = vrot.slane %v3448_v38, 1  ;;  %v4112_v51 = vpop.f32.mrf.mxu1 }
 0x131   : > { %2045 = vmatpush.msrb.mxu2 %v2023_v50  ;;  %1960 = vmatpush.msrb.mxu0 %v1893_v52  ;;  %v2154_v50 = vld [vmem:[#allocation4 + $0x7a0] sm:$0xff]  ;;  %v2005_v52 = vld [vmem:[#allocation4 + $0x5d0] sm:$0xff] }
 0x132   : > { %2085 = vmatpush.msra.mxu1 %v2024_v53  ;;  %1926 = vmatpush.msrb.mxu3 %v1880_v57  ;;  %v1875_v53 = vld [vmem:[#allocation4 + $0x498] sm:$0xff]  ;;  %v2152_v57 = vld [vmem:[#allocation4 + $0x790] sm:$0xff] }
 0x133   : > { %2046 = vmatpush.msrb.mxu2 %v2021_v54  ;;  %1961 = vmatpush.msrb.mxu0 %v1891_v59  ;;  %v2006_v54 = vld [vmem:[#allocation4 + $0x5d8] sm:$0xff]  ;;  %v2003_v59 = vld [vmem:[#allocation4 + $0x5c0] sm:$0xff] }
 0x134   : > { %2086 = vmatpush.msra.mxu1 %v2022_v60  ;;  %1927 = vmatpush.msrb.mxu3 %v1878_v63  ;;  %v1873_v63 = vld [vmem:[#allocation4 + $0x488] sm:$0xff] }
 0x135   : > { %2047 = vmatpush.msrb.mxu2 %v2019_v61  ;;  %1962 = vmatpush.msrb.mxu0 %v1889_v0  ;;  %v530_v61 = vadd.f32 %v4066_v11, %v4062_v3  ;;  %v2004_v0 = vld [vmem:[#allocation4 + $0x5c8] sm:$0xff]  ;;  %v2160_v3 = vld [vmem:[#allocation4 + $0x7d0] sm:$0xff]  ;;  %v2002_v11 = vld [vmem:[#allocation4 + $0x5b8] sm:$0xff] }
 0x136   : > { %2087 = vmatpush.msra.mxu1 %v2020_v2  ;;  %1928 = vmatpush.msrb.mxu3 %v1876_v5  ;;  %v490_v2 = vadd.f32 %v4047_v36, %v4049_v45  ;;  %v2150_v5 = vld [vmem:[#allocation4 + $0x780] sm:$0xff]  ;;  %v736_v36 = vadd.f32 %v4068_v12, %v4081_v40  ;;  %v2157_v40 = vld [vmem:[#allocation4 + $0x7b8] sm:$0xff] }
 0x137   : > { %2048 = vmatpush.msrb.mxu2 %v2017_v4  ;;  %1963 = vmatpush.msrb.mxu0 %v1887_v6  ;;  %v4122_v4 = vpop.f32.mrf.mxu2  ;;  %v3447_v6 = vld [vmem:[%s3993_s22 + $0x10] sm:$0x1e]  ;;  %v1999_v45 = vld [vmem:[#allocation4 + $0x5a0] sm:$0xff] }
 0x138   : > { %2088 = vmatpush.msra.mxu1 %v2018_v7  ;;  %1929 = vmatpush.msrb.mxu3 %v1874_v13  ;;  %v593_v7 = vadd.f32 %v4085_v55, %v530_v61  ;;  %v2148_v13 = vld [vmem:[#allocation4 + $0x770] sm:$0xff]  ;;  %v2158_v55 = vld [vmem:[#allocation4 + $0x7c0] sm:$0xff] }
 0x139   : > { %2049 = vmatpush.msrb.mxu2 %v2015_v8  ;;  %1964 = vmatpush.msrb.mxu0 %v1885_v14  ;;  %v2001_v8 = vld [vmem:[#allocation4 + $0x5b0] sm:$0xff]  ;;  %v2146_v12 = vld [vmem:[#allocation4 + $0x760] sm:$0xff] }
 0x13a   : > { %2089 = vmatpush.msra.mxu1 %v2016_v15  ;;  %1930 = vmatpush.msrb.mxu3 %v1872_v20  ;;  %v2037_v15 = vrot.slane %v3447_v6, 1  ;;  %v2000_v20 = vld [vmem:[#allocation4 + $0x5a8] sm:$0xff]  ;;  %v613_v24 = vadd.f32 %v4059_v62, %v593_v7  ;;  %v2287_v62 = vld [vmem:[#allocation4 + $0x8f0] sm:$0xff]  ;;  %v2277_v61 = vld [vmem:[#allocation4 + $0x8a0] sm:$0xff] }
 0x13b   : > { %2050 = vmatpush.msrb.mxu2 %v2013_v17  ;;  %1965 = vmatpush.msrb.mxu0 %v1883_v22  ;;  %v553_v17 = vadd.f32 %v4056_v58, %v490_v2  ;;  %v2161_v58 = vld [vmem:[#allocation4 + $0x7d8] sm:$0xff]  ;;  %v2278_v7 = vld [vmem:[#allocation4 + $0x8a8] sm:$0xff] }
 0x13c   : > { %2090 = vmatpush.msra.mxu1 %v2014_v25  ;;  %1931 = vmatmul.f32.vlgmr.msrb.gmra.mxu3 %v1910_v23  ;;  %v861_v25 = vadd.f32 %v4083_v46, %v4087_v56  ;;  %v821_v56 = vadd.f32 %v4079_v30, %v4096_v18  ;;  %v2142_v30 = vld [vmem:[#allocation4 + $0x740] sm:$0xff]  ;;  %v2153_v18 = vld [vmem:[#allocation4 + $0x798] sm:$0xff] }
 0x13d   : > { %2051 = vmatpush.msrb.mxu2 %v2011_v26  ;;  %2116 = vmatpush.msra.mxu3 %v2034_v27  ;;  %v986_v26 = vadd.f32 %v4107_v39, %v4110_v44  ;;  %v2144_v27 = vld [vmem:[#allocation4 + $0x750] sm:$0xff]  ;;  %v573_v46 = vadd.f32 %v4077_v29, %v553_v17  ;;  %v946_v29 = vadd.f32 %v4094_v10, %v4089_v1  ;;  %v2282_v10 = vld [vmem:[#allocation4 + $0x8c8] sm:$0xff] }
 0x13e   : > { %1966 = vmatpush.msrb.mxu0 %v1881_v28  ;;  %2091 = vmatpush.msra.mxu1 %v2012_v31  ;;  %v2155_v28 = vld [vmem:[#allocation4 + $0x7a8] sm:$0xff]  ;;  %v1071_v1 = vadd.f32 %v4098_v19, %v4122_v4  ;;  %v2136_v4 = vld [vmem:[#allocation4 + $0x710] sm:$0xff] }
 0x13f   : > { %3445 = vmatmul.msk.f32.vlgmr.msra.gmra.mxu0 %vm448_vm0, %v1911_v32  ;;  %2052 = vmatpush.msrb.mxu2 %v2009_v34  ;;  %v1111_v34 = vadd.f32 %v4104_v33, %v4112_v51  ;;  %v738_v38 = vadd.f32 %v696_v9, %v573_v46  ;;  %v2140_v33 = vld [vmem:[#allocation4 + $0x730] sm:$0xff] }
 0x140   : > { %2117 = vmatpush.msra.mxu3 %v2032_v35  ;;  %1967 = vmatpush.msrb.mxu0 %v1879_v37  ;;  %v2283_v35 = vld [vmem:[#allocation4 + $0x8d0] sm:$0xff]  ;;  %v2285_v37 = vld [vmem:[#allocation4 + $0x8e0] sm:$0xff] }
 0x141   : > { %2092 = vmatpush.msra.mxu1 %v2010_v41  ;;  %3446 = vmatmul.msk.f32.vlgmr.msra.gmra.mxu2 %vm448_vm0, %v1911_v32  ;;  %v2284_v41 = vld [vmem:[#allocation4 + $0x8d8] sm:$0xff]  ;;  %v863_v44 = vadd.f32 %v821_v56, %v738_v38  ;;  %v2279_v51 = vld [vmem:[#allocation4 + $0x8b0] sm:$0xff]  ;;  %v2139_v56 = vld [vmem:[#allocation4 + $0x728] sm:$0xff] }
 0x142   : > { %2169 = vmatpush.msrb.mxu3 %v2156_v42  ;;  %1968 = vmatpush.msrb.mxu0 %v1877_v43  ;;  %v2281_v42 = vld [vmem:[#allocation4 + $0x8c0] sm:$0xff]  ;;  %v2128_v46 = vld [vmem:[#allocation4 + $0x6d0] sm:$0xff]  ;;  %v2268_v38 = vld [vmem:[#allocation4 + $0x858] sm:$0xff] }
 0x143   : > { %2053 = vmatpush.msrb.mxu2 %v2007_v47  ;;  %2093 = vmatpush.msra.mxu1 %v2008_v48  ;;  %v2151_v47 = vld [vmem:[#allocation4 + $0x788] sm:$0xff] }
 0x144   : > { %2170 = vmatpush.msrb.mxu3 %v2154_v50  ;;  %3449 = vmatmul.msk.f32.vlgmr.msrb.gmra.mxu1 %vm448_vm0, %v2038_v49  ;;  %v4116_v60 = vpop.f32.mrf.mxu0 }
 0x145   : > { %2054 = vmatpush.msrb.mxu2 %v2005_v52  ;;  %1969 = vmatpush.msrb.mxu0 %v1875_v53  ;;  %v988_v52 = vadd.f32 %v946_v29, %v863_v44  ;;  %v2138_v53 = vld [vmem:[#allocation4 + $0x720] sm:$0xff]  ;;  %v3456_v44 = vld [vmem:[%s3993_s22 + $0x38] sm:$0x1e] }
 0x146   : > { %2094 = vmatpush.msra.mxu1 %v2006_v54  ;;  %2171 = vmatpush.msrb.mxu3 %v2152_v57  ;;  %v2149_v54 = vld [vmem:[#allocation4 + $0x778] sm:$0xff] }
 0x147   : > { %2055 = vmatpush.msrb.mxu2 %v2003_v59  ;;  %3450 = vmatmul.msk.f32.vlgmr.msra.gmra.mxu3 %vm448_vm0, %v2038_v49  ;;  %v4127_v14 = vpop.f32.mrf.mxu3  ;;  %v4150_v49 = vld [vmem:[#allocation7] sm:$0x3]  ;;  %v2280_v59 = vld [vmem:[#allocation4 + $0x8b8] sm:$0xff]  ;;  %v1113_v6 = vadd.f32 %v1071_v1, %v988_v52  ;;  %v2292_v1 = vrot.slane %v3456_v44, 1 }
 0x148   : > { %1970 = vmatpush.msrb.mxu0 %v1873_v63  ;;  %2095 = vmatpush.msra.mxu1 %v2004_v0  ;;  %v1196_v63 = vadd.f32 %v4116_v60, %v4127_v14  ;;  %v1368_v19 = vperm.slane %v4150_v49, 1  ;;  %v2276_v60 = vld [vmem:[#allocation4 + $0x898] sm:$0xff]  ;;  %v2273_v14 = vld [vmem:[#allocation4 + $0x880] sm:$0xff]  ;;  %v1367_v17 = vperm.slane %v4150_v49, 0  ;;  %v2262_v49 = vld [vmem:[#allocation4 + $0x828] sm:$0xff] }
 0x149   : > { %2172 = vmatpush.msrb.mxu3 %v2150_v5  ;;  %1971 = vmatmul.f32.vlgmr.msrb.gmra.mxu0 %v1910_v23  ;;  %v4134_v22 = vpop.f32.mrf.mxu1  ;;  %v739_v23 = vadd.f32 %v736_v36, %v613_v24  ;;  %v2147_v5 = vld [vmem:[#allocation4 + $0x768] sm:$0xff]  ;;  %v2260_v52 = vld [vmem:[#allocation4 + $0x818] sm:$0xff] }
 0x14a   : > { %2056 = vmatpush.msrb.mxu2 %v2001_v8  ;;  %2203 = vmatpush.msra.mxu0 %v2160_v3  ;;  %v2275_v8 = vld [vmem:[#allocation4 + $0x890] sm:$0xff]  ;;  %v2143_v24 = vld [vmem:[#allocation4 + $0x748] sm:$0xff]  ;;  %v2509_v44 = vld [vmem:[#allocation9 + $0x378] sm:$0xff] }
 0x14b   : > { %2096 = vmatpush.msra.mxu1 %v2002_v11  ;;  %2173 = vmatpush.msrb.mxu3 %v2148_v13  ;;  %v864_v32 = vadd.f32 %v861_v25, %v739_v23  ;;  %v2134_v11 = vld [vmem:[#allocation4 + $0x700] sm:$0xff]  ;;  %v2145_v13 = vld [vmem:[#allocation4 + $0x758] sm:$0xff]  ;;  %v2274_v25 = vld [vmem:[#allocation4 + $0x888] sm:$0xff] }
 0x14c   : > { %2057 = vmatpush.msrb.mxu2 %v1999_v45  ;;  %2204 = vmatpush.msra.mxu0 %v2158_v55  ;;  %v1235_v31 = vpop.f32.mrf.mxu2  ;;  %v1238_v45 = vadd.f32 %v1196_v63, %v1113_v6  ;;  %v2141_v23 = vld [vmem:[#allocation4 + $0x738] sm:$0xff]  ;;  %v2255_v63 = vld [vmem:[#allocation4 + $0x7f0] sm:$0xff] }
 0x14d   : > { %2058 = vmatmul.f32.vlgmr.msrb.gmra.mxu2 %v2037_v15  ;;  %2097 = vmatpush.msra.mxu1 %v2000_v20  ;;  %v989_v39 = vadd.f32 %v986_v26, %v864_v32  ;;  %v2132_v20 = vld [vmem:[#allocation4 + $0x6f0] sm:$0xff]  ;;  %v2269_v26 = vld [vmem:[#allocation4 + $0x860] sm:$0xff] }
 0x14e   : > { %2174 = vmatpush.msrb.mxu3 %v2146_v12  ;;  %2209 = vmatpush.msrb.mxu0 %v2157_v40  ;;  %v1215_v21 = vpop.f32.mrf.mxu0  ;;  %v2271_v12 = vld [vmem:[#allocation4 + $0x870] sm:$0xff] }
 0x14f   : > { %2243 = vmatpush.msra.mxu2 %v2161_v58  ;;  %2098 = vmatmul.f32.vlgmr.msra.gmra.mxu1 %v2037_v15  ;;  %v1236_v43 = vadd.f32 %v1235_v31, %v1215_v21  ;;  %v1114_v50 = vadd.f32 %v1111_v34, %v989_v39  ;;  %v2130_v58 = vld [vmem:[#allocation4 + $0x6e0] sm:$0xff]  ;;  %v3452_v21 = vld [vmem:[%s3993_s22 + $0x28] sm:$0x1e]  ;;  %v2492_v6 = vld [vmem:[#allocation9 + $0x2f0] sm:$0xff] }
 0x150   : > { %2330 = vmatpush.msrb.mxu1 %v2287_v62  ;;  %2175 = vmatpush.msrb.mxu3 %v2144_v27  ;;  %v4160_v62 = vld [vmem:[%s3993_s22 + $0x20] sm:$0x1e]  ;;  %v2165_v39 = vrot.slane %v3452_v21, 1  ;;  %v2480_v21 = vld [vmem:[#allocation9 + $0x290] sm:$0xff] }
 0x151   : > { %2210 = vmatpush.msrb.mxu0 %v2155_v28  ;;  %2244 = vmatpush.msra.mxu2 %v2159_v16  ;;  %v1239_v0 = vadd.f32 %v1236_v43, %v1114_v50  ;;  %v2270_v28 = vld [vmem:[#allocation4 + $0x868] sm:$0xff]  ;;  %v2267_v16 = vld [vmem:[#allocation4 + $0x850] sm:$0xff]  ;;  %v2126_v34 = vld [vmem:[#allocation4 + $0x6c0] sm:$0xff] }
 0x152   : > { %2331 = vmatpush.msrb.mxu1 %v2285_v37  ;;  %v1360_v48 = vpop.f32.mrf.mxu3  ;;  %2176 = vmatpush.msrb.mxu3 %v2142_v30  ;;  %v2164_v37 = vrot.slane %v4160_v62, 1  ;;  %v2265_v30 = vld [vmem:[#allocation4 + $0x840] sm:$0xff]  ;;  %v2133_v43 = vld [vmem:[#allocation4 + $0x6f8] sm:$0xff] }
 0x153   : > { %2296 = vmatpush.msrb.mxu2 %v2283_v35  ;;  %2211 = vmatpush.msrb.mxu0 %v2153_v18  ;;  %v2137_v35 = vld [vmem:[#allocation4 + $0x718] sm:$0xff]  ;;  %v2135_v18 = vld [vmem:[#allocation4 + $0x708] sm:$0xff] }
 0x154   : > { %2336 = vmatpush.msra.mxu1 %v2284_v41  ;;  %v1340_v57 = vpop.f32.mrf.mxu1  ;;  %2177 = vmatpush.msrb.mxu3 %v2140_v33  ;;  %v2266_v41 = vld [vmem:[#allocation4 + $0x848] sm:$0xff]  ;;  %v2264_v33 = vld [vmem:[#allocation4 + $0x838] sm:$0xff] }
 0x155   : > { %2297 = vmatpush.msrb.mxu2 %v2281_v42  ;;  %2212 = vmatpush.msrb.mxu0 %v2151_v47  ;;  %v1361_v2 = vadd.f32 %v1360_v48, %v1340_v57  ;;  %v2263_v42 = vld [vmem:[#allocation4 + $0x830] sm:$0xff]  ;;  %v2261_v47 = vld [vmem:[#allocation4 + $0x820] sm:$0xff]  ;;  %v2131_v48 = vld [vmem:[#allocation4 + $0x6e8] sm:$0xff] }
 0x156   : > { %2337 = vmatpush.msra.mxu1 %v2282_v10  ;;  %2178 = vmatpush.msrb.mxu3 %v2138_v53  ;;  %v2288_v50 = vld [vmem:[#allocation4 + $0x8f8] sm:$0xff]  ;;  %v2259_v10 = vld [vmem:[#allocation4 + $0x810] sm:$0xff]  ;;  %v2286_v53 = vld [vmem:[#allocation4 + $0x8e8] sm:$0xff] }
 0x157   : > { %2298 = vmatpush.msrb.mxu2 %v2279_v51  ;;  %2213 = vmatpush.msrb.mxu0 %v2149_v54  ;;  %v1364_v3 = vadd.f32 %v1361_v2, %v1239_v0  ;;  %v2129_v51 = vld [vmem:[#allocation4 + $0x6d8] sm:$0xff]  ;;  %v2257_v54 = vld [vmem:[#allocation4 + $0x800] sm:$0xff]  ;;  %v2127_v57 = vld [vmem:[#allocation4 + $0x6c8] sm:$0xff] }
 0x158   : > { %2338 = vmatpush.msra.mxu1 %v2280_v59  ;;  %v1300_v36 = vpop.f32.mrf.mxu2  ;;  %2179 = vmatpush.msrb.mxu3 %v2136_v4  ;;  %v2258_v59 = vld [vmem:[#allocation4 + $0x808] sm:$0xff]  ;;  %v2256_v0 = vld [vmem:[#allocation4 + $0x7f8] sm:$0xff]  ;;  %v2253_v2 = vld [vmem:[#allocation4 + $0x7e0] sm:$0xff] }
 0x159   : > { %2299 = vmatpush.msrb.mxu2 %v2277_v61  ;;  %2214 = vmatpush.msrb.mxu0 %v2147_v5  ;;  %v1372_v55 = vadd.f32 %v1368_v19, %v1364_v3  ;;  %v1321_v15 = vadd.f32 %v4134_v22, %v1300_v36  ;;  %v2272_v22 = vld [vmem:[#allocation4 + $0x878] sm:$0xff]  ;;  %v3455_v61 = vld [vmem:[%s3993_s22 + $0x30] sm:$0x1e]  ;;  %v2254_v4 = vld [vmem:[#allocation4 + $0x7e8] sm:$0xff] }
 0x15a   : > { %2339 = vmatpush.msra.mxu1 %v2278_v7  ;;  %2180 = vmatpush.msrb.mxu3 %v2134_v11  ;;  %v2291_v19 = vrot.slane %v3455_v61, 1  ;;  %v2524_v7 = vld [vmem:[#allocation9 + $0x3f0] sm:$0xff]  ;;  %v2525_v3 = vld [vmem:[#allocation9 + $0x3f8] sm:$0xff]  ;;  %v2490_v36 = vld [vmem:[#allocation9 + $0x2e0] sm:$0xff] }
 0x15b   : > { %2300 = vmatpush.msrb.mxu2 %v2275_v8  ;;  %2215 = vmatpush.msrb.mxu0 %v2145_v13  ;;  %v1374_v40 = vmax.f32 %v1372_v55, 0.0  ;;  %v1363_v9 = vadd.f32 %v1321_v15, %v1238_v45  ;;  %v2493_v8 = vld [vmem:[#allocation9 + $0x2f8] sm:$0xff]  ;;  %v2523_v45 = vld [vmem:[#allocation9 + $0x3e8] sm:$0xff]  ;;  %v2488_v55 = vld [vmem:[#allocation9 + $0x2d0] sm:$0xff] }
 0x15c   : > { %2340 = vmatpush.msra.mxu1 %v2276_v60  ;;  %2181 = vmatpush.msrb.mxu3 %v2132_v20  ;;  %v2522_v60 = vld [vmem:[#allocation9 + $0x3e0] sm:$0xff]  ;;  %v2520_v15 = vld [vmem:[#allocation9 + $0x3d0] sm:$0xff]  ;;  %v2489_v20 = vld [vmem:[#allocation9 + $0x2d8] sm:$0xff] }
 0x15d   : > { %2301 = vmatpush.msrb.mxu2 %v2273_v14  ;;  %2216 = vmatpush.msrb.mxu0 %v2143_v24  ;;  %v1371_v27 = vadd.f32 %v1367_v17, %v1363_v9  ;;  %v1377_v31 = vrot.slane %v1374_v40, 4  ;;  %v2491_v14 = vld [vmem:[#allocation9 + $0x2e8] sm:$0xff]  ;;  %v2521_v24 = vld [vmem:[#allocation9 + $0x3d8] sm:$0xff] }
 0x15e   : > { %2341 = vmatpush.msra.mxu1 %v2274_v25  ;;  %2182 = vmatpush.msrb.mxu3 %v2130_v58  ;;  %v2486_v25 = vld [vmem:[#allocation9 + $0x2c0] sm:$0xff]  ;;  %v2487_v40 = vld [vmem:[#allocation9 + $0x2c8] sm:$0xff]  ;;  %v2517_v62 = vld [vmem:[#allocation9 + $0x3b8] sm:$0xff] }
 0x15f   : > { %2302 = vmatpush.msrb.mxu2 %v2271_v12  ;;  %2217 = vmatpush.msrb.mxu0 %v2141_v23  ;;  %v1373_v32 = vmax.f32 %v1371_v27, 0.0  ;;  %v2518_v12 = vld [vmem:[#allocation9 + $0x3c0] sm:$0xff]  ;;  %v2519_v9 = vld [vmem:[#allocation9 + $0x3c8] sm:$0xff]  ;;  %v2484_v23 = vld [vmem:[#allocation9 + $0x2b0] sm:$0xff] }
 0x160   : > { %2342 = vmatpush.msra.mxu1 %v2272_v22  ;;  %2183 = vmatpush.msrb.mxu3 %v2128_v46  ;;  %v2516_v22 = vld [vmem:[#allocation9 + $0x3b0] sm:$0xff]  ;;  %v2482_v27 = vld [vmem:[#allocation9 + $0x2a0] sm:$0xff]  ;;  %v2503_v61 = vld [vmem:[#allocation9 + $0x348] sm:$0xff] }
 0x161   : > { %2303 = vmatpush.msrb.mxu2 %v2269_v26  ;;  %2218 = vmatpush.msrb.mxu0 %v2139_v56  ;;  %v1379_v29 = vsel %vm1378_vm1, %v1373_v32, %v1377_v31  ;;  %v2485_v26 = vld [vmem:[#allocation9 + $0x2b8] sm:$0xff]  ;;  %v2514_v46 = vld [vmem:[#allocation9 + $0x3a0] sm:$0xff]  ;;  %v2483_v56 = vld [vmem:[#allocation9 + $0x2a8] sm:$0xff] }
 0x162   : > { %2343 = vmatpush.msra.mxu1 %v2270_v28  ;;  %1381 = vst [vmem:[#allocation2] sm:$0xff] %v1379_v29  ;;  %2184 = vmatpush.msrb.mxu3 %v2126_v34  ;;  %v2515_v28 = vld [vmem:[#allocation9 + $0x3a8] sm:$0xff]  ;;  %v2512_v31 = vld [vmem:[#allocation9 + $0x390] sm:$0xff]  ;;  %v2481_v34 = vld [vmem:[#allocation9 + $0x298] sm:$0xff] }
 0x163   : > { %2304 = vmatpush.msrb.mxu2 %v2267_v16  ;;  %2219 = vmatpush.msrb.mxu0 %v2137_v35  ;;  %v2513_v35 = vld [vmem:[#allocation9 + $0x398] sm:$0xff]  ;;  %v2479_v29 = vld [vmem:[#allocation9 + $0x288] sm:$0xff] }
 0x164   : > { %2344 = vmatpush.msra.mxu1 %v2268_v38  ;;  %2185 = vmatmul.f32.vlgmr.msrb.gmra.mxu3 %v2164_v37  ;;  %v2510_v38 = vld [vmem:[#allocation9 + $0x380] sm:$0xff] }
 0x165   : > { %2305 = vmatpush.msrb.mxu2 %v2265_v30  ;;  %2220 = vmatpush.msrb.mxu0 %v2135_v18  ;;  %v2511_v30 = vld [vmem:[#allocation9 + $0x388] sm:$0xff] }
 0x166   : > { %2345 = vmatpush.msra.mxu1 %v2266_v41  ;;  %3453 = vmatmul.msk.f32.vlgmr.msra.gmra.mxu0 %vm448_vm0, %v2165_v39  ;;  %v2476_v41 = vld [vmem:[#allocation9 + $0x270] sm:$0xff] }
 0x167   : > { %2306 = vmatpush.msrb.mxu2 %v2263_v42  ;;  %2221 = vmatpush.msrb.mxu0 %v2133_v43  ;;  %v2508_v42 = vld [vmem:[#allocation9 + $0x370] sm:$0xff]  ;;  %v2477_v43 = vld [vmem:[#allocation9 + $0x278] sm:$0xff] }
 0x168   : > { %2346 = vmatpush.msra.mxu1 %v2264_v33  ;;  %3454 = vmatmul.msk.f32.vlgmr.msra.gmra.mxu2 %vm448_vm0, %v2165_v39  ;;  %v2474_v33 = vld [vmem:[#allocation9 + $0x260] sm:$0xff] }
 0x169   : > { %2307 = vmatpush.msrb.mxu2 %v2261_v47  ;;  %2222 = vmatpush.msrb.mxu0 %v2131_v48  ;;  %v2506_v47 = vld [vmem:[#allocation9 + $0x360] sm:$0xff]  ;;  %v2475_v48 = vld [vmem:[#allocation9 + $0x268] sm:$0xff] }
 0x16a   : > { %2347 = vmatpush.msra.mxu1 %v2262_v49  ;;  %2370 = vmatpush.msra.mxu3 %v2288_v50  ;;  %v2507_v49 = vld [vmem:[#allocation9 + $0x368] sm:$0xff] }
 0x16b   : > { %2308 = vmatpush.msrb.mxu2 %v2259_v10  ;;  %3457 = vmatmul.msk.f32.vlgmr.msrb.gmra.mxu1 %vm448_vm0, %v2292_v1  ;;  %v2504_v10 = vld [vmem:[#allocation9 + $0x350] sm:$0xff] }
 0x16c   : > { %2223 = vmatpush.msrb.mxu0 %v2129_v51  ;;  %2348 = vmatpush.msra.mxu1 %v2260_v52  ;;  %v2473_v52 = vld [vmem:[#allocation9 + $0x258] sm:$0xff] }
 0x16d   : > { %2371 = vmatpush.msra.mxu3 %v2286_v53  ;;  %2309 = vmatpush.msrb.mxu2 %v2257_v54  ;;  %v2505_v53 = vld [vmem:[#allocation9 + $0x358] sm:$0xff]  ;;  %v2470_v54 = vld [vmem:[#allocation9 + $0x240] sm:$0xff] }
 0x16e   : > { %3458 = vmatmul.msk.f32.vlgmr.msra.gmra.mxu3 %vm448_vm0, %v2292_v1  ;;  %2224 = vmatpush.msrb.mxu0 %v2127_v57  ;;  %v2472_v1 = vld [vmem:[#allocation9 + $0x250] sm:$0xff]  ;;  %v2502_v57 = vld [vmem:[#allocation9 + $0x340] sm:$0xff] }
 0x16f   : > { %2349 = vmatpush.msra.mxu1 %v2258_v59  ;;  %2225 = vmatmul.f32.vlgmr.msrb.gmra.mxu0 %v2164_v37  ;;  %v4171_v5 = vpop.f32.mrf.mxu0  ;;  %v2478_v37 = vld [vmem:[#allocation9 + $0x280] sm:$0xff]  ;;  %v2471_v59 = vld [vmem:[#allocation9 + $0x248] sm:$0xff] }
 0x170   : > { %2310 = vmatpush.msrb.mxu2 %v2255_v63  ;;  %2532 = vmatpush.msrb.mxu3 %v2492_v6  ;;  %v2501_v6 = vld [vmem:[#allocation9 + $0x338] sm:$0xff] }
 0x171   : > { %2350 = vmatpush.msra.mxu1 %v2256_v0  ;;  %2552 = vmatpush.msra.mxu0 %v2524_v7  ;;  %v2466_v7 = vld [vmem:[#allocation9 + $0x220] sm:$0xff] }
 0x172   : > { %2311 = vmatpush.msrb.mxu2 %v2253_v2  ;;  %2533 = vmatpush.msrb.mxu3 %v2490_v36  ;;  %v2468_v2 = vld [vmem:[#allocation9 + $0x230] sm:$0xff]  ;;  %v2499_v36 = vld [vmem:[#allocation9 + $0x328] sm:$0xff] }
 0x173   : > { %2312 = vmatmul.f32.vlgmr.msrb.gmra.mxu2 %v2291_v19  ;;  %2351 = vmatpush.msra.mxu1 %v2254_v4  ;;  %v4173_v11 = vpop.f32.mrf.mxu3  ;;  %v2469_v4 = vld [vmem:[#allocation9 + $0x238] sm:$0xff] }
 0x174   : > { %2352 = vmatmul.f32.vlgmr.msra.gmra.mxu1 %v2291_v19  ;;  %2572 = vmatpush.msra.mxu2 %v2493_v8  ;;  %v4175_v13 = vpop.f32.mrf.mxu1  ;;  %v2500_v19 = vld [vmem:[#allocation9 + $0x330] sm:$0xff]  ;;  %v2498_v8 = vld [vmem:[#allocation9 + $0x320] sm:$0xff] }
 0x175   : > { %2592 = vmatpush.msrb.mxu1 %v2525_v3  ;;  %2553 = vmatpush.msra.mxu0 %v2522_v60  ;;  %v4177_v17 = vpop.f32.mrf.mxu2  ;;  %v2467_v3 = vld [vmem:[#allocation9 + $0x228] sm:$0xff] }
 0x176   : > { %2573 = vmatpush.msra.mxu2 %v2491_v14  ;;  %2534 = vmatpush.msrb.mxu3 %v2488_v55  ;;  %v2464_v14 = vld [vmem:[#allocation9 + $0x210] sm:$0xff]  ;;  %v2465_v55 = vld [vmem:[#allocation9 + $0x218] sm:$0xff] }
 0x177   : > { %2593 = vmatpush.msrb.mxu1 %v2523_v45  ;;  %2554 = vmatpush.msra.mxu0 %v2520_v15  ;;  %v2496_v45 = vld [vmem:[#allocation9 + $0x310] sm:$0xff] }
 0x178   : > { %2574 = vmatpush.msra.mxu2 %v2489_v20  ;;  %2535 = vmatpush.msrb.mxu3 %v2486_v25  ;;  %v2497_v20 = vld [vmem:[#allocation9 + $0x318] sm:$0xff]  ;;  %v2494_v25 = vld [vmem:[#allocation9 + $0x300] sm:$0xff] }
 0x179   : > { %2594 = vmatpush.msrb.mxu1 %v2521_v24  ;;  %2555 = vmatpush.msra.mxu0 %v2518_v12  ;;  %v2462_v24 = vld [vmem:[#allocation9 + $0x200] sm:$0xff]  ;;  %v2463_v12 = vld [vmem:[#allocation9 + $0x208] sm:$0xff] }
 0x17a   : > { %v4179_v58 = vpop.f32.mrf.mxu0  ;;  %2575 = vmatpush.msra.mxu2 %v2487_v40  ;;  %2536 = vmatpush.msrb.mxu3 %v2484_v23  ;;  %v2495_v40 = vld [vmem:[#allocation9 + $0x308] sm:$0xff]  ;;  %v2458_v23 = vld [vmem:[#allocation9 + $0x1f0] sm:$0xff] }
 0x17b   : > { %2595 = vmatpush.msrb.mxu1 %v2519_v9  ;;  %2556 = vmatpush.msra.mxu0 %v2516_v22  ;;  %v2426_v9 = vld [vmem:[#allocation9 + $0xf0] sm:$0xff] }
 0x17c   : > { %2576 = vmatpush.msra.mxu2 %v2485_v26  ;;  %2537 = vmatpush.msrb.mxu3 %v2482_v27  ;;  %v2459_v27 = vld [vmem:[#allocation9 + $0x1f8] sm:$0xff] }
 0x17d   : > { %2596 = vmatpush.msrb.mxu1 %v2517_v62  ;;  %2557 = vmatpush.msra.mxu0 %v2514_v46  ;;  %v2427_v62 = vld [vmem:[#allocation9 + $0xf8] sm:$0xff]  ;;  %v2424_v46 = vld [vmem:[#allocation9 + $0xe0] sm:$0xff] }
 0x17e   : > { %v4181_v16 = vpop.f32.mrf.mxu3  ;;  %v4183_v32 = vpop.f32.mrf.mxu1  ;;  %2577 = vmatpush.msra.mxu2 %v2483_v56  ;;  %2538 = vmatpush.msrb.mxu3 %v2480_v21  ;;  %v2456_v56 = vld [vmem:[#allocation9 + $0x1e0] sm:$0xff]  ;;  %v2457_v21 = vld [vmem:[#allocation9 + $0x1e8] sm:$0xff] }
 0x17f   : > { %2597 = vmatpush.msrb.mxu1 %v2515_v28  ;;  %2558 = vmatpush.msra.mxu0 %v2512_v31  ;;  %v4185_v18 = vpop.f32.mrf.mxu2  ;;  %v2425_v28 = vld [vmem:[#allocation9 + $0xe8] sm:$0xff]  ;;  %v2422_v31 = vld [vmem:[#allocation9 + $0xd0] sm:$0xff] }
 0x180   : > { %2578 = vmatpush.msra.mxu2 %v2481_v34  ;;  %2539 = vmatpush.msrb.mxu3 %v2478_v37  ;;  %v2454_v34 = vld [vmem:[#allocation9 + $0x1d0] sm:$0xff] }
 0x181   : > { %2598 = vmatpush.msrb.mxu1 %v2513_v35  ;;  %2559 = vmatpush.msra.mxu0 %v2510_v38  ;;  %v2423_v35 = vld [vmem:[#allocation9 + $0xd8] sm:$0xff] }
 0x182   : > { %2579 = vmatpush.msra.mxu2 %v2479_v29  ;;  %2540 = vmatpush.msrb.mxu3 %v2476_v41  ;;  %v2455_v38 = vld [vmem:[#allocation9 + $0x1d8] sm:$0xff]  ;;  %v2452_v41 = vld [vmem:[#allocation9 + $0x1c0] sm:$0xff] }
 0x183   : > { %2599 = vmatpush.msrb.mxu1 %v2511_v30  ;;  %2560 = vmatpush.msra.mxu0 %v2508_v42  ;;  %v2420_v30 = vld [vmem:[#allocation9 + $0xc0] sm:$0xff]  ;;  %v2421_v42 = vld [vmem:[#allocation9 + $0xc8] sm:$0xff] }
 0x184   : > { %2580 = vmatpush.msra.mxu2 %v2477_v43  ;;  %2541 = vmatpush.msrb.mxu3 %v2474_v33  ;;  %v2453_v43 = vld [vmem:[#allocation9 + $0x1c8] sm:$0xff]  ;;  %v2450_v33 = vld [vmem:[#allocation9 + $0x1b0] sm:$0xff] }
 0x185   : > { %2600 = vmatpush.msrb.mxu1 %v2509_v44  ;;  %2561 = vmatpush.msra.mxu0 %v2506_v47  ;;  %v2418_v44 = vld [vmem:[#allocation9 + $0xb0] sm:$0xff]  ;;  %v2419_v47 = vld [vmem:[#allocation9 + $0xb8] sm:$0xff] }
 0x186   : > { %2581 = vmatpush.msra.mxu2 %v2475_v48  ;;  %2542 = vmatpush.msrb.mxu3 %v2472_v1  ;;  %v2416_v1 = vld [vmem:[#allocation9 + $0xa0] sm:$0xff] }
 0x187   : > { %2601 = vmatpush.msrb.mxu1 %v2507_v49  ;;  %2562 = vmatpush.msra.mxu0 %v2504_v10  ;;  %v2451_v49 = vld [vmem:[#allocation9 + $0x1b8] sm:$0xff]  ;;  %v2448_v10 = vld [vmem:[#allocation9 + $0x1a0] sm:$0xff] }
 0x188   : > { %2582 = vmatpush.msra.mxu2 %v2473_v52  ;;  %2543 = vmatpush.msrb.mxu3 %v2470_v54  ;;  %v2417_v52 = vld [vmem:[#allocation9 + $0xa8] sm:$0xff] }
 0x189   : > { %2602 = vmatpush.msrb.mxu1 %v2505_v53  ;;  %2563 = vmatpush.msra.mxu0 %v2502_v57  ;;  %v2449_v54 = vld [vmem:[#allocation9 + $0x1a8] sm:$0xff]  ;;  %v2414_v57 = vld [vmem:[#allocation9 + $0x90] sm:$0xff] }
 0x18a   : > { %2583 = vmatpush.msra.mxu2 %v2471_v59  ;;  %2544 = vmatpush.msrb.mxu3 %v2468_v2  ;;  %v2446_v59 = vld [vmem:[#allocation9 + $0x190] sm:$0xff]  ;;  %v2447_v2 = vld [vmem:[#allocation9 + $0x198] sm:$0xff] }
 0x18b   : > { %2603 = vmatpush.msrb.mxu1 %v2503_v61  ;;  %2564 = vmatpush.msra.mxu0 %v2500_v19  ;;  %v2415_v61 = vld [vmem:[#allocation9 + $0x98] sm:$0xff]  ;;  %v2412_v19 = vld [vmem:[#allocation9 + $0x80] sm:$0xff] }
 0x18c   : > { %2584 = vmatpush.msra.mxu2 %v2469_v4  ;;  %2545 = vmatpush.msrb.mxu3 %v2466_v7  ;;  %v2444_v4 = vld [vmem:[#allocation9 + $0x180] sm:$0xff] }
 0x18d   : > { %2604 = vmatpush.msrb.mxu1 %v2501_v6  ;;  %2565 = vmatpush.msra.mxu0 %v2498_v8  ;;  %v2413_v6 = vld [vmem:[#allocation9 + $0x88] sm:$0xff] }
 0x18e   : > { %2585 = vmatpush.msra.mxu2 %v2467_v3  ;;  %2546 = vmatpush.msrb.mxu3 %v2464_v14  ;;  %v2445_v8 = vld [vmem:[#allocation9 + $0x188] sm:$0xff]  ;;  %v1539_v3 = vadd.f32 %v4177_v17, %v4179_v58  ;;  %v2410_v14 = vld [vmem:[#allocation9 + $0x70] sm:$0xff] }
 0x18f   : > { %2605 = vmatpush.msrb.mxu1 %v2499_v36  ;;  %2566 = vmatpush.msra.mxu0 %v2496_v45  ;;  %v2442_v45 = vld [vmem:[#allocation9 + $0x170] sm:$0xff]  ;;  %v2441_v17 = vld [vmem:[#allocation9 + $0x168] sm:$0xff] }
 0x190   : > { %2586 = vmatpush.msra.mxu2 %v2465_v55  ;;  %2547 = vmatpush.msrb.mxu3 %v2462_v24  ;;  %v2411_v55 = vld [vmem:[#allocation9 + $0x78] sm:$0xff]  ;;  %v2408_v24 = vld [vmem:[#allocation9 + $0x60] sm:$0xff]  ;;  %v1602_v58 = vadd.f32 %v4183_v32, %v1539_v3 }
 0x191   : > { %2606 = vmatpush.msrb.mxu1 %v2497_v20  ;;  %2567 = vmatpush.msra.mxu0 %v2494_v25  ;;  %v2443_v20 = vld [vmem:[#allocation9 + $0x178] sm:$0xff]  ;;  %v2440_v25 = vld [vmem:[#allocation9 + $0x160] sm:$0xff] }
 0x192   : > { %2587 = vmatpush.msra.mxu2 %v2463_v12  ;;  %2618 = vmatpush.msra.mxu3 %v2426_v9  ;;  %v2409_v12 = vld [vmem:[#allocation9 + $0x68] sm:$0xff] }
 0x193   : > { %2607 = vmatpush.msrb.mxu1 %v2495_v40  ;;  %2638 = vmatpush.msrb.mxu0 %v2458_v23  ;;  %v2406_v23 = vld [vmem:[#allocation9 + $0x50] sm:$0xff] }
 0x194   : > { %v4187_v39 = vpop.f32.mrf.mxu0  ;;  %2658 = vmatpush.msrb.mxu2 %v2427_v62  ;;  %2619 = vmatpush.msra.mxu3 %v2424_v46  ;;  %v2438_v62 = vld [vmem:[#allocation9 + $0x150] sm:$0xff]  ;;  %v2439_v46 = vld [vmem:[#allocation9 + $0x158] sm:$0xff] }
 0x195   : > { %2678 = vmatpush.msra.mxu1 %v2459_v27  ;;  %2639 = vmatpush.msrb.mxu0 %v2456_v56  ;;  %v2407_v27 = vld [vmem:[#allocation9 + $0x58] sm:$0xff] }
 0x196   : > { %2659 = vmatpush.msrb.mxu2 %v2425_v28  ;;  %2620 = vmatpush.msra.mxu3 %v2422_v31  ;;  %v2404_v28 = vld [vmem:[#allocation9 + $0x40] sm:$0xff]  ;;  %v2405_v31 = vld [vmem:[#allocation9 + $0x48] sm:$0xff] }
 0x197   : > { %v4189_v50 = vpop.f32.mrf.mxu3  ;;  %2679 = vmatpush.msra.mxu1 %v2457_v21  ;;  %2640 = vmatpush.msrb.mxu0 %v2454_v34  ;;  %v2436_v21 = vld [vmem:[#allocation9 + $0x140] sm:$0xff]  ;;  %v1499_v34 = vadd.f32 %v4171_v5, %v4173_v11 }
 0x198   : > { %2660 = vmatpush.msrb.mxu2 %v2423_v35  ;;  %2621 = vmatpush.msra.mxu3 %v2420_v30  ;;  %v2437_v35 = vld [vmem:[#allocation9 + $0x148] sm:$0xff]  ;;  %v2434_v30 = vld [vmem:[#allocation9 + $0x130] sm:$0xff]  ;;  %v2400_v11 = vld [vmem:[#allocation9 + $0x20] sm:$0xff] }
 0x199   : > { %v4191_v51 = vpop.f32.mrf.mxu1  ;;  %2680 = vmatpush.msra.mxu1 %v2455_v38  ;;  %2641 = vmatpush.msrb.mxu0 %v2452_v41  ;;  %v2402_v38 = vld [vmem:[#allocation9 + $0x30] sm:$0xff]  ;;  %v1622_v41 = vadd.f32 %v4181_v16, %v1602_v58  ;;  %v1562_v5 = vadd.f32 %v4185_v18, %v1499_v34  ;;  %v2401_v16 = vld [vmem:[#allocation9 + $0x28] sm:$0xff] }
 0x19a   : > { %2661 = vmatpush.msrb.mxu2 %v2421_v42  ;;  %2622 = vmatpush.msra.mxu3 %v2418_v44  ;;  %v2403_v42 = vld [vmem:[#allocation9 + $0x38] sm:$0xff]  ;;  %v2432_v44 = vld [vmem:[#allocation9 + $0x120] sm:$0xff]  ;;  %v2430_v18 = vld [vmem:[#allocation9 + $0x110] sm:$0xff] }
 0x19b   : > { %2681 = vmatpush.msra.mxu1 %v2453_v43  ;;  %2642 = vmatpush.msrb.mxu0 %v2450_v33  ;;  %v2435_v43 = vld [vmem:[#allocation9 + $0x138] sm:$0xff] }
 0x19c   : > { %v4193_v63 = vpop.f32.mrf.mxu2  ;;  %2662 = vmatpush.msrb.mxu2 %v2419_v47  ;;  %2623 = vmatpush.msra.mxu3 %v2416_v1  ;;  %v2398_v1 = vld [vmem:[#allocation9 + $0x10] sm:$0xff] }
 0x19d   : > { %2682 = vmatpush.msra.mxu1 %v2451_v49  ;;  %2643 = vmatpush.msrb.mxu0 %v2448_v10 }
 0x19e   : > { %v4195_v0 = vpop.f32.mrf.mxu0  ;;  %2663 = vmatpush.msrb.mxu2 %v2417_v52  ;;  %2624 = vmatpush.msra.mxu3 %v2414_v57  ;;  %v1582_v57 = vadd.f32 %v4175_v13, %v1562_v5  ;;  %v2727_v5 = vld [vmem:[#allocation9 + $0x4d8] sm:$0xff] }
 0x19f   : > { %2683 = vmatpush.msra.mxu1 %v2449_v54  ;;  %2644 = vmatpush.msrb.mxu0 %v2446_v59  ;;  %v1743_v56 = vadd.f32 %v4193_v63, %v4195_v0 }
 0x1a0   : > { %2664 = vmatpush.msrb.mxu2 %v2415_v61  ;;  %2625 = vmatpush.msra.mxu3 %v2412_v19  ;;  %v2397_v19 = vld [vmem:[#allocation9 + $0x8] sm:$0xff] }
 0x1a1   : > { %2684 = vmatpush.msra.mxu1 %v2447_v2  ;;  %2645 = vmatpush.msrb.mxu0 %v2444_v4  ;;  %v1746_v33 = vadd.f32 %v1743_v56, %v1622_v41  ;;  %v2429_v4 = vld [vmem:[#allocation9 + $0x108] sm:$0xff]  ;;  %v2760_v41 = vld [vmem:[#allocation9 + $0x5e0] sm:$0xff] }
 0x1a2   : > { %v4197_v60 = vpop.f32.mrf.mxu3  ;;  %2665 = vmatpush.msrb.mxu2 %v2413_v6  ;;  %2626 = vmatpush.msra.mxu3 %v2410_v14 }
 0x1a3   : > { %2685 = vmatpush.msra.mxu1 %v2445_v8  ;;  %2646 = vmatpush.msrb.mxu0 %v2442_v45  ;;  %v2378_v8 = vld [vmem:[#allocation7] sm:$0x3] }
 0x1a4   : > { %v4199_v15 = vpop.f32.mrf.mxu1  ;;  %2666 = vmatpush.msrb.mxu2 %v2411_v55  ;;  %2627 = vmatpush.msra.mxu3 %v2408_v24  ;;  %v2381_v55 = vperm.slane %v2378_v8, 1 }
 0x1a5   : > { %2686 = vmatpush.msra.mxu1 %v2443_v20  ;;  %2647 = vmatpush.msrb.mxu0 %v2440_v25  ;;  %v1866_v63 = vadd.f32 %v4197_v60, %v4199_v15  ;;  %v2433_v60 = vld [vmem:[#allocation9 + $0x128] sm:$0xff]  ;;  %v1703_v15 = vadd.f32 %v4187_v39, %v4189_v50  ;;  %v2396_v39 = vld [vmem:[#allocation9] sm:$0xff] }
 0x1a6   : > { %2667 = vmatpush.msrb.mxu2 %v2409_v12  ;;  %2628 = vmatpush.msra.mxu3 %v2406_v23  ;;  %v2428_v50 = vld [vmem:[#allocation9 + $0x100] sm:$0xff]  ;;  %v2380_v23 = vperm.slane %v2378_v8, 0  ;;  %v2717_v8 = vld [vmem:[#allocation9 + $0x488] sm:$0xff] }
 0x1a7   : > { %2687 = vmatpush.msra.mxu1 %v2441_v17  ;;  %2648 = vmatpush.msrb.mxu0 %v2438_v62  ;;  %v1869_v10 = vadd.f32 %v1866_v63, %v1746_v33  ;;  %v1745_v6 = vadd.f32 %v1703_v15, %v1582_v57  ;;  %v2729_v63 = vld [vmem:[#allocation9 + $0x4e8] sm:$0xff]  ;;  %v2756_v33 = vld [vmem:[#allocation9 + $0x5c0] sm:$0xff] }
 0x1a8   : > { %v4201_v22 = vpop.f32.mrf.mxu2  ;;  %2668 = vmatpush.msrb.mxu2 %v2407_v27  ;;  %2629 = vmatpush.msra.mxu3 %v2404_v28  ;;  %v2753_v57 = vld [vmem:[#allocation9 + $0x5a8] sm:$0xff] }
 0x1a9   : > { %2688 = vmatpush.msra.mxu1 %v2439_v46  ;;  %2649 = vmatpush.msrb.mxu0 %v2436_v21  ;;  %v1826_v59 = vadd.f32 %v4191_v51, %v4201_v22  ;;  %v2395_v21 = vld [vmem:[#allocation2] sm:$0x77] }
 0x1aa   : > { %2669 = vmatpush.msrb.mxu2 %v2405_v31  ;;  %2630 = vmatpush.msra.mxu3 %v2402_v38  ;;  %v2762_v31 = vld [vmem:[#allocation9 + $0x5f0] sm:$0xff]  ;;  %v2763_v38 = vld [vmem:[#allocation9 + $0x5f8] sm:$0xff] }
 0x1ab   : > { %2689 = vmatpush.msra.mxu1 %v2437_v35  ;;  %2650 = vmatpush.msrb.mxu0 %v2434_v30  ;;  %v1868_v51 = vadd.f32 %v1826_v59, %v1745_v6  ;;  %v2731_v35 = vld [vmem:[#allocation9 + $0x4f8] sm:$0xff]  ;;  %v2728_v30 = vld [vmem:[#allocation9 + $0x4e0] sm:$0xff]  ;;  %v2718_v59 = vld [vmem:[#allocation9 + $0x490] sm:$0xff] }
 0x1ac   : > { %2670 = vmatpush.msrb.mxu2 %v2403_v42  ;;  %2631 = vmatpush.msra.mxu3 %v2400_v11  ;;  %v2726_v42 = vld [vmem:[#allocation9 + $0x4d0] sm:$0xff]  ;;  %v2759_v11 = vld [vmem:[#allocation9 + $0x5d8] sm:$0xff] }
 0x1ad   : > { %2690 = vmatpush.msra.mxu1 %v2435_v43  ;;  %2651 = vmatpush.msrb.mxu0 %v2432_v44  ;;  %v2758_v43 = vld [vmem:[#allocation9 + $0x5d0] sm:$0xff]  ;;  %v2724_v44 = vld [vmem:[#allocation9 + $0x4c0] sm:$0xff] }
 0x1ae   : > { %2671 = vmatpush.msrb.mxu2 %v2401_v16  ;;  %2632 = vmatpush.msra.mxu3 %v2398_v1  ;;  %v2757_v16 = vld [vmem:[#allocation9 + $0x5c8] sm:$0xff]  ;;  %v2722_v1 = vld [vmem:[#allocation9 + $0x4b0] sm:$0xff] }
 0x1af   : > { %2691 = vmatpush.msra.mxu1 %v2433_v60  ;;  %2652 = vmatpush.msrb.mxu0 %v2430_v18  ;;  %v2698_v60 = vld [vmem:[#allocation2] sm:$0xee]  ;;  %v2754_v18 = vld [vmem:[#allocation9 + $0x5b0] sm:$0xff] }
 0x1b0   : > { %2633 = vmatpush.msra.mxu3 %v2396_v39  ;;  %v2750_v39 = vld [vmem:[#allocation9 + $0x590] sm:$0xff] }
 0x1b1   : > { %2653 = vmatpush.msrb.mxu0 %v2428_v50  ;;  %v2719_v50 = vld [vmem:[#allocation9 + $0x498] sm:$0xff] }
 0x1bc   : > { %v4203_v26 = vpop.f32.mrf.mxu0 }
 0x1bf   : > { %v4205_v37 = vpop.f32.mrf.mxu3 }
 0x1c1   : > { %v4207_v29 = vpop.f32.mrf.mxu1 }
 0x1c4   : > { %v4209_v48 = vpop.f32.mrf.mxu2 }
 0x1c6   : > { %v4211_v53 = vpop.f32.mrf.mxu0 }
 0x1c7   : > { %v1993_v47 = vadd.f32 %v4209_v48, %v4211_v53  ;;  %v2399_v48 = vld [vmem:[#allocation9 + $0x18] sm:$0xff] }
 0x1c8   : > { %v2431_v53 = vld [vmem:[#allocation9 + $0x118] sm:$0xff]  ;;  %2672 = vmatpush.msrb.mxu2 %v2399_v48  ;;  %v2752_v48 = vld [vmem:[#allocation9 + $0x5a0] sm:$0xff] }
 0x1c9   : > { %v1996_v61 = vadd.f32 %v1993_v47, %v1869_v10  ;;  %2692 = vmatpush.msra.mxu1 %v2431_v53  ;;  %v2725_v47 = vld [vmem:[#allocation9 + $0x4c8] sm:$0xff]  ;;  %v2723_v10 = vld [vmem:[#allocation9 + $0x4b8] sm:$0xff] }
 0x1ca   : > { %v4213_v7 = vpop.f32.mrf.mxu3  ;;  %2673 = vmatpush.msrb.mxu2 %v2397_v19  ;;  %v2721_v53 = vld [vmem:[#allocation9 + $0x4a8] sm:$0xff]  ;;  %v2716_v19 = vld [vmem:[#allocation9 + $0x480] sm:$0xff] }
 0x1cb   : > { %2693 = vmatpush.msra.mxu1 %v2429_v4  ;;  %v2748_v4 = vld [vmem:[#allocation9 + $0x580] sm:$0xff] }
 0x1cc   : > { %v4217_v36 = vpop.f32.mrf.mxu1 }
 0x1cd   : > { %v2120_v52 = vadd.f32 %v4213_v7, %v4217_v36  ;;  %v1953_v7 = vadd.f32 %v4203_v26, %v4205_v37 }
 0x1cf   : > { %v2123_v13 = vadd.f32 %v2120_v52, %v1996_v61  ;;  %v1995_v20 = vadd.f32 %v1953_v7, %v1868_v51  ;;  %v2755_v52 = vld [vmem:[#allocation9 + $0x5b8] sm:$0xff]  ;;  %v2714_v51 = vld [vmem:[#allocation9 + $0x470] sm:$0xff] }
 0x1d0   : > { %v4219_v40 = vpop.f32.mrf.mxu2  ;;  %v2751_v61 = vld [vmem:[#allocation9 + $0x598] sm:$0xff] }
 0x1d1   : > { %v2080_v22 = vadd.f32 %v4207_v29, %v4219_v40 }
 0x1d3   : > { %v2122_v24 = vadd.f32 %v2080_v22, %v1995_v20  ;;  %v2746_v22 = vld [vmem:[#allocation9 + $0x570] sm:$0xff]  ;;  %v2745_v20 = vld [vmem:[#allocation9 + $0x568] sm:$0xff] }
 0x1e3   : > { %v4221_v9 = vpop.f32.mrf.mxu0 }
 0x1e7   : > { %v4228_v32 = vpop.f32.mrf.mxu3 }
 0x1e8   : > { %v4233_v0 = vpop.f32.mrf.mxu1  ;;  %v2207_v26 = vadd.f32 %v4221_v9, %v4228_v32  ;;  %v2730_v9 = vld [vmem:[#allocation9 + $0x4f0] sm:$0xff] }
 0x1ea   : > { %v2249_v17 = vadd.f32 %v2207_v26, %v2122_v24  ;;  %v2710_v26 = vld [vmem:[#allocation9 + $0x450] sm:$0xff]  ;;  %v2711_v24 = vld [vmem:[#allocation9 + $0x458] sm:$0xff] }
 0x1eb   : > { %v2246_v49 = vpop.f32.mrf.mxu2 }
 0x1ec   : > { %v2226_v54 = vpop.f32.mrf.mxu0 }
 0x1ed   : > { %v2247_v2 = vadd.f32 %v2246_v49, %v2226_v54  ;;  %v2720_v54 = vld [vmem:[#allocation9 + $0x4a0] sm:$0xff] }
 0x1ef   : > { %v2250_v14 = vadd.f32 %v2247_v2, %v2123_v13  ;;  %v2749_v13 = vld [vmem:[#allocation9 + $0x588] sm:$0xff] }
 0x1f1   : > { %v2353_v3 = vpop.f32.mrf.mxu1  ;;  %v2373_v36 = vpop.f32.mrf.mxu3 }
 0x1f2   : > { %v2374_v45 = vadd.f32 %v2373_v36, %v2353_v3  ;;  %v2715_v3 = vld [vmem:[#allocation9 + $0x478] sm:$0xff] }
 0x1f3   : > { %v2747_v36 = vld [vmem:[#allocation9 + $0x578] sm:$0xff] }
 0x1f4   : > { %v2377_v37 = vadd.f32 %v2374_v45, %v2250_v14  ;;  %v2712_v14 = vld [vmem:[#allocation9 + $0x460] sm:$0xff] }
 0x1f5   : > { %v2744_v45 = vld [vmem:[#allocation9 + $0x560] sm:$0xff] }
 0x1f6   : > { %v2385_v25 = vadd.f32 %v2381_v55, %v2377_v37  ;;  %v2313_v12 = vpop.f32.mrf.mxu2  ;;  %v2713_v55 = vld [vmem:[#allocation9 + $0x468] sm:$0xff]  ;;  %v2742_v37 = vld [vmem:[#allocation9 + $0x550] sm:$0xff] }
 0x1f7   : > { %v2334_v58 = vadd.f32 %v4233_v0, %v2313_v12  ;;  %v2761_v0 = vld [vmem:[#allocation9 + $0x5e8] sm:$0xff]  ;;  %v2708_v12 = vld [vmem:[#allocation9 + $0x440] sm:$0xff] }
 0x1f8   : > { %v2387_v29 = vmax.f32 %v2385_v25, 0.0  ;;  %v2743_v25 = vld [vmem:[#allocation9 + $0x558] sm:$0xff] }
 0x1f9   : > { %v2376_v40 = vadd.f32 %v2334_v58, %v2249_v17  ;;  %v2740_v17 = vld [vmem:[#allocation9 + $0x540] sm:$0xff]  ;;  %v2709_v58 = vld [vmem:[#allocation9 + $0x448] sm:$0xff] }
 0x1fa   : > { %v2390_v27 = vrot.slane %v2387_v29, 4  ;;  %v2706_v29 = vld [vmem:[#allocation9 + $0x430] sm:$0xff] }
 0x1fb   : > { %v2384_v62 = vadd.f32 %v2380_v23, %v2376_v40  ;;  %v2741_v23 = vld [vmem:[#allocation9 + $0x548] sm:$0xff]  ;;  %v2738_v40 = vld [vmem:[#allocation9 + $0x530] sm:$0xff] }
 0x1fd   : > { %v2386_v46 = vmax.f32 %v2384_v62, 0.0  ;;  %v2707_v62 = vld [vmem:[#allocation9 + $0x438] sm:$0xff] }
 0x1ff   : > { %v2391_v56 = vsel %vm1378_vm1, %v2386_v46, %v2390_v27  ;;  %v2739_v27 = vld [vmem:[#allocation9 + $0x538] sm:$0xff]  ;;  %v2704_v46 = vld [vmem:[#allocation9 + $0x420] sm:$0xff] }
 0x200   : > { %2394 = vst [vmem:[#allocation2 + $0x8] sm:$0xff] %v2391_v56  ;;  %v2736_v56 = vld [vmem:[#allocation9 + $0x520] sm:$0xff] }
 0x207   : > { %v2460_v28 = vld [vmem:[#allocation2 + $0x8] sm:$0x77] }
 0x208   : > { %2527 = vst [vmem:[#allocation1] ss:$2 sm:$0xff] %v2460_v28  ;;  %v2854_v2 = vld [vmem:[#allocation2 + $0x8] sm:$0xee] }
 0x209   : > { %v2705_v28 = vld [vmem:[#allocation9 + $0x428] sm:$0xff] }
 0x20f   : > { %v2528_v34 = vld.sshfl [vmem:[#allocation1] sm:$0xff pattern:$0x75316420]  ;;  %v2529_v32 = vld.sshfl [vmem:[#allocation1 + $0x8] sm:$0xff pattern:$0x75316420] }
 0x210   : > { %2548 = vmatmul.f32.vlgmr.msrb.gmra.mxu3 %v2528_v34  ;;  %2568 = vmatmul.f32.vlgmr.msra.gmra.mxu0 %v2529_v32  ;;  %2613 = vst [vmem:[#allocation1] ss:$2 sm:$0xff] %v2395_v21  ;;  %v2737_v21 = vld [vmem:[#allocation9 + $0x528] sm:$0xff] }
 0x211   : > { %2588 = vmatmul.f32.vlgmr.msra.gmra.mxu2 %v2528_v34  ;;  %2608 = vmatmul.f32.vlgmr.msrb.gmra.mxu1 %v2529_v32  ;;  %v2703_v34 = vld [vmem:[#allocation9 + $0x418] sm:$0xff] }
 0x212   : > { %2772 = vmatpush.msrb.mxu3 %v2730_v9  ;;  %2792 = vmatpush.msra.mxu0 %v2762_v31  ;;  %v2702_v9 = vld [vmem:[#allocation9 + $0x410] sm:$0xff]  ;;  %v2735_v32 = vld [vmem:[#allocation9 + $0x518] sm:$0xff] }
 0x213   : > { %2812 = vmatpush.msra.mxu2 %v2731_v35  ;;  %2832 = vmatpush.msrb.mxu1 %v2763_v38  ;;  %v2734_v31 = vld [vmem:[#allocation9 + $0x510] sm:$0xff]  ;;  %v2700_v35 = vld [vmem:[#allocation9 + $0x400] sm:$0xff] }
 0x214   : > { %2773 = vmatpush.msrb.mxu3 %v2728_v30  ;;  %2793 = vmatpush.msra.mxu0 %v2760_v41  ;;  %v2732_v38 = vld [vmem:[#allocation9 + $0x500] sm:$0xff]  ;;  %v2701_v30 = vld [vmem:[#allocation9 + $0x408] sm:$0xff] }
 0x215   : > { %2813 = vmatpush.msra.mxu2 %v2729_v63  ;;  %2833 = vmatpush.msrb.mxu1 %v2761_v0  ;;  %v2733_v41 = vld [vmem:[#allocation9 + $0x508] sm:$0xff] }
 0x216   : > { %2774 = vmatpush.msrb.mxu3 %v2726_v42  ;;  %2794 = vmatpush.msra.mxu0 %v2758_v43  ;;  %v2886_v42 = vld [vmem:[#allocation9 + $0x6f0] sm:$0xff] }
 0x217   : > { %2814 = vmatpush.msra.mxu2 %v2727_v5  ;;  %2834 = vmatpush.msrb.mxu1 %v2759_v11  ;;  %v2614_v15 = vld.sshfl [vmem:[#allocation1] sm:$0xff pattern:$0x75316420]  ;;  %v2615_v49 = vld.sshfl [vmem:[#allocation1 + $0x8] sm:$0xff pattern:$0x75316420] }
 0x218   : > { %2775 = vmatpush.msrb.mxu3 %v2724_v44  ;;  %2795 = vmatpush.msra.mxu0 %v2756_v33  ;;  %2765 = vst [vmem:[#allocation1] ss:$2 sm:$0xff] %v2698_v60  ;;  %v2918_v43 = vld [vmem:[#allocation9 + $0x7f0] sm:$0xff]  ;;  %v2887_v5 = vld [vmem:[#allocation9 + $0x6f8] sm:$0xff]  ;;  %v2884_v44 = vld [vmem:[#allocation9 + $0x6e0] sm:$0xff] }
 0x219   : > { %2815 = vmatpush.msra.mxu2 %v2725_v47  ;;  %2835 = vmatpush.msrb.mxu1 %v2757_v16  ;;  %v2919_v11 = vld [vmem:[#allocation9 + $0x7f8] sm:$0xff]  ;;  %v2916_v33 = vld [vmem:[#allocation9 + $0x7e0] sm:$0xff]  ;;  %v2885_v47 = vld [vmem:[#allocation9 + $0x6e8] sm:$0xff] }
 0x21a   : > { %2634 = vmatmul.f32.vlgmr.msra.gmra.mxu3 %v2614_v15  ;;  %2654 = vmatmul.f32.vlgmr.msrb.gmra.mxu0 %v2615_v49  ;;  %v2917_v16 = vld [vmem:[#allocation9 + $0x7e8] sm:$0xff]  ;;  %v2882_v60 = vld [vmem:[#allocation9 + $0x6d0] sm:$0xff] }
 0x21b   : > { %2674 = vmatmul.f32.vlgmr.msrb.gmra.mxu2 %v2614_v15  ;;  %2694 = vmatmul.f32.vlgmr.msra.gmra.mxu1 %v2615_v49  ;;  %v2914_v15 = vld [vmem:[#allocation9 + $0x7d0] sm:$0xff]  ;;  %v2883_v49 = vld [vmem:[#allocation9 + $0x6d8] sm:$0xff] }
 0x21c   : > { %2776 = vmatpush.msrb.mxu3 %v2722_v1  ;;  %2796 = vmatpush.msra.mxu0 %v2754_v18  ;;  %v2915_v1 = vld [vmem:[#allocation9 + $0x7d8] sm:$0xff]  ;;  %v2880_v18 = vld [vmem:[#allocation9 + $0x6c0] sm:$0xff] }
 0x21d   : > { %2816 = vmatpush.msra.mxu2 %v2723_v10  ;;  %2836 = vmatpush.msrb.mxu1 %v2755_v52  ;;  %v2912_v10 = vld [vmem:[#allocation9 + $0x7c0] sm:$0xff]  ;;  %v2881_v52 = vld [vmem:[#allocation9 + $0x6c8] sm:$0xff] }
 0x21e   : > { %2777 = vmatpush.msrb.mxu3 %v2720_v54  ;;  %2797 = vmatpush.msra.mxu0 %v2752_v48  ;;  %v2913_v54 = vld [vmem:[#allocation9 + $0x7c8] sm:$0xff]  ;;  %v2878_v48 = vld [vmem:[#allocation9 + $0x6b0] sm:$0xff] }
 0x21f   : > { %2817 = vmatpush.msra.mxu2 %v2721_v53  ;;  %2837 = vmatpush.msrb.mxu1 %v2753_v57  ;;  %v4253_v6 = vld.sshfl [vmem:[#allocation1] sm:$0xff pattern:$0x75316420]  ;;  %v4255_v7 = vld.sshfl [vmem:[#allocation1 + $0x8] sm:$0xff pattern:$0x75316420] }
 0x220   : > { %2778 = vmatpush.msrb.mxu3 %v2718_v59  ;;  %2798 = vmatpush.msra.mxu0 %v2750_v39  ;;  %2921 = vst [vmem:[#allocation1] ss:$2 sm:$0xff] %v2854_v2  ;;  %v2768_v63 = vrot.slane %v4253_v6, 1  ;;  %v2769_v0 = vrot.slane %v4255_v7, 1  ;;  %v2910_v53 = vld [vmem:[#allocation9 + $0x7b0] sm:$0xff]  ;;  %v2879_v57 = vld [vmem:[#allocation9 + $0x6b8] sm:$0xff] }
 0x221   : > { %2818 = vmatpush.msra.mxu2 %v2719_v50  ;;  %2838 = vmatpush.msrb.mxu1 %v2751_v61  ;;  %v2911_v59 = vld [vmem:[#allocation9 + $0x7b8] sm:$0xff]  ;;  %v2876_v39 = vld [vmem:[#allocation9 + $0x6a0] sm:$0xff]  ;;  %v2877_v61 = vld [vmem:[#allocation9 + $0x6a8] sm:$0xff] }
 0x222   : > { %2779 = vmatpush.msrb.mxu3 %v2716_v19  ;;  %2799 = vmatpush.msra.mxu0 %v2748_v4  ;;  %v2908_v50 = vld [vmem:[#allocation9 + $0x7a0] sm:$0xff]  ;;  %v2909_v2 = vld [vmem:[#allocation9 + $0x7a8] sm:$0xff]  ;;  %v2874_v19 = vld [vmem:[#allocation9 + $0x690] sm:$0xff] }
 0x223   : > { %2819 = vmatpush.msra.mxu2 %v2717_v8  ;;  %2839 = vmatpush.msrb.mxu1 %v2749_v13  ;;  %v2906_v4 = vld [vmem:[#allocation9 + $0x790] sm:$0xff]  ;;  %v2875_v6 = vld [vmem:[#allocation9 + $0x698] sm:$0xff]  ;;  %v2872_v8 = vld [vmem:[#allocation9 + $0x680] sm:$0xff] }
 0x224   : > { %2780 = vmatpush.msrb.mxu3 %v2714_v51  ;;  %2800 = vmatpush.msra.mxu0 %v2746_v22  ;;  %v2907_v7 = vld [vmem:[#allocation9 + $0x798] sm:$0xff]  ;;  %v2904_v13 = vld [vmem:[#allocation9 + $0x780] sm:$0xff]  ;;  %v2873_v51 = vld [vmem:[#allocation9 + $0x688] sm:$0xff] }
 0x225   : > { %2820 = vmatpush.msra.mxu2 %v2715_v3  ;;  %2840 = vmatpush.msrb.mxu1 %v2747_v36  ;;  %v2905_v22 = vld [vmem:[#allocation9 + $0x788] sm:$0xff]  ;;  %v2870_v3 = vld [vmem:[#allocation9 + $0x670] sm:$0xff] }
 0x226   : > { %2781 = vmatpush.msrb.mxu3 %v2712_v14  ;;  %2801 = vmatpush.msra.mxu0 %v2744_v45  ;;  %v2902_v36 = vld [vmem:[#allocation9 + $0x770] sm:$0xff]  ;;  %v2871_v14 = vld [vmem:[#allocation9 + $0x678] sm:$0xff] }
 0x227   : > { %2821 = vmatpush.msra.mxu2 %v2713_v55  ;;  %2841 = vmatpush.msrb.mxu1 %v2745_v20  ;;  %v2903_v45 = vld [vmem:[#allocation9 + $0x778] sm:$0xff]  ;;  %v2868_v55 = vld [vmem:[#allocation9 + $0x660] sm:$0xff] }
 0x228   : > { %2782 = vmatpush.msrb.mxu3 %v2710_v26  ;;  %2802 = vmatpush.msra.mxu0 %v2742_v37  ;;  %v2900_v20 = vld [vmem:[#allocation9 + $0x760] sm:$0xff]  ;;  %v2869_v26 = vld [vmem:[#allocation9 + $0x668] sm:$0xff] }
 0x229   : > { %2822 = vmatpush.msra.mxu2 %v2711_v24  ;;  %2842 = vmatpush.msrb.mxu1 %v2743_v25  ;;  %v2901_v37 = vld [vmem:[#allocation9 + $0x768] sm:$0xff]  ;;  %v2866_v24 = vld [vmem:[#allocation9 + $0x650] sm:$0xff] }
 0x22a   : > { %2783 = vmatpush.msrb.mxu3 %v2708_v12  ;;  %2803 = vmatpush.msra.mxu0 %v2740_v17  ;;  %v2898_v25 = vld [vmem:[#allocation9 + $0x750] sm:$0xff]  ;;  %v2867_v12 = vld [vmem:[#allocation9 + $0x658] sm:$0xff] }
 0x22b   : > { %2823 = vmatpush.msra.mxu2 %v2709_v58  ;;  %2843 = vmatpush.msrb.mxu1 %v2741_v23  ;;  %v2899_v17 = vld [vmem:[#allocation9 + $0x758] sm:$0xff]  ;;  %v2864_v58 = vld [vmem:[#allocation9 + $0x640] sm:$0xff] }
 0x22c   : > { %2784 = vmatpush.msrb.mxu3 %v2706_v29  ;;  %2804 = vmatpush.msra.mxu0 %v2738_v40  ;;  %v2896_v23 = vld [vmem:[#allocation9 + $0x740] sm:$0xff]  ;;  %v2865_v29 = vld [vmem:[#allocation9 + $0x648] sm:$0xff] }
 0x22d   : > { %2824 = vmatpush.msra.mxu2 %v2707_v62  ;;  %2844 = vmatpush.msrb.mxu1 %v2739_v27  ;;  %v2897_v40 = vld [vmem:[#allocation9 + $0x748] sm:$0xff]  ;;  %v2862_v62 = vld [vmem:[#allocation9 + $0x630] sm:$0xff] }
 0x22e   : > { %2785 = vmatpush.msrb.mxu3 %v2704_v46  ;;  %2805 = vmatpush.msra.mxu0 %v2736_v56  ;;  %v2894_v27 = vld [vmem:[#allocation9 + $0x730] sm:$0xff]  ;;  %v2863_v46 = vld [vmem:[#allocation9 + $0x638] sm:$0xff] }
 0x22f   : > { %2825 = vmatpush.msra.mxu2 %v2705_v28  ;;  %2845 = vmatpush.msrb.mxu1 %v2737_v21  ;;  %v2895_v56 = vld [vmem:[#allocation9 + $0x738] sm:$0xff]  ;;  %v2860_v28 = vld [vmem:[#allocation9 + $0x620] sm:$0xff] }
 0x230   : > { %2786 = vmatpush.msrb.mxu3 %v2702_v9  ;;  %2806 = vmatpush.msra.mxu0 %v2734_v31  ;;  %v2892_v21 = vld [vmem:[#allocation9 + $0x720] sm:$0xff]  ;;  %v2861_v9 = vld [vmem:[#allocation9 + $0x628] sm:$0xff] }
 0x231   : > { %2826 = vmatpush.msra.mxu2 %v2703_v34  ;;  %2846 = vmatpush.msrb.mxu1 %v2735_v32  ;;  %v2893_v31 = vld [vmem:[#allocation9 + $0x728] sm:$0xff]  ;;  %v2858_v34 = vld [vmem:[#allocation9 + $0x610] sm:$0xff] }
 0x232   : > { %2787 = vmatpush.msrb.mxu3 %v2700_v35  ;;  %2807 = vmatpush.msra.mxu0 %v2732_v38  ;;  %v2890_v32 = vld [vmem:[#allocation9 + $0x710] sm:$0xff]  ;;  %v2859_v35 = vld [vmem:[#allocation9 + $0x618] sm:$0xff] }
 0x233   : > { %2827 = vmatpush.msra.mxu2 %v2701_v30  ;;  %2847 = vmatpush.msrb.mxu1 %v2733_v41  ;;  %v2891_v38 = vld [vmem:[#allocation9 + $0x718] sm:$0xff]  ;;  %v2856_v41 = vld [vmem:[#allocation9 + $0x600] sm:$0xff] }
 0x234   : > { %2788 = vmatmul.f32.vlgmr.msrb.gmra.mxu3 %v2768_v63  ;;  %2808 = vmatmul.f32.vlgmr.msra.gmra.mxu0 %v2769_v0  ;;  %v2922_v30 = vld.sshfl [vmem:[#allocation1] sm:$0xff pattern:$0x75316420] }
 0x235   : > { %2828 = vmatmul.f32.vlgmr.msra.gmra.mxu2 %v2768_v63  ;;  %2848 = vmatmul.f32.vlgmr.msrb.gmra.mxu1 %v2769_v0  ;;  %v2888_v63 = vld [vmem:[#allocation9 + $0x700] sm:$0xff] }
 0x236   : > { %2928 = vmatpush.msra.mxu3 %v2886_v42  ;;  %2948 = vmatpush.msrb.mxu0 %v2918_v43  ;;  %v2923_v0 = vld.sshfl [vmem:[#allocation1 + $0x8] sm:$0xff pattern:$0x75316420] }
 0x237   : > { %2968 = vmatpush.msrb.mxu2 %v2887_v5  ;;  %2988 = vmatpush.msra.mxu1 %v2919_v11  ;;  %v2857_v42 = vld [vmem:[#allocation9 + $0x608] sm:$0xff]  ;;  %v2924_v5 = vrot.slane %v2922_v30, 1  ;;  %v2925_v11 = vrot.slane %v2923_v0, 1  ;;  %v3032_v30 = vld [vmem:[#allocation12 + $0x10] sm:$0xff] }
 0x238   : > { %2929 = vmatpush.msra.mxu3 %v2884_v44  ;;  %2949 = vmatpush.msrb.mxu0 %v2916_v33  ;;  %v2889_v43 = vld [vmem:[#allocation9 + $0x708] sm:$0xff]  ;;  %v3072_v44 = vld [vmem:[#allocation12 + $0x138] sm:$0xff]  ;;  %v3071_v33 = vld [vmem:[#allocation12 + $0x130] sm:$0xff] }
 0x239   : > { %2969 = vmatpush.msrb.mxu2 %v2885_v47  ;;  %2989 = vmatpush.msra.mxu1 %v2917_v16  ;;  %v3045_v47 = vld [vmem:[#allocation12 + $0x78] sm:$0xff]  ;;  %v3052_v0 = vld [vmem:[#allocation12 + $0xb0] sm:$0xff] }
 0x23a   : > { %2930 = vmatpush.msra.mxu3 %v2882_v60  ;;  %2950 = vmatpush.msrb.mxu0 %v2914_v15  ;;  %v3192_v16 = vld [vmem:[#allocation12 + $0x1f8] sm:$0xff]  ;;  %v3070_v60 = vld [vmem:[#allocation12 + $0x128] sm:$0xff]  ;;  %v3044_v15 = vld [vmem:[#allocation12 + $0x70] sm:$0xff] }
 0x23b   : > { %2970 = vmatpush.msrb.mxu2 %v2883_v49  ;;  %2990 = vmatpush.msra.mxu1 %v2915_v1  ;;  %v3191_v49 = vld [vmem:[#allocation12 + $0x1f0] sm:$0xff]  ;;  %v3069_v1 = vld [vmem:[#allocation12 + $0x120] sm:$0xff] }
 0x23c   : > { %2931 = vmatpush.msra.mxu3 %v2880_v18  ;;  %2951 = vmatpush.msrb.mxu0 %v2912_v10  ;;  %v3068_v18 = vld [vmem:[#allocation12 + $0x118] sm:$0xff]  ;;  %v3067_v10 = vld [vmem:[#allocation12 + $0x110] sm:$0xff] }
 0x23d   : > { %2971 = vmatpush.msrb.mxu2 %v2881_v52  ;;  %2991 = vmatpush.msra.mxu1 %v2913_v54  ;;  %v3043_v52 = vld [vmem:[#allocation12 + $0x68] sm:$0xff] }
 0x23e   : > { %2932 = vmatpush.msra.mxu3 %v2878_v48  ;;  %2952 = vmatpush.msrb.mxu0 %v2910_v53  ;;  %v3190_v54 = vld [vmem:[#allocation12 + $0x1e8] sm:$0xff]  ;;  %v3042_v53 = vld [vmem:[#allocation12 + $0x60] sm:$0xff] }
 0x23f   : > { %2972 = vmatpush.msrb.mxu2 %v2879_v57  ;;  %2992 = vmatpush.msra.mxu1 %v2911_v59  ;;  %v3066_v48 = vld [vmem:[#allocation12 + $0x108] sm:$0xff]  ;;  %v3189_v57 = vld [vmem:[#allocation12 + $0x1e0] sm:$0xff] }
 0x240   : > { %2933 = vmatpush.msra.mxu3 %v2876_v39  ;;  %2953 = vmatpush.msrb.mxu0 %v2908_v50  ;;  %v3065_v59 = vld [vmem:[#allocation12 + $0x100] sm:$0xff]  ;;  %v3041_v39 = vld [vmem:[#allocation12 + $0x58] sm:$0xff] }
 0x241   : > { %2973 = vmatpush.msrb.mxu2 %v2877_v61  ;;  %2993 = vmatpush.msra.mxu1 %v2909_v2  ;;  %v3188_v50 = vld [vmem:[#allocation12 + $0x1d8] sm:$0xff] }
 0x242   : > { %2934 = vmatpush.msra.mxu3 %v2874_v19  ;;  %2954 = vmatpush.msrb.mxu0 %v2906_v4  ;;  %v3064_v61 = vld [vmem:[#allocation12 + $0xf8] sm:$0xff]  ;;  %v3040_v19 = vld [vmem:[#allocation12 + $0x50] sm:$0xff] }
 0x243   : > { %2974 = vmatpush.msrb.mxu2 %v2875_v6  ;;  %2994 = vmatpush.msra.mxu1 %v2907_v7  ;;  %v3080_v2 = vld [vmem:[#allocation12 + $0x178] sm:$0xff]  ;;  %v3187_v4 = vld [vmem:[#allocation12 + $0x1d0] sm:$0xff] }
 0x244   : > { %2935 = vmatpush.msra.mxu3 %v2872_v8  ;;  %2955 = vmatpush.msrb.mxu0 %v2904_v13  ;;  %v3063_v6 = vld [vmem:[#allocation12 + $0xf0] sm:$0xff]  ;;  %v3039_v8 = vld [vmem:[#allocation12 + $0x48] sm:$0xff] }
 0x245   : > { %2975 = vmatpush.msrb.mxu2 %v2873_v51  ;;  %2995 = vmatpush.msra.mxu1 %v2905_v22  ;;  %v3079_v7 = vld [vmem:[#allocation12 + $0x170] sm:$0xff]  ;;  %v3186_v13 = vld [vmem:[#allocation12 + $0x1c8] sm:$0xff] }
 0x246   : > { %2936 = vmatpush.msra.mxu3 %v2870_v3  ;;  %2956 = vmatpush.msrb.mxu0 %v2902_v36  ;;  %v3062_v51 = vld [vmem:[#allocation12 + $0xe8] sm:$0xff]  ;;  %v3038_v3 = vld [vmem:[#allocation12 + $0x40] sm:$0xff] }
 0x247   : > { %2976 = vmatpush.msrb.mxu2 %v2871_v14  ;;  %2996 = vmatpush.msra.mxu1 %v2903_v45  ;;  %v3078_v22 = vld [vmem:[#allocation12 + $0x168] sm:$0xff]  ;;  %v3185_v36 = vld [vmem:[#allocation12 + $0x1c0] sm:$0xff] }
 0x248   : > { %2937 = vmatpush.msra.mxu3 %v2868_v55  ;;  %2957 = vmatpush.msrb.mxu0 %v2900_v20  ;;  %v3061_v55 = vld [vmem:[#allocation12 + $0xe0] sm:$0xff] }
 0x249   : > { %2977 = vmatpush.msrb.mxu2 %v2869_v26  ;;  %2997 = vmatpush.msra.mxu1 %v2901_v37  ;;  %v3077_v20 = vld [vmem:[#allocation12 + $0x160] sm:$0xff] }
 0x24a   : > { %2938 = vmatpush.msra.mxu3 %v2866_v24  ;;  %2958 = vmatpush.msrb.mxu0 %v2898_v25  ;;  %v3037_v24 = vld [vmem:[#allocation12 + $0x38] sm:$0xff] }
 0x24b   : > { %2978 = vmatpush.msrb.mxu2 %v2867_v12  ;;  %2998 = vmatpush.msra.mxu1 %v2899_v17  ;;  %v3184_v25 = vld [vmem:[#allocation12 + $0x1b8] sm:$0xff] }
 0x24c   : > { %2939 = vmatpush.msra.mxu3 %v2864_v58  ;;  %2959 = vmatpush.msrb.mxu0 %v2896_v23  ;;  %v3060_v12 = vld [vmem:[#allocation12 + $0xd8] sm:$0xff]  ;;  %v3036_v58 = vld [vmem:[#allocation12 + $0x30] sm:$0xff] }
 0x24d   : > { %2979 = vmatpush.msrb.mxu2 %v2865_v29  ;;  %2999 = vmatpush.msra.mxu1 %v2897_v40  ;;  %v3076_v17 = vld [vmem:[#allocation12 + $0x158] sm:$0xff]  ;;  %v3183_v23 = vld [vmem:[#allocation12 + $0x1b0] sm:$0xff] }
 0x24e   : > { %2940 = vmatpush.msra.mxu3 %v2862_v62  ;;  %2960 = vmatpush.msrb.mxu0 %v2894_v27  ;;  %v3059_v29 = vld [vmem:[#allocation12 + $0xd0] sm:$0xff]  ;;  %v3035_v62 = vld [vmem:[#allocation12 + $0x28] sm:$0xff] }
 0x24f   : > { %2980 = vmatpush.msrb.mxu2 %v2863_v46  ;;  %3000 = vmatpush.msra.mxu1 %v2895_v56  ;;  %v3075_v40 = vld [vmem:[#allocation12 + $0x150] sm:$0xff]  ;;  %v3182_v27 = vld [vmem:[#allocation12 + $0x1a8] sm:$0xff] }
 0x250   : > { %2941 = vmatpush.msra.mxu3 %v2860_v28  ;;  %2961 = vmatpush.msrb.mxu0 %v2892_v21  ;;  %v3058_v46 = vld [vmem:[#allocation12 + $0xc8] sm:$0xff]  ;;  %v3034_v28 = vld [vmem:[#allocation12 + $0x20] sm:$0xff] }
 0x251   : > { %2981 = vmatpush.msrb.mxu2 %v2861_v9  ;;  %3001 = vmatpush.msra.mxu1 %v2893_v31  ;;  %v3074_v56 = vld [vmem:[#allocation12 + $0x148] sm:$0xff]  ;;  %v3181_v21 = vld [vmem:[#allocation12 + $0x1a0] sm:$0xff] }
 0x252   : > { %2942 = vmatpush.msra.mxu3 %v2858_v34  ;;  %2962 = vmatpush.msrb.mxu0 %v2890_v32  ;;  %v3057_v9 = vld [vmem:[#allocation12 + $0xc0] sm:$0xff]  ;;  %v3033_v34 = vld [vmem:[#allocation12 + $0x18] sm:$0xff] }
 0x253   : > { %2982 = vmatpush.msrb.mxu2 %v2859_v35  ;;  %3002 = vmatpush.msra.mxu1 %v2891_v38  ;;  %v3073_v31 = vld [vmem:[#allocation12 + $0x140] sm:$0xff]  ;;  %v3053_v32 = vld [vmem:[#allocation12 + $0xb8] sm:$0xff] }
 0x254   : > { %2943 = vmatpush.msra.mxu3 %v2856_v41  ;;  %2963 = vmatpush.msrb.mxu0 %v2888_v63  ;;  %v3180_v35 = vld [vmem:[#allocation12 + $0x198] sm:$0xff] }
 0x255   : > { %2983 = vmatpush.msrb.mxu2 %v2857_v42  ;;  %3003 = vmatpush.msra.mxu1 %v2889_v43  ;;  %v3200_v38 = vld [vmem:[#allocation12 + $0x238] sm:$0xff]  ;;  %v3179_v42 = vld [vmem:[#allocation12 + $0x190] sm:$0xff] }
 0x256   : > { %2944 = vmatmul.f32.vlgmr.msra.gmra.mxu3 %v2924_v5  ;;  %2964 = vmatmul.f32.vlgmr.msrb.gmra.mxu0 %v2925_v11  ;;  %v3199_v43 = vld [vmem:[#allocation12 + $0x230] sm:$0xff] }
 0x257   : > { %2984 = vmatmul.f32.vlgmr.msrb.gmra.mxu2 %v2924_v5  ;;  %3004 = vmatmul.f32.vlgmr.msra.gmra.mxu1 %v2925_v11 }
 0x258   : > { %3088 = vmatpush.msrb.mxu3 %v3072_v44  ;;  %3134 = vmatpush.msra.mxu2 %v3045_v47  ;;  %v3031_v44 = vld [vmem:[#allocation12 + $0x8] sm:$0xff] }
 0x259   : > { %3207 = vmatpush.msrb.mxu1 %v3192_v16  ;;  %3116 = vmatpush.msra.mxu0 %v3080_v2  ;;  %v3178_v47 = vld [vmem:[#allocation12 + $0x188] sm:$0xff] }
 0x25a   : > { %3089 = vmatpush.msrb.mxu3 %v3071_v33  ;;  %3135 = vmatpush.msra.mxu2 %v3044_v15  ;;  %v3051_v33 = vld [vmem:[#allocation12 + $0xa8] sm:$0xff]  ;;  %v3050_v15 = vld [vmem:[#allocation12 + $0xa0] sm:$0xff] }
 0x25b   : > { %3208 = vmatpush.msrb.mxu1 %v3191_v49  ;;  %3117 = vmatpush.msra.mxu0 %v3079_v7  ;;  %v3198_v16 = vld [vmem:[#allocation12 + $0x228] sm:$0xff]  ;;  %v3177_v49 = vld [vmem:[#allocation12 + $0x180] sm:$0xff] }
 0x25c   : > { %3090 = vmatpush.msrb.mxu3 %v3070_v60  ;;  %3136 = vmatpush.msra.mxu2 %v3043_v52  ;;  %v3030_v60 = vld [vmem:[#allocation12] sm:$0xff]  ;;  %v3047_v2 = vld [vmem:[#allocation12 + $0x88] sm:$0xff] }
 0x25d   : > { %3209 = vmatpush.msrb.mxu1 %v3190_v54  ;;  %3118 = vmatpush.msra.mxu0 %v3078_v22  ;;  %v3046_v7 = vld [vmem:[#allocation12 + $0x80] sm:$0xff]  ;;  %v3010_v22 = vld [vmem:[#allocation10] sm:$0x3] }
 0x25e   : > { %3091 = vmatpush.msrb.mxu3 %v3069_v1  ;;  %3137 = vmatpush.msra.mxu2 %v3042_v53  ;;  %v3197_v1 = vld [vmem:[#allocation12 + $0x220] sm:$0xff]  ;;  %v3049_v53 = vld [vmem:[#allocation12 + $0x98] sm:$0xff] }
 0x25f   : > { %3210 = vmatpush.msrb.mxu1 %v3189_v57  ;;  %3119 = vmatpush.msra.mxu0 %v3077_v20  ;;  %v3196_v57 = vld [vmem:[#allocation12 + $0x218] sm:$0xff] }
 0x260   : > { %3092 = vmatpush.msrb.mxu3 %v3068_v18  ;;  %3138 = vmatpush.msra.mxu2 %v3041_v39 }
 0x261   : > { %3211 = vmatpush.msrb.mxu1 %v3188_v50  ;;  %3120 = vmatpush.msra.mxu0 %v3076_v17  ;;  %v3195_v50 = vld [vmem:[#allocation12 + $0x210] sm:$0xff] }
 0x262   : > { %3093 = vmatpush.msrb.mxu3 %v3067_v10  ;;  %3139 = vmatpush.msra.mxu2 %v3040_v19  ;;  %v3194_v19 = vld [vmem:[#allocation12 + $0x208] sm:$0xff] }
 0x263   : > { %3212 = vmatpush.msrb.mxu1 %v3187_v4  ;;  %3121 = vmatpush.msra.mxu0 %v3075_v40 }
 0x264   : > { %3094 = vmatpush.msrb.mxu3 %v3066_v48  ;;  %3140 = vmatpush.msra.mxu2 %v3039_v8  ;;  %v3193_v8 = vld [vmem:[#allocation12 + $0x200] sm:$0xff] }
 0x265   : > { %3213 = vmatpush.msrb.mxu1 %v3186_v13  ;;  %3122 = vmatpush.msra.mxu0 %v3074_v56 }
 0x266   : > { %3095 = vmatpush.msrb.mxu3 %v3065_v59  ;;  %3141 = vmatpush.msra.mxu2 %v3038_v3  ;;  %v3048_v59 = vld [vmem:[#allocation12 + $0x90] sm:$0xff] }
 0x267   : > { %3214 = vmatpush.msrb.mxu1 %v3185_v36  ;;  %3123 = vmatpush.msra.mxu0 %v3073_v31 }
 0x268   : > { %3096 = vmatpush.msrb.mxu3 %v3064_v61  ;;  %3142 = vmatpush.msra.mxu2 %v3037_v24  ;;  %v3012_v24 = vperm.slane %v3010_v22, 0 }
 0x269   : > { %3215 = vmatpush.msrb.mxu1 %v3184_v25  ;;  %3162 = vmatpush.msrb.mxu0 %v3053_v32 }
 0x26a   : > { %3097 = vmatpush.msrb.mxu3 %v3063_v6  ;;  %3143 = vmatpush.msra.mxu2 %v3036_v58 }
 0x26b   : > { %3216 = vmatpush.msrb.mxu1 %v3183_v23  ;;  %3163 = vmatpush.msrb.mxu0 %v3052_v0 }
 0x26c   : > { %3098 = vmatpush.msrb.mxu3 %v3062_v51  ;;  %3144 = vmatpush.msra.mxu2 %v3035_v62 }
 0x26d   : > { %3217 = vmatpush.msrb.mxu1 %v3182_v27  ;;  %3164 = vmatpush.msrb.mxu0 %v3051_v33 }
 0x26e   : > { %3099 = vmatpush.msrb.mxu3 %v3061_v55  ;;  %3145 = vmatpush.msra.mxu2 %v3034_v28 }
 0x26f   : > { %3218 = vmatpush.msrb.mxu1 %v3181_v21  ;;  %3165 = vmatpush.msrb.mxu0 %v3050_v15 }
 0x270   : > { %3100 = vmatpush.msrb.mxu3 %v3060_v12  ;;  %3146 = vmatpush.msra.mxu2 %v3033_v34  ;;  %v3013_v12 = vperm.slane %v3010_v22, 1 }
 0x271   : > { %3219 = vmatpush.msrb.mxu1 %v3180_v35  ;;  %3166 = vmatpush.msrb.mxu0 %v3049_v53 }
 0x272   : > { %3101 = vmatpush.msrb.mxu3 %v3059_v29  ;;  %3147 = vmatpush.msra.mxu2 %v3032_v30 }
 0x273   : > { %3220 = vmatpush.msrb.mxu1 %v3179_v42  ;;  %3167 = vmatpush.msrb.mxu0 %v3048_v59 }
 0x274   : > { %3102 = vmatpush.msrb.mxu3 %v3058_v46  ;;  %3148 = vmatpush.msra.mxu2 %v3031_v44 }
 0x275   : > { %3221 = vmatpush.msrb.mxu1 %v3178_v47  ;;  %3168 = vmatpush.msrb.mxu0 %v3047_v2  ;;  %v3248_v47 = vld [vmem:[#allocation13] sm:$0x1] }
 0x276   : > { %3103 = vmatpush.msrb.mxu3 %v3057_v9  ;;  %3149 = vmatpush.msra.mxu2 %v3030_v60 }
 0x277   : > { %3222 = vmatpush.msrb.mxu1 %v3177_v49  ;;  %3169 = vmatpush.msrb.mxu0 %v3046_v7 }
 0x278   : > { %3235 = vmatpush.msra.mxu3 %v3200_v38 }
 0x27a   : > { %3236 = vmatpush.msra.mxu3 %v3199_v43 }
 0x27c   : > { %3237 = vmatpush.msra.mxu3 %v3198_v16 }
 0x27e   : > { %3238 = vmatpush.msra.mxu3 %v3197_v1 }
 0x280   : > { %3239 = vmatpush.msra.mxu3 %v3196_v57 }
 0x282   : > { %3240 = vmatpush.msra.mxu3 %v3195_v50 }
 0x284   : > { %3241 = vmatpush.msra.mxu3 %v3194_v19 }
 0x286   : > { %3242 = vmatpush.msra.mxu3 %v3193_v8 }
 0x28d   : > { %v4259_v14 = vpop.f32.mrf.mxu0 }
 0x28e   : > { %v4263_v26 = vpop.f32.mrf.mxu1 }
 0x293   : > { %v4261_v45 = vpop.f32.mrf.mxu3 }
 0x294   : > { %v4265_v37 = vpop.f32.mrf.mxu2  ;;  %v2570_v52 = vadd.f32 %v4259_v14, %v4261_v45 }
 0x295   : > { %v2610_v39 = vadd.f32 %v4263_v26, %v4265_v37 }
 0x297   : > { %v2655_v41 = vpop.f32.mrf.mxu0 }
 0x298   : > { %v2695_v5 = vpop.f32.mrf.mxu1 }
 0x29d   : > { %v2635_v63 = vpop.f32.mrf.mxu3 }
 0x29e   : > { %v2675_v11 = vpop.f32.mrf.mxu2  ;;  %v2636_v61 = vadd.f32 %v2635_v63, %v2570_v52 }
 0x29f   : > { %v2676_v4 = vadd.f32 %v2675_v11, %v2610_v39 }
 0x2a0   : > { %v2656_v51 = vadd.f32 %v2655_v41, %v2636_v61 }
 0x2a1   : > { %v2696_v3 = vadd.f32 %v2695_v5, %v2676_v4 }
 0x2b1   : > { %v2809_v18 = vpop.f32.mrf.mxu0 }
 0x2b2   : > { %v2849_v54 = vpop.f32.mrf.mxu1 }
 0x2b7   : > { %v2789_v10 = vpop.f32.mrf.mxu3 }
 0x2b8   : > { %v2829_v48 = vpop.f32.mrf.mxu2  ;;  %v2810_v6 = vadd.f32 %v2809_v18, %v2789_v10 }
 0x2b9   : > { %v2850_v13 = vadd.f32 %v2849_v54, %v2829_v48 }
 0x2ba   : > { %v2852_v45 = vadd.f32 %v2810_v6, %v2656_v51 }
 0x2bb   : > { %v2853_v37 = vadd.f32 %v2850_v13, %v2696_v3 }
 0x2d3   : > { %v2965_v36 = vpop.f32.mrf.mxu0 }
 0x2d4   : > { %v3005_v55 = vpop.f32.mrf.mxu1 }
 0x2d9   : > { %v2945_v14 = vpop.f32.mrf.mxu3 }
 0x2da   : > { %v2966_v20 = vadd.f32 %v2965_v36, %v2945_v14  ;;  %v2985_v26 = vpop.f32.mrf.mxu2 }
 0x2db   : > { %v3006_v25 = vadd.f32 %v3005_v55, %v2985_v26 }
 0x2dc   : > { %v3008_v17 = vadd.f32 %v2966_v20, %v2852_v45 }
 0x2dd   : > { %v3009_v58 = vadd.f32 %v3006_v25, %v2853_v37 }
 0x2de   : > { %v3016_v23 = vadd.f32 %v3012_v24, %v3008_v17 }
 0x2df   : > { %v3017_v29 = vadd.f32 %v3013_v12, %v3009_v58 }
 0x2e0   : > { %v3018_v62 = vmax.f32 %v3016_v23, 0.0 }
 0x2e1   : > { %v3019_v40 = vmax.f32 %v3017_v29, 0.0 }
 0x2e3   : > { %v3022_v27 = vrot.slane %v3019_v40, 4 }
 0x2e5   : > { %v3023_v46 = vsel %vm1378_vm1, %v3018_v62, %v3022_v27 }
 0x2e6   : > { %3028 = vst.msk [vmem:[#allocation3] sm:$0x77] %vm3027_vm4, %v3023_v46 }
 0x2ed   : > { %v3055_v56 = vld [vmem:[#allocation3 + $0x1] ss:$4 sm:$0x3]  ;;  %v3029_v28 = vld [vmem:[#allocation3] ss:$4 sm:$0x3] }
 0x2ee   : > { %v3082_v21 = vperm.slane %v3055_v56, 0  ;;  %v3083_v9 = vperm.slane %v3055_v56, 1  ;;  %v3129_v31 = vperm.slane %v3029_v28, 0  ;;  %v3175_v34 = vld [vmem:[#allocation3 + $0x2] ss:$4 sm:$0x3] }
 0x2ef   : > { %v3202_v32 = vperm.slane %v3175_v34, 0  ;;  %v3130_v35 = vperm.slane %v3029_v28, 1  ;;  %v3203_v38 = vperm.slane %v3175_v34, 1 }
 0x2f0   : > { %3104 = vmatmul.f32.vlgmr.msrb.gmra.mxu3 %v3082_v21  ;;  %3459 = vmatmul.msk.f32.vlgmr.msra.gmra.mxu0 %vm3085_vm5, %v3083_v9 }
 0x2f1   : > { %3150 = vmatmul.f32.vlgmr.msra.gmra.mxu2 %v3129_v31  ;;  %3223 = vmatmul.f32.vlgmr.msrb.gmra.mxu1 %v3202_v32 }
 0x2f8   : > { %3460 = vmatmul.msk.f32.vlgmr.msrb.gmra.mxu0 %vm3085_vm5, %v3130_v35  ;;  %3461 = vmatmul.msk.f32.vlgmr.msra.gmra.mxu3 %vm3085_vm5, %v3203_v38 }
 0x36d   : > { %v3125_v30 = vpop.f32.mrf.mxu0 }
 0x36e   : > { %v3224_v43 = vpop.f32.mrf.mxu1 }
 0x373   : > { %v3105_v41 = vpop.f32.mrf.mxu3 }
 0x374   : > { %v3126_v63 = vadd.f32 %v3125_v30, %v3105_v41  ;;  %v3151_v0 = vpop.f32.mrf.mxu2 }
 0x375   : > { %v3171_v5 = vpop.f32.mrf.mxu0 }
 0x376   : > { %v3152_v42 = vadd.f32 %v3151_v0, %v3126_v63 }
 0x378   : > { %v3172_v44 = vadd.f32 %v3171_v5, %v3152_v42 }
 0x37b   : > { %v3244_v11 = vpop.f32.mrf.mxu3 }
 0x37c   : > { %v3245_v33 = vadd.f32 %v3244_v11, %v3224_v43 }
 0x37e   : > { %v3247_v16 = vadd.f32 %v3245_v33, %v3172_v44 }
 0x380   : > { %v3249_v60 = vadd.f32 %v3248_v47, %v3247_v16 }
 0x382   : > { %v3250_v15 = vmax.f32 %v3249_v60, 0.0 }
 0x384   : > { %3252 = vst.msk [vmem:[%s364_s14] sm:$0x1] %vm3251_vm6, %v3250_v15 }
 0x385   : > { %3776 = shalt.err (!%p3773_p8)
}
 0x386   : > { %3489 = dma.vmem_to_hbm [thread:$0]  (%p3917_p5), %s3265_s15, 16, %s3267_s19, %s3254_s20  }
 0x387 PF: > { %p3526_p9 = scmp.ge.s32.totalorder %s3827_s27, 2  ;;  %s3278_s4 = sand.u32 1, %s3815_s24  }
 0x388   : > { %s3279_s13 = scalar_lea.sflag [#allocation6], %s3278_s4 }
 0x389   : > { %p3511_p10 = pnand %p3526_p9, %p3921_p6 }
 0x38b   : > { %p3512_p11 = pneg %p3511_p10 }
 0x38d   : > { %3810 = dma.done.wait (%p3512_p11), %s3279_s13, 16  }
 0x38e   : > { %3812 = vsyncadd (%p3512_p11), %s3279_s13, 4294967280  ;;  %p21_p12 = scmp.ge.s32.totalorder %s3904_s30, 4   ;;  %s4322_s24 = smov %s3819_s25 }
 0x38f   : > { %s4323_s25 = smov %s3823_s26  ;;  %s4324_s26 = smov %s3915_s10 }
 0x390   : > { %s4325_s27 = smov %s3904_s30  ;;  %23 = sbr.rel (!%p21_p12) target bundleno = 11 (0xb), region = 130 }
 0x395   :  { %3284 = vsyncpa [#allocation5], 1 }
 0x396   :  { %3286 = vsyncpa [#allocation5 + $0x1], 1 }
 0x397   :  { %3287 = vsyncpa [#allocation8], 1 }
 0x398   :  { %3288 = vsyncpa [#allocation11], 1 }
 0x399   :  { %3289 = vsyncpa [#allocation14], 1 }
 0x39a   :  { %3290 = vsyncpa [#allocation6], 1 }
 0x39b   :  { %3292 = vsyncpa [#allocation6 + $0x1], 1 }

</bundles_post_ra>
